<compile_context>
chip_gen: v6e
topology: v6e:2x2x1
jax: 0.10.0
libtpu: 0.0.40
codegen_flags: <defaults>
</compile_context>

<pallas_src>
import math
import numpy as np
import jax
import jax.numpy as jnp
from jax.experimental import pallas as pl
from jax.experimental.pallas import tpu as pltpu

# ---- model hyper-parameters (small, consistent with the module) -------------
B, S, D = 2, 8, 32          # batch, sequence length, d_model
NHEAD = 4
HD = D // NHEAD             # head dim
FF = 64                     # dim_feedforward
NUM_LAYERS = 3
EPS = 1e-5
N = B * S                   # flattened token rows


# ---- math helpers (used both inside the Pallas kernel and in the reference) -
def _layernorm(x, gamma, beta):
    mu = jnp.mean(x, axis=-1, keepdims=True)
    var = jnp.mean((x - mu) ** 2, axis=-1, keepdims=True)
    return (x - mu) * jax.lax.rsqrt(var + EPS) * gamma + beta


# ---- Pallas kernel: whole encoder stack for one block of batch elements -----
def make_encoder_kernel(nb):
    """nb = token rows per grid block (= batch_elements_per_block * S)."""
    bb = nb // S            # batch elements handled by this block
    g = bb * NHEAD          # attention batch dim (batch * heads)

    def kernel(src_ref, wqkv_ref, wo_ref, w1_ref, w2_ref,
               bqkv_ref, b1_ref, vecd_ref, out_ref):
        x = src_ref[...]                       # (nb, D) f32

        # Weights: separate bf16 inputs (no slab slicing); softmax scale is
        # already folded into the Q columns of w_qkv / bqkv.
        w_qkv = wqkv_ref[...]                  # (D, 3D) bf16
        w_o = wo_ref[...]                      # (D, D)  bf16
        w_1 = w1_ref[...]                      # (D, FF) bf16
        w_2 = w2_ref[...]                      # (FF, D) bf16

        # Hoist all (1, X) -> (nb, X) broadcasts out of the unrolled layer loop
        # (JAX does not CSE broadcast_in_dim).
        bqkv_b = jnp.broadcast_to(bqkv_ref[...], (nb, 3 * D))
        b1_b = jnp.broadcast_to(b1_ref[...], (nb, FF))
        vecd = vecd_ref[...]                   # (8, D) f32 rows: bo,b2,g1,be1,g2,be2,gf,bef
        bo_b = jnp.broadcast_to(vecd[0:1], (nb, D))
        b2_b = jnp.broadcast_to(vecd[1:2], (nb, D))
        g1_b = jnp.broadcast_to(vecd[2:3], (nb, D))
        be1_b = jnp.broadcast_to(vecd[3:4], (nb, D))
        g2_b = jnp.broadcast_to(vecd[4:5], (nb, D))
        be2_b = jnp.broadcast_to(vecd[5:6], (nb, D))
        gf_b = jnp.broadcast_to(vecd[6:7], (nb, D))
        bef_b = jnp.broadcast_to(vecd[7:8], (nb, D))

        def one_layer(x):
            xb = x.astype(jnp.bfloat16)
            # Fused QKV projection: one MXU pass, f32 accumulation.
            qkv = jnp.dot(xb, w_qkv, preferred_element_type=jnp.float32) + bqkv_b
            qkv_b = qkv.astype(jnp.bfloat16)

            # (nb, 3D) -> (bb, 3*NHEAD, S, HD): one reshape + one transpose,
            # then collapse (batch, head) into a single leading batch dim.
            qkv4 = jnp.swapaxes(qkv_b.reshape(bb, S, 3 * NHEAD, HD), 1, 2)
            qg = qkv4[:, 0 * NHEAD:1 * NHEAD].reshape(g, S, HD)
            kg = qkv4[:, 1 * NHEAD:2 * NHEAD].reshape(g, S, HD)
            vg = qkv4[:, 2 * NHEAD:3 * NHEAD].reshape(g, S, HD)

            # Scores: scale pre-folded into Q, batch separation via batch dim
            # (no additive mask needed).
            s = jnp.einsum('gqd,gkd->gqk', qg, kg,
                           preferred_element_type=jnp.float32)        # (g, S, S)
            s = s - jnp.max(s, axis=-1, keepdims=True)
            p = jnp.exp(s)
            p = p * pl.reciprocal(jnp.sum(p, axis=-1, keepdims=True), approx=True)
            og = jnp.einsum('gqk,gkd->gqd', p.astype(jnp.bfloat16), vg,
                            preferred_element_type=jnp.float32)       # (g, S, HD)

            # Merge heads with a single transpose + reshape.
            attn = jnp.swapaxes(og.reshape(bb, NHEAD, S, HD), 1, 2).reshape(nb, D)
            attn = jnp.dot(attn.astype(jnp.bfloat16), w_o,
                           preferred_element_type=jnp.float32) + bo_b

            y = _layernorm(x + attn, g1_b, be1_b)
            h1 = jnp.maximum(
                jnp.dot(y.astype(jnp.bfloat16), w_1,
                        preferred_element_type=jnp.float32) + b1_b, 0.0)
            ff = jnp.dot(h1.astype(jnp.bfloat16), w_2,
                         preferred_element_type=jnp.float32) + b2_b
            return _layernorm(y + ff, g2_b, be2_b)

        # Shared-weight stack: same layer applied NUM_LAYERS times (static unroll).
        for _ in range(NUM_LAYERS):
            x = one_layer(x)

        # final norm (self.norm is a LayerNorm here)
        out_ref[...] = _layernorm(x, gf_b, bef_b)

    return kernel


# ---- parameter packing (18 logical arrays -> 8 kernel inputs) ----------------
def pack_params(params):
    (wq, bq, wk, bk, wv, bv, wo, bo, w1, b1, w2, b2,
     g1, be1, g2, be2, gf, bef) = params
    scale = 1.0 / math.sqrt(HD)
    # Fold softmax scale into the Q projection (weights and bias).
    w_qkv = jnp.concatenate([wq * scale, wk, wv], axis=1).astype(jnp.bfloat16)
    bqkv = jnp.concatenate([bq * scale, bk, bv], axis=1)            # (1, 3D) f32
    vecd = jnp.concatenate([bo, b2, g1, be1, g2, be2, gf, bef], 0)  # (8, D) f32
    return (w_qkv, wo.astype(jnp.bfloat16), w1.astype(jnp.bfloat16),
            w2.astype(jnp.bfloat16), bqkv, b1, vecd)


def transformer_encoder_pallas(src, params, *, batch_blocks=1):
    """src: (B, S, D) f32; params: tuple of 18 arrays (see init_params).

    batch_blocks=1: one kernel invocation (best on single-TC v5e/v6e).
    batch_blocks=2: grid over batch with "parallel" semantics (both TCs on v7x).
    """
    assert B % batch_blocks == 0
    nb = (B // batch_blocks) * S
    w_qkv, w_o, w_1, w_2, bqkv, b1, vecd = pack_params(params)
    src2d = src.reshape(N, D)

    def full(a):
        return pl.BlockSpec(a.shape, lambda i: (0, 0))

    out2d = pl.pallas_call(
        make_encoder_kernel(nb),
        out_shape=jax.ShapeDtypeStruct((N, D), jnp.float32),
        grid=(batch_blocks,),
        in_specs=[
            pl.BlockSpec((nb, D), lambda i: (i, 0)),
            full(w_qkv), full(w_o), full(w_1), full(w_2),
            full(bqkv), full(b1), full(vecd),
        ],
        out_specs=pl.BlockSpec((nb, D), lambda i: (i, 0)),
        compiler_params=pltpu.CompilerParams(
            dimension_semantics=("parallel",)),
    )(src2d, w_qkv, w_o, w_1, w_2, bqkv, b1, vecd)
    return out2d.reshape(B, S, D)


# ---- deterministic parameter init (shapes implied by the encoder layer) -----
def init_params(key):
    ks = jax.random.split(key, 12)

    def lin_w(k, fan_in, shape):
        return jax.random.normal(k, shape, jnp.float32) / math.sqrt(fan_in)

    wq = lin_w(ks[0], D, (D, D)); bq = 0.01 * jax.random.normal(ks[1], (1, D), jnp.float32)
    wk = lin_w(ks[2], D, (D, D)); bk = 0.01 * jax.random.normal(ks[3], (1, D), jnp.float32)
    wv = lin_w(ks[4], D, (D, D)); bv = 0.01 * jax.random.normal(ks[5], (1, D), jnp.float32)
    wo = lin_w(ks[6], D, (D, D)); bo = 0.01 * jax.random.normal(ks[7], (1, D), jnp.float32)
    w1 = lin_w(ks[8], D, (D, FF)); b1 = 0.01 * jax.random.normal(ks[9], (1, FF), jnp.float32)
    w2 = lin_w(ks[10], FF, (FF, D)); b2 = 0.01 * jax.random.normal(ks[11], (1, D), jnp.float32)
    g1 = jnp.ones((1, D), jnp.float32); be1 = jnp.zeros((1, D), jnp.float32)
    g2 = jnp.ones((1, D), jnp.float32); be2 = jnp.zeros((1, D), jnp.float32)
    gf = jnp.ones((1, D), jnp.float32); bef = jnp.zeros((1, D), jnp.float32)
    return (wq, bq, wk, bk, wv, bv, wo, bo, w1, b1, w2, b2,
            g1, be1, g2, be2, gf, bef)


# ---- pure-JAX f32 reference (per-batch, per-head) for a sanity check --------
def _encoder_layer_ref(x, wq, bq, wk, bk, wv, bv, wo, bo,
                       w1, b1, w2, b2, g1, be1, g2, be2):
    q = jnp.dot(x, wq) + bq
    k = jnp.dot(x, wk) + bk
    v = jnp.dot(x, wv) + bv
    scale = 1.0 / math.sqrt(HD)
    heads = []
    for h in range(NHEAD):
        qh = q[:, h * HD:(h + 1) * HD]
        kh = k[:, h * HD:(h + 1) * HD]
        vh = v[:, h * HD:(h + 1) * HD]
        s = jnp.dot(qh, kh.T) * scale
        s = s - jnp.max(s, axis=-1, keepdims=True)
        p = jnp.exp(s)
        p = p / jnp.sum(p, axis=-1, keepdims=True)
        heads.append(jnp.dot(p, vh))
    attn = jnp.concatenate(heads, axis=-1)
    attn = jnp.dot(attn, wo) + bo
    x = _layernorm(x + attn, g1, be1)
    h1 = jnp.maximum(jnp.dot(x, w1) + b1, 0.0)
    ff = jnp.dot(h1, w2) + b2
    return _layernorm(x + ff, g2, be2)


def reference_forward(src, params):
    layer_params = params[:16]
    gf, bef = params[16], params[17]

    def one(x):
        for _ in range(NUM_LAYERS):
            x = _encoder_layer_ref(x, *layer_params)
        return _layernorm(x, gf, bef)

    return jax.vmap(one)(src)


if __name__ == "__main__":
    key = jax.random.PRNGKey(0)
    k_src, k_par = jax.random.split(key)
    src = jax.random.normal(k_src, (B, S, D), jnp.float32)
    params = init_params(k_par)

    ref = jax.block_until_ready(reference_forward(src, params))

    # Single-invocation path (v5e/v6e single TensorCore).
    out1 = jax.block_until_ready(transformer_encoder_pallas(src, params))
    assert out1.shape == (B, S, D)
    np.testing.assert_allclose(np.asarray(out1), np.asarray(ref),
                               rtol=3e-2, atol=3e-2)

    # Grid-over-batch path (uses both TensorCores on v7x; still correct on 1-TC chips).
    out2 = jax.block_until_ready(
        transformer_encoder_pallas(src, params, batch_blocks=2))
    np.testing.assert_allclose(np.asarray(out2), np.asarray(ref),
                               rtol=3e-2, atol=3e-2)

    print("KERNEL_OK")
</pallas_src>

<mosaic_0001>
module attributes {stable_mosaic.version = 11 : i64} {
  func.func @kernel(%arg0: i32, %arg1: memref<16x32xf32, #tpu.memory_space<vmem>>, %arg2: memref<32x96xbf16, #tpu.memory_space<vmem>>, %arg3: memref<32x32xbf16, #tpu.memory_space<vmem>>, %arg4: memref<32x64xbf16, #tpu.memory_space<vmem>>, %arg5: memref<64x32xbf16, #tpu.memory_space<vmem>>, %arg6: memref<1x96xf32, #tpu.memory_space<vmem>>, %arg7: memref<1x64xf32, #tpu.memory_space<vmem>>, %arg8: memref<8x32xf32, #tpu.memory_space<vmem>>, %arg9: memref<16x32xf32, #tpu.memory_space<vmem>>) attributes {dimension_semantics = [#tpu.dimension_semantics<parallel>], iteration_bounds = array<i64: 1>, scalar_prefetch = 0 : i64, scratch_operands = 0 : i64, tpu.core_type = #tpu.core_type<tc>, window_params = [{transform_indices = @transform_0, window_bounds = array<i64: 16, 32>}, {pipeline_mode = #tpu.pipeline_mode<synchronous>, transform_indices = @transform_1, window_bounds = array<i64: 32, 96>}, {pipeline_mode = #tpu.pipeline_mode<synchronous>, transform_indices = @transform_2, window_bounds = array<i64: 32, 32>}, {pipeline_mode = #tpu.pipeline_mode<synchronous>, transform_indices = @transform_3, window_bounds = array<i64: 32, 64>}, {pipeline_mode = #tpu.pipeline_mode<synchronous>, transform_indices = @transform_4, window_bounds = array<i64: 64, 32>}, {pipeline_mode = #tpu.pipeline_mode<synchronous>, transform_indices = @transform_5, window_bounds = array<i64: 1, 96>}, {pipeline_mode = #tpu.pipeline_mode<synchronous>, transform_indices = @transform_6, window_bounds = array<i64: 1, 64>}, {pipeline_mode = #tpu.pipeline_mode<synchronous>, transform_indices = @transform_7, window_bounds = array<i64: 8, 32>}, {transform_indices = @transform_8, window_bounds = array<i64: 16, 32>}]} {
    %c0 = arith.constant 0 : index
    %c0_0 = arith.constant 0 : index
    %0 = vector.load %arg1[%c0, %c0_0] : memref<16x32xf32, #tpu.memory_space<vmem>>, vector<16x32xf32>
    %c0_1 = arith.constant 0 : index
    %c0_2 = arith.constant 0 : index
    %1 = vector.load %arg2[%c0_1, %c0_2] : memref<32x96xbf16, #tpu.memory_space<vmem>>, vector<32x96xbf16>
    %c0_3 = arith.constant 0 : index
    %c0_4 = arith.constant 0 : index
    %2 = vector.load %arg3[%c0_3, %c0_4] : memref<32x32xbf16, #tpu.memory_space<vmem>>, vector<32x32xbf16>
    %c0_5 = arith.constant 0 : index
    %c0_6 = arith.constant 0 : index
    %3 = vector.load %arg4[%c0_5, %c0_6] : memref<32x64xbf16, #tpu.memory_space<vmem>>, vector<32x64xbf16>
    %c0_7 = arith.constant 0 : index
    %c0_8 = arith.constant 0 : index
    %4 = vector.load %arg5[%c0_7, %c0_8] : memref<64x32xbf16, #tpu.memory_space<vmem>>, vector<64x32xbf16>
    %c0_9 = arith.constant 0 : index
    %c0_10 = arith.constant 0 : index
    %5 = vector.load %arg6[%c0_9, %c0_10] : memref<1x96xf32, #tpu.memory_space<vmem>>, vector<1x96xf32>
    %6 = vector.shape_cast %5 : vector<1x96xf32> to vector<1x96xf32>
    %7 = vector.broadcast %6 : vector<1x96xf32> to vector<16x96xf32>
    %c0_11 = arith.constant 0 : index
    %c0_12 = arith.constant 0 : index
    %8 = vector.load %arg7[%c0_11, %c0_12] : memref<1x64xf32, #tpu.memory_space<vmem>>, vector<1x64xf32>
    %9 = vector.shape_cast %8 : vector<1x64xf32> to vector<1x64xf32>
    %10 = vector.broadcast %9 : vector<1x64xf32> to vector<16x64xf32>
    %c0_13 = arith.constant 0 : index
    %c0_14 = arith.constant 0 : index
    %11 = vector.load %arg8[%c0_13, %c0_14] : memref<8x32xf32, #tpu.memory_space<vmem>>, vector<8x32xf32>
    %12 = vector.extract_strided_slice %11 {offsets = [0, 0], sizes = [1, 32], strides = [1, 1]} : vector<8x32xf32> to vector<1x32xf32>
    %13 = vector.shape_cast %12 : vector<1x32xf32> to vector<1x32xf32>
    %14 = vector.broadcast %13 : vector<1x32xf32> to vector<16x32xf32>
    %15 = vector.extract_strided_slice %11 {offsets = [1, 0], sizes = [1, 32], strides = [1, 1]} : vector<8x32xf32> to vector<1x32xf32>
    %16 = vector.shape_cast %15 : vector<1x32xf32> to vector<1x32xf32>
    %17 = vector.broadcast %16 : vector<1x32xf32> to vector<16x32xf32>
    %18 = vector.extract_strided_slice %11 {offsets = [2, 0], sizes = [1, 32], strides = [1, 1]} : vector<8x32xf32> to vector<1x32xf32>
    %19 = vector.shape_cast %18 : vector<1x32xf32> to vector<1x32xf32>
    %20 = vector.broadcast %19 : vector<1x32xf32> to vector<16x32xf32>
    %21 = vector.extract_strided_slice %11 {offsets = [3, 0], sizes = [1, 32], strides = [1, 1]} : vector<8x32xf32> to vector<1x32xf32>
    %22 = vector.shape_cast %21 : vector<1x32xf32> to vector<1x32xf32>
    %23 = vector.broadcast %22 : vector<1x32xf32> to vector<16x32xf32>
    %24 = vector.extract_strided_slice %11 {offsets = [4, 0], sizes = [1, 32], strides = [1, 1]} : vector<8x32xf32> to vector<1x32xf32>
    %25 = vector.shape_cast %24 : vector<1x32xf32> to vector<1x32xf32>
    %26 = vector.broadcast %25 : vector<1x32xf32> to vector<16x32xf32>
    %27 = vector.extract_strided_slice %11 {offsets = [5, 0], sizes = [1, 32], strides = [1, 1]} : vector<8x32xf32> to vector<1x32xf32>
    %28 = vector.shape_cast %27 : vector<1x32xf32> to vector<1x32xf32>
    %29 = vector.broadcast %28 : vector<1x32xf32> to vector<16x32xf32>
    %30 = vector.extract_strided_slice %11 {offsets = [6, 0], sizes = [1, 32], strides = [1, 1]} : vector<8x32xf32> to vector<1x32xf32>
    %31 = vector.shape_cast %30 : vector<1x32xf32> to vector<1x32xf32>
    %32 = vector.broadcast %31 : vector<1x32xf32> to vector<16x32xf32>
    %33 = vector.extract_strided_slice %11 {offsets = [7, 0], sizes = [1, 32], strides = [1, 1]} : vector<8x32xf32> to vector<1x32xf32>
    %34 = vector.shape_cast %33 : vector<1x32xf32> to vector<1x32xf32>
    %35 = vector.broadcast %34 : vector<1x32xf32> to vector<16x32xf32>
    %36 = arith.truncf %0 : vector<16x32xf32> to vector<16x32xbf16>
    %cst = arith.constant dense<0.000000e+00> : vector<16x96xf32>
    %37 = tpu.matmul %36, %1, %cst {dimension_numbers = #tpu.dot_dimension_numbers<[1], [0], [0], [1], [0, 0, 1, 1], [], []>} : vector<16x32xbf16>, vector<32x96xbf16>, vector<16x96xf32> -> vector<16x96xf32>
    %38 = arith.addf %37, %7 : vector<16x96xf32>
    %39 = arith.truncf %38 : vector<16x96xf32> to vector<16x96xbf16>
    %40 = vector.shape_cast %39 : vector<16x96xbf16> to vector<2x8x12x8xbf16>
    %41 = tpu.transpose %40, [0, 2, 1, 3] : vector<2x8x12x8xbf16> -> vector<2x12x8x8xbf16>
    %42 = vector.extract_strided_slice %41 {offsets = [0, 0, 0, 0], sizes = [2, 4, 8, 8], strides = [1, 1, 1, 1]} : vector<2x12x8x8xbf16> to vector<2x4x8x8xbf16>
    %43 = vector.shape_cast %42 : vector<2x4x8x8xbf16> to vector<8x8x8xbf16>
    %44 = vector.extract_strided_slice %41 {offsets = [0, 4, 0, 0], sizes = [2, 4, 8, 8], strides = [1, 1, 1, 1]} : vector<2x12x8x8xbf16> to vector<2x4x8x8xbf16>
    %45 = vector.shape_cast %44 : vector<2x4x8x8xbf16> to vector<8x8x8xbf16>
    %46 = vector.extract_strided_slice %41 {offsets = [0, 8, 0, 0], sizes = [2, 4, 8, 8], strides = [1, 1, 1, 1]} : vector<2x12x8x8xbf16> to vector<2x4x8x8xbf16>
    %47 = vector.shape_cast %46 : vector<2x4x8x8xbf16> to vector<8x8x8xbf16>
    "tpu.trace_start"() <{level = 10 : i32, message = "gqd,gkd->gqk"}> : () -> ()
    %cst_15 = arith.constant dense<0.000000e+00> : vector<8x8x8xf32>
    %48 = tpu.matmul %43, %45, %cst_15 {dimension_numbers = #tpu.dot_dimension_numbers<[2], [2], [1], [1], [0, 0, 0, 1, 1, 1], [0], [0]>} : vector<8x8x8xbf16>, vector<8x8x8xbf16>, vector<8x8x8xf32> -> vector<8x8x8xf32>
    "tpu.trace_stop"() : () -> ()
    %cst_16 = arith.constant dense<0xFF800000> : vector<8x8xf32>
    %49 = vector.multi_reduction <maximumf>, %48, %cst_16 [2] : vector<8x8x8xf32> to vector<8x8xf32>
    %50 = vector.shape_cast %49 : vector<8x8xf32> to vector<8x8x1xf32>
    %51 = vector.broadcast %50 : vector<8x8x1xf32> to vector<8x8x8xf32>
    %52 = arith.subf %48, %51 : vector<8x8x8xf32>
    %53 = math.exp %52 : vector<8x8x8xf32>
    %cst_17 = arith.constant dense<0.000000e+00> : vector<8x8xf32>
    %54 = vector.multi_reduction <add>, %53, %cst_17 [2] : vector<8x8x8xf32> to vector<8x8xf32>
    %55 = vector.shape_cast %54 : vector<8x8xf32> to vector<8x8x1xf32>
    %56 = tpu.reciprocal %55 {approx = true} : vector<8x8x1xf32> -> vector<8x8x1xf32>
    %57 = vector.broadcast %56 : vector<8x8x1xf32> to vector<8x8x8xf32>
    %58 = arith.mulf %53, %57 : vector<8x8x8xf32>
    %59 = arith.truncf %58 : vector<8x8x8xf32> to vector<8x8x8xbf16>
    "tpu.trace_start"() <{level = 10 : i32, message = "gqk,gkd->gqd"}> : () -> ()
    %cst_18 = arith.constant dense<0.000000e+00> : vector<8x8x8xf32>
    %60 = tpu.matmul %59, %47, %cst_18 {dimension_numbers = #tpu.dot_dimension_numbers<[2], [1], [1], [2], [0, 0, 0, 1, 1, 2], [0], [0]>} : vector<8x8x8xbf16>, vector<8x8x8xbf16>, vector<8x8x8xf32> -> vector<8x8x8xf32>
    "tpu.trace_stop"() : () -> ()
    %61 = vector.shape_cast %60 : vector<8x8x8xf32> to vector<2x4x8x8xf32>
    %62 = tpu.transpose %61, [0, 2, 1, 3] : vector<2x4x8x8xf32> -> vector<2x8x4x8xf32>
    %63 = vector.shape_cast %62 : vector<2x8x4x8xf32> to vector<16x32xf32>
    %64 = arith.truncf %63 : vector<16x32xf32> to vector<16x32xbf16>
    %cst_19 = arith.constant dense<0.000000e+00> : vector<16x32xf32>
    %65 = tpu.matmul %64, %2, %cst_19 {dimension_numbers = #tpu.dot_dimension_numbers<[1], [0], [0], [1], [0, 0, 1, 1], [], []>} : vector<16x32xbf16>, vector<32x32xbf16>, vector<16x32xf32> -> vector<16x32xf32>
    %66 = arith.addf %65, %14 : vector<16x32xf32>
    %67 = arith.addf %0, %66 : vector<16x32xf32>
    %cst_20 = arith.constant dense<0.000000e+00> : vector<16xf32>
    %68 = vector.multi_reduction <add>, %67, %cst_20 [1] : vector<16x32xf32> to vector<16xf32>
    %69 = vector.shape_cast %68 : vector<16xf32> to vector<16x1xf32>
    %cst_21 = arith.constant 3.200000e+01 : f32
    %70 = vector.broadcast %cst_21 : f32 to vector<16x1xf32>
    %71 = arith.divf %69, %70 : vector<16x1xf32>
    %72 = vector.broadcast %71 : vector<16x1xf32> to vector<16x32xf32>
    %73 = arith.subf %67, %72 : vector<16x32xf32>
    %74 = arith.mulf %73, %73 : vector<16x32xf32>
    %cst_22 = arith.constant dense<0.000000e+00> : vector<16xf32>
    %75 = vector.multi_reduction <add>, %74, %cst_22 [1] : vector<16x32xf32> to vector<16xf32>
    %76 = vector.shape_cast %75 : vector<16xf32> to vector<16x1xf32>
    %cst_23 = arith.constant 3.200000e+01 : f32
    %77 = vector.broadcast %cst_23 : f32 to vector<16x1xf32>
    %78 = arith.divf %76, %77 : vector<16x1xf32>
    %79 = vector.broadcast %71 : vector<16x1xf32> to vector<16x32xf32>
    %80 = arith.subf %67, %79 : vector<16x32xf32>
    %cst_24 = arith.constant 9.99999974E-6 : f32
    %81 = vector.broadcast %cst_24 : f32 to vector<16x1xf32>
    %82 = arith.addf %78, %81 : vector<16x1xf32>
    %83 = math.rsqrt %82 : vector<16x1xf32>
    %84 = vector.broadcast %83 : vector<16x1xf32> to vector<16x32xf32>
    %85 = arith.mulf %80, %84 : vector<16x32xf32>
    %86 = arith.mulf %85, %20 : vector<16x32xf32>
    %87 = arith.addf %86, %23 : vector<16x32xf32>
    %88 = arith.truncf %87 : vector<16x32xf32> to vector<16x32xbf16>
    %cst_25 = arith.constant dense<0.000000e+00> : vector<16x64xf32>
    %89 = tpu.matmul %88, %3, %cst_25 {dimension_numbers = #tpu.dot_dimension_numbers<[1], [0], [0], [1], [0, 0, 1, 1], [], []>} : vector<16x32xbf16>, vector<32x64xbf16>, vector<16x64xf32> -> vector<16x64xf32>
    %90 = arith.addf %89, %10 : vector<16x64xf32>
    %cst_26 = arith.constant 0.000000e+00 : f32
    %91 = vector.broadcast %cst_26 : f32 to vector<16x64xf32>
    %92 = arith.maximumf %90, %91 : vector<16x64xf32>
    %93 = arith.truncf %92 : vector<16x64xf32> to vector<16x64xbf16>
    %cst_27 = arith.constant dense<0.000000e+00> : vector<16x32xf32>
    %94 = tpu.matmul %93, %4, %cst_27 {dimension_numbers = #tpu.dot_dimension_numbers<[1], [0], [0], [1], [0, 0, 1, 1], [], []>} : vector<16x64xbf16>, vector<64x32xbf16>, vector<16x32xf32> -> vector<16x32xf32>
    %95 = arith.addf %94, %17 : vector<16x32xf32>
    %96 = arith.addf %87, %95 : vector<16x32xf32>
    %cst_28 = arith.constant dense<0.000000e+00> : vector<16xf32>
    %97 = vector.multi_reduction <add>, %96, %cst_28 [1] : vector<16x32xf32> to vector<16xf32>
    %98 = vector.shape_cast %97 : vector<16xf32> to vector<16x1xf32>
    %cst_29 = arith.constant 3.200000e+01 : f32
    %99 = vector.broadcast %cst_29 : f32 to vector<16x1xf32>
    %100 = arith.divf %98, %99 : vector<16x1xf32>
    %101 = vector.broadcast %100 : vector<16x1xf32> to vector<16x32xf32>
    %102 = arith.subf %96, %101 : vector<16x32xf32>
    %103 = arith.mulf %102, %102 : vector<16x32xf32>
    %cst_30 = arith.constant dense<0.000000e+00> : vector<16xf32>
    %104 = vector.multi_reduction <add>, %103, %cst_30 [1] : vector<16x32xf32> to vector<16xf32>
    %105 = vector.shape_cast %104 : vector<16xf32> to vector<16x1xf32>
    %cst_31 = arith.constant 3.200000e+01 : f32
    %106 = vector.broadcast %cst_31 : f32 to vector<16x1xf32>
    %107 = arith.divf %105, %106 : vector<16x1xf32>
    %108 = vector.broadcast %100 : vector<16x1xf32> to vector<16x32xf32>
    %109 = arith.subf %96, %108 : vector<16x32xf32>
    %cst_32 = arith.constant 9.99999974E-6 : f32
    %110 = vector.broadcast %cst_32 : f32 to vector<16x1xf32>
    %111 = arith.addf %107, %110 : vector<16x1xf32>
    %112 = math.rsqrt %111 : vector<16x1xf32>
    %113 = vector.broadcast %112 : vector<16x1xf32> to vector<16x32xf32>
    %114 = arith.mulf %109, %113 : vector<16x32xf32>
    %115 = arith.mulf %114, %26 : vector<16x32xf32>
    %116 = arith.addf %115, %29 : vector<16x32xf32>
    %117 = arith.truncf %116 : vector<16x32xf32> to vector<16x32xbf16>
    %cst_33 = arith.constant dense<0.000000e+00> : vector<16x96xf32>
    %118 = tpu.matmul %117, %1, %cst_33 {dimension_numbers = #tpu.dot_dimension_numbers<[1], [0], [0], [1], [0, 0, 1, 1], [], []>} : vector<16x32xbf16>, vector<32x96xbf16>, vector<16x96xf32> -> vector<16x96xf32>
    %119 = arith.addf %118, %7 : vector<16x96xf32>
    %120 = arith.truncf %119 : vector<16x96xf32> to vector<16x96xbf16>
    %121 = vector.shape_cast %120 : vector<16x96xbf16> to vector<2x8x12x8xbf16>
    %122 = tpu.transpose %121, [0, 2, 1, 3] : vector<2x8x12x8xbf16> -> vector<2x12x8x8xbf16>
    %123 = vector.extract_strided_slice %122 {offsets = [0, 0, 0, 0], sizes = [2, 4, 8, 8], strides = [1, 1, 1, 1]} : vector<2x12x8x8xbf16> to vector<2x4x8x8xbf16>
    %124 = vector.shape_cast %123 : vector<2x4x8x8xbf16> to vector<8x8x8xbf16>
    %125 = vector.extract_strided_slice %122 {offsets = [0, 4, 0, 0], sizes = [2, 4, 8, 8], strides = [1, 1, 1, 1]} : vector<2x12x8x8xbf16> to vector<2x4x8x8xbf16>
    %126 = vector.shape_cast %125 : vector<2x4x8x8xbf16> to vector<8x8x8xbf16>
    %127 = vector.extract_strided_slice %122 {offsets = [0, 8, 0, 0], sizes = [2, 4, 8, 8], strides = [1, 1, 1, 1]} : vector<2x12x8x8xbf16> to vector<2x4x8x8xbf16>
    %128 = vector.shape_cast %127 : vector<2x4x8x8xbf16> to vector<8x8x8xbf16>
    "tpu.trace_start"() <{level = 10 : i32, message = "gqd,gkd->gqk"}> : () -> ()
    %cst_34 = arith.constant dense<0.000000e+00> : vector<8x8x8xf32>
    %129 = tpu.matmul %124, %126, %cst_34 {dimension_numbers = #tpu.dot_dimension_numbers<[2], [2], [1], [1], [0, 0, 0, 1, 1, 1], [0], [0]>} : vector<8x8x8xbf16>, vector<8x8x8xbf16>, vector<8x8x8xf32> -> vector<8x8x8xf32>
    "tpu.trace_stop"() : () -> ()
    %cst_35 = arith.constant dense<0xFF800000> : vector<8x8xf32>
    %130 = vector.multi_reduction <maximumf>, %129, %cst_35 [2] : vector<8x8x8xf32> to vector<8x8xf32>
    %131 = vector.shape_cast %130 : vector<8x8xf32> to vector<8x8x1xf32>
    %132 = vector.broadcast %131 : vector<8x8x1xf32> to vector<8x8x8xf32>
    %133 = arith.subf %129, %132 : vector<8x8x8xf32>
    %134 = math.exp %133 : vector<8x8x8xf32>
    %cst_36 = arith.constant dense<0.000000e+00> : vector<8x8xf32>
    %135 = vector.multi_reduction <add>, %134, %cst_36 [2] : vector<8x8x8xf32> to vector<8x8xf32>
    %136 = vector.shape_cast %135 : vector<8x8xf32> to vector<8x8x1xf32>
    %137 = tpu.reciprocal %136 {approx = true} : vector<8x8x1xf32> -> vector<8x8x1xf32>
    %138 = vector.broadcast %137 : vector<8x8x1xf32> to vector<8x8x8xf32>
    %139 = arith.mulf %134, %138 : vector<8x8x8xf32>
    %140 = arith.truncf %139 : vector<8x8x8xf32> to vector<8x8x8xbf16>
    "tpu.trace_start"() <{level = 10 : i32, message = "gqk,gkd->gqd"}> : () -> ()
    %cst_37 = arith.constant dense<0.000000e+00> : vector<8x8x8xf32>
    %141 = tpu.matmul %140, %128, %cst_37 {dimension_numbers = #tpu.dot_dimension_numbers<[2], [1], [1], [2], [0, 0, 0, 1, 1, 2], [0], [0]>} : vector<8x8x8xbf16>, vector<8x8x8xbf16>, vector<8x8x8xf32> -> vector<8x8x8xf32>
    "tpu.trace_stop"() : () -> ()
    %142 = vector.shape_cast %141 : vector<8x8x8xf32> to vector<2x4x8x8xf32>
    %143 = tpu.transpose %142, [0, 2, 1, 3] : vector<2x4x8x8xf32> -> vector<2x8x4x8xf32>
    %144 = vector.shape_cast %143 : vector<2x8x4x8xf32> to vector<16x32xf32>
    %145 = arith.truncf %144 : vector<16x32xf32> to vector<16x32xbf16>
    %cst_38 = arith.constant dense<0.000000e+00> : vector<16x32xf32>
    %146 = tpu.matmul %145, %2, %cst_38 {dimension_numbers = #tpu.dot_dimension_numbers<[1], [0], [0], [1], [0, 0, 1, 1], [], []>} : vector<16x32xbf16>, vector<32x32xbf16>, vector<16x32xf32> -> vector<16x32xf32>
    %147 = arith.addf %146, %14 : vector<16x32xf32>
    %148 = arith.addf %116, %147 : vector<16x32xf32>
    %cst_39 = arith.constant dense<0.000000e+00> : vector<16xf32>
    %149 = vector.multi_reduction <add>, %148, %cst_39 [1] : vector<16x32xf32> to vector<16xf32>
    %150 = vector.shape_cast %149 : vector<16xf32> to vector<16x1xf32>
    %cst_40 = arith.constant 3.200000e+01 : f32
    %151 = vector.broadcast %cst_40 : f32 to vector<16x1xf32>
    %152 = arith.divf %150, %151 : vector<16x1xf32>
    %153 = vector.broadcast %152 : vector<16x1xf32> to vector<16x32xf32>
    %154 = arith.subf %148, %153 : vector<16x32xf32>
    %155 = arith.mulf %154, %154 : vector<16x32xf32>
    %cst_41 = arith.constant dense<0.000000e+00> : vector<16xf32>
    %156 = vector.multi_reduction <add>, %155, %cst_41 [1] : vector<16x32xf32> to vector<16xf32>
    %157 = vector.shape_cast %156 : vector<16xf32> to vector<16x1xf32>
    %cst_42 = arith.constant 3.200000e+01 : f32
    %158 = vector.broadcast %cst_42 : f32 to vector<16x1xf32>
    %159 = arith.divf %157, %158 : vector<16x1xf32>
    %160 = vector.broadcast %152 : vector<16x1xf32> to vector<16x32xf32>
    %161 = arith.subf %148, %160 : vector<16x32xf32>
    %cst_43 = arith.constant 9.99999974E-6 : f32
    %162 = vector.broadcast %cst_43 : f32 to vector<16x1xf32>
    %163 = arith.addf %159, %162 : vector<16x1xf32>
    %164 = math.rsqrt %163 : vector<16x1xf32>
    %165 = vector.broadcast %164 : vector<16x1xf32> to vector<16x32xf32>
    %166 = arith.mulf %161, %165 : vector<16x32xf32>
    %167 = arith.mulf %166, %20 : vector<16x32xf32>
    %168 = arith.addf %167, %23 : vector<16x32xf32>
    %169 = arith.truncf %168 : vector<16x32xf32> to vector<16x32xbf16>
    %cst_44 = arith.constant dense<0.000000e+00> : vector<16x64xf32>
    %170 = tpu.matmul %169, %3, %cst_44 {dimension_numbers = #tpu.dot_dimension_numbers<[1], [0], [0], [1], [0, 0, 1, 1], [], []>} : vector<16x32xbf16>, vector<32x64xbf16>, vector<16x64xf32> -> vector<16x64xf32>
    %171 = arith.addf %170, %10 : vector<16x64xf32>
    %cst_45 = arith.constant 0.000000e+00 : f32
    %172 = vector.broadcast %cst_45 : f32 to vector<16x64xf32>
    %173 = arith.maximumf %171, %172 : vector<16x64xf32>
    %174 = arith.truncf %173 : vector<16x64xf32> to vector<16x64xbf16>
    %cst_46 = arith.constant dense<0.000000e+00> : vector<16x32xf32>
    %175 = tpu.matmul %174, %4, %cst_46 {dimension_numbers = #tpu.dot_dimension_numbers<[1], [0], [0], [1], [0, 0, 1, 1], [], []>} : vector<16x64xbf16>, vector<64x32xbf16>, vector<16x32xf32> -> vector<16x32xf32>
    %176 = arith.addf %175, %17 : vector<16x32xf32>
    %177 = arith.addf %168, %176 : vector<16x32xf32>
    %cst_47 = arith.constant dense<0.000000e+00> : vector<16xf32>
    %178 = vector.multi_reduction <add>, %177, %cst_47 [1] : vector<16x32xf32> to vector<16xf32>
    %179 = vector.shape_cast %178 : vector<16xf32> to vector<16x1xf32>
    %cst_48 = arith.constant 3.200000e+01 : f32
    %180 = vector.broadcast %cst_48 : f32 to vector<16x1xf32>
    %181 = arith.divf %179, %180 : vector<16x1xf32>
    %182 = vector.broadcast %181 : vector<16x1xf32> to vector<16x32xf32>
    %183 = arith.subf %177, %182 : vector<16x32xf32>
    %184 = arith.mulf %183, %183 : vector<16x32xf32>
    %cst_49 = arith.constant dense<0.000000e+00> : vector<16xf32>
    %185 = vector.multi_reduction <add>, %184, %cst_49 [1] : vector<16x32xf32> to vector<16xf32>
    %186 = vector.shape_cast %185 : vector<16xf32> to vector<16x1xf32>
    %cst_50 = arith.constant 3.200000e+01 : f32
    %187 = vector.broadcast %cst_50 : f32 to vector<16x1xf32>
    %188 = arith.divf %186, %187 : vector<16x1xf32>
    %189 = vector.broadcast %181 : vector<16x1xf32> to vector<16x32xf32>
    %190 = arith.subf %177, %189 : vector<16x32xf32>
    %cst_51 = arith.constant 9.99999974E-6 : f32
    %191 = vector.broadcast %cst_51 : f32 to vector<16x1xf32>
    %192 = arith.addf %188, %191 : vector<16x1xf32>
    %193 = math.rsqrt %192 : vector<16x1xf32>
    %194 = vector.broadcast %193 : vector<16x1xf32> to vector<16x32xf32>
    %195 = arith.mulf %190, %194 : vector<16x32xf32>
    %196 = arith.mulf %195, %26 : vector<16x32xf32>
    %197 = arith.addf %196, %29 : vector<16x32xf32>
    %198 = arith.truncf %197 : vector<16x32xf32> to vector<16x32xbf16>
    %cst_52 = arith.constant dense<0.000000e+00> : vector<16x96xf32>
    %199 = tpu.matmul %198, %1, %cst_52 {dimension_numbers = #tpu.dot_dimension_numbers<[1], [0], [0], [1], [0, 0, 1, 1], [], []>} : vector<16x32xbf16>, vector<32x96xbf16>, vector<16x96xf32> -> vector<16x96xf32>
    %200 = arith.addf %199, %7 : vector<16x96xf32>
    %201 = arith.truncf %200 : vector<16x96xf32> to vector<16x96xbf16>
    %202 = vector.shape_cast %201 : vector<16x96xbf16> to vector<2x8x12x8xbf16>
    %203 = tpu.transpose %202, [0, 2, 1, 3] : vector<2x8x12x8xbf16> -> vector<2x12x8x8xbf16>
    %204 = vector.extract_strided_slice %203 {offsets = [0, 0, 0, 0], sizes = [2, 4, 8, 8], strides = [1, 1, 1, 1]} : vector<2x12x8x8xbf16> to vector<2x4x8x8xbf16>
    %205 = vector.shape_cast %204 : vector<2x4x8x8xbf16> to vector<8x8x8xbf16>
    %206 = vector.extract_strided_slice %203 {offsets = [0, 4, 0, 0], sizes = [2, 4, 8, 8], strides = [1, 1, 1, 1]} : vector<2x12x8x8xbf16> to vector<2x4x8x8xbf16>
    %207 = vector.shape_cast %206 : vector<2x4x8x8xbf16> to vector<8x8x8xbf16>
    %208 = vector.extract_strided_slice %203 {offsets = [0, 8, 0, 0], sizes = [2, 4, 8, 8], strides = [1, 1, 1, 1]} : vector<2x12x8x8xbf16> to vector<2x4x8x8xbf16>
    %209 = vector.shape_cast %208 : vector<2x4x8x8xbf16> to vector<8x8x8xbf16>
    "tpu.trace_start"() <{level = 10 : i32, message = "gqd,gkd->gqk"}> : () -> ()
    %cst_53 = arith.constant dense<0.000000e+00> : vector<8x8x8xf32>
    %210 = tpu.matmul %205, %207, %cst_53 {dimension_numbers = #tpu.dot_dimension_numbers<[2], [2], [1], [1], [0, 0, 0, 1, 1, 1], [0], [0]>} : vector<8x8x8xbf16>, vector<8x8x8xbf16>, vector<8x8x8xf32> -> vector<8x8x8xf32>
    "tpu.trace_stop"() : () -> ()
    %cst_54 = arith.constant dense<0xFF800000> : vector<8x8xf32>
    %211 = vector.multi_reduction <maximumf>, %210, %cst_54 [2] : vector<8x8x8xf32> to vector<8x8xf32>
    %212 = vector.shape_cast %211 : vector<8x8xf32> to vector<8x8x1xf32>
    %213 = vector.broadcast %212 : vector<8x8x1xf32> to vector<8x8x8xf32>
    %214 = arith.subf %210, %213 : vector<8x8x8xf32>
    %215 = math.exp %214 : vector<8x8x8xf32>
    %cst_55 = arith.constant dense<0.000000e+00> : vector<8x8xf32>
    %216 = vector.multi_reduction <add>, %215, %cst_55 [2] : vector<8x8x8xf32> to vector<8x8xf32>
    %217 = vector.shape_cast %216 : vector<8x8xf32> to vector<8x8x1xf32>
    %218 = tpu.reciprocal %217 {approx = true} : vector<8x8x1xf32> -> vector<8x8x1xf32>
    %219 = vector.broadcast %218 : vector<8x8x1xf32> to vector<8x8x8xf32>
    %220 = arith.mulf %215, %219 : vector<8x8x8xf32>
    %221 = arith.truncf %220 : vector<8x8x8xf32> to vector<8x8x8xbf16>
    "tpu.trace_start"() <{level = 10 : i32, message = "gqk,gkd->gqd"}> : () -> ()
    %cst_56 = arith.constant dense<0.000000e+00> : vector<8x8x8xf32>
    %222 = tpu.matmul %221, %209, %cst_56 {dimension_numbers = #tpu.dot_dimension_numbers<[2], [1], [1], [2], [0, 0, 0, 1, 1, 2], [0], [0]>} : vector<8x8x8xbf16>, vector<8x8x8xbf16>, vector<8x8x8xf32> -> vector<8x8x8xf32>
    "tpu.trace_stop"() : () -> ()
    %223 = vector.shape_cast %222 : vector<8x8x8xf32> to vector<2x4x8x8xf32>
    %224 = tpu.transpose %223, [0, 2, 1, 3] : vector<2x4x8x8xf32> -> vector<2x8x4x8xf32>
    %225 = vector.shape_cast %224 : vector<2x8x4x8xf32> to vector<16x32xf32>
    %226 = arith.truncf %225 : vector<16x32xf32> to vector<16x32xbf16>
    %cst_57 = arith.constant dense<0.000000e+00> : vector<16x32xf32>
    %227 = tpu.matmul %226, %2, %cst_57 {dimension_numbers = #tpu.dot_dimension_numbers<[1], [0], [0], [1], [0, 0, 1, 1], [], []>} : vector<16x32xbf16>, vector<32x32xbf16>, vector<16x32xf32> -> vector<16x32xf32>
    %228 = arith.addf %227, %14 : vector<16x32xf32>
    %229 = arith.addf %197, %228 : vector<16x32xf32>
    %cst_58 = arith.constant dense<0.000000e+00> : vector<16xf32>
    %230 = vector.multi_reduction <add>, %229, %cst_58 [1] : vector<16x32xf32> to vector<16xf32>
    %231 = vector.shape_cast %230 : vector<16xf32> to vector<16x1xf32>
    %cst_59 = arith.constant 3.200000e+01 : f32
    %232 = vector.broadcast %cst_59 : f32 to vector<16x1xf32>
    %233 = arith.divf %231, %232 : vector<16x1xf32>
    %234 = vector.broadcast %233 : vector<16x1xf32> to vector<16x32xf32>
    %235 = arith.subf %229, %234 : vector<16x32xf32>
    %236 = arith.mulf %235, %235 : vector<16x32xf32>
    %cst_60 = arith.constant dense<0.000000e+00> : vector<16xf32>
    %237 = vector.multi_reduction <add>, %236, %cst_60 [1] : vector<16x32xf32> to vector<16xf32>
    %238 = vector.shape_cast %237 : vector<16xf32> to vector<16x1xf32>
    %cst_61 = arith.constant 3.200000e+01 : f32
    %239 = vector.broadcast %cst_61 : f32 to vector<16x1xf32>
    %240 = arith.divf %238, %239 : vector<16x1xf32>
    %241 = vector.broadcast %233 : vector<16x1xf32> to vector<16x32xf32>
    %242 = arith.subf %229, %241 : vector<16x32xf32>
    %cst_62 = arith.constant 9.99999974E-6 : f32
    %243 = vector.broadcast %cst_62 : f32 to vector<16x1xf32>
    %244 = arith.addf %240, %243 : vector<16x1xf32>
    %245 = math.rsqrt %244 : vector<16x1xf32>
    %246 = vector.broadcast %245 : vector<16x1xf32> to vector<16x32xf32>
    %247 = arith.mulf %242, %246 : vector<16x32xf32>
    %248 = arith.mulf %247, %20 : vector<16x32xf32>
    %249 = arith.addf %248, %23 : vector<16x32xf32>
    %250 = arith.truncf %249 : vector<16x32xf32> to vector<16x32xbf16>
    %cst_63 = arith.constant dense<0.000000e+00> : vector<16x64xf32>
    %251 = tpu.matmul %250, %3, %cst_63 {dimension_numbers = #tpu.dot_dimension_numbers<[1], [0], [0], [1], [0, 0, 1, 1], [], []>} : vector<16x32xbf16>, vector<32x64xbf16>, vector<16x64xf32> -> vector<16x64xf32>
    %252 = arith.addf %251, %10 : vector<16x64xf32>
    %cst_64 = arith.constant 0.000000e+00 : f32
    %253 = vector.broadcast %cst_64 : f32 to vector<16x64xf32>
    %254 = arith.maximumf %252, %253 : vector<16x64xf32>
    %255 = arith.truncf %254 : vector<16x64xf32> to vector<16x64xbf16>
    %cst_65 = arith.constant dense<0.000000e+00> : vector<16x32xf32>
    %256 = tpu.matmul %255, %4, %cst_65 {dimension_numbers = #tpu.dot_dimension_numbers<[1], [0], [0], [1], [0, 0, 1, 1], [], []>} : vector<16x64xbf16>, vector<64x32xbf16>, vector<16x32xf32> -> vector<16x32xf32>
    %257 = arith.addf %256, %17 : vector<16x32xf32>
    %258 = arith.addf %249, %257 : vector<16x32xf32>
    %cst_66 = arith.constant dense<0.000000e+00> : vector<16xf32>
    %259 = vector.multi_reduction <add>, %258, %cst_66 [1] : vector<16x32xf32> to vector<16xf32>
    %260 = vector.shape_cast %259 : vector<16xf32> to vector<16x1xf32>
    %cst_67 = arith.constant 3.200000e+01 : f32
    %261 = vector.broadcast %cst_67 : f32 to vector<16x1xf32>
    %262 = arith.divf %260, %261 : vector<16x1xf32>
    %263 = vector.broadcast %262 : vector<16x1xf32> to vector<16x32xf32>
    %264 = arith.subf %258, %263 : vector<16x32xf32>
    %265 = arith.mulf %264, %264 : vector<16x32xf32>
    %cst_68 = arith.constant dense<0.000000e+00> : vector<16xf32>
    %266 = vector.multi_reduction <add>, %265, %cst_68 [1] : vector<16x32xf32> to vector<16xf32>
    %267 = vector.shape_cast %266 : vector<16xf32> to vector<16x1xf32>
    %cst_69 = arith.constant 3.200000e+01 : f32
    %268 = vector.broadcast %cst_69 : f32 to vector<16x1xf32>
    %269 = arith.divf %267, %268 : vector<16x1xf32>
    %270 = vector.broadcast %262 : vector<16x1xf32> to vector<16x32xf32>
    %271 = arith.subf %258, %270 : vector<16x32xf32>
    %cst_70 = arith.constant 9.99999974E-6 : f32
    %272 = vector.broadcast %cst_70 : f32 to vector<16x1xf32>
    %273 = arith.addf %269, %272 : vector<16x1xf32>
    %274 = math.rsqrt %273 : vector<16x1xf32>
    %275 = vector.broadcast %274 : vector<16x1xf32> to vector<16x32xf32>
    %276 = arith.mulf %271, %275 : vector<16x32xf32>
    %277 = arith.mulf %276, %26 : vector<16x32xf32>
    %278 = arith.addf %277, %29 : vector<16x32xf32>
    %cst_71 = arith.constant dense<0.000000e+00> : vector<16xf32>
    %279 = vector.multi_reduction <add>, %278, %cst_71 [1] : vector<16x32xf32> to vector<16xf32>
    %280 = vector.shape_cast %279 : vector<16xf32> to vector<16x1xf32>
    %cst_72 = arith.constant 3.200000e+01 : f32
    %281 = vector.broadcast %cst_72 : f32 to vector<16x1xf32>
    %282 = arith.divf %280, %281 : vector<16x1xf32>
    %283 = vector.broadcast %282 : vector<16x1xf32> to vector<16x32xf32>
    %284 = arith.subf %278, %283 : vector<16x32xf32>
    %285 = arith.mulf %284, %284 : vector<16x32xf32>
    %cst_73 = arith.constant dense<0.000000e+00> : vector<16xf32>
    %286 = vector.multi_reduction <add>, %285, %cst_73 [1] : vector<16x32xf32> to vector<16xf32>
    %287 = vector.shape_cast %286 : vector<16xf32> to vector<16x1xf32>
    %cst_74 = arith.constant 3.200000e+01 : f32
    %288 = vector.broadcast %cst_74 : f32 to vector<16x1xf32>
    %289 = arith.divf %287, %288 : vector<16x1xf32>
    %290 = vector.broadcast %282 : vector<16x1xf32> to vector<16x32xf32>
    %291 = arith.subf %278, %290 : vector<16x32xf32>
    %cst_75 = arith.constant 9.99999974E-6 : f32
    %292 = vector.broadcast %cst_75 : f32 to vector<16x1xf32>
    %293 = arith.addf %289, %292 : vector<16x1xf32>
    %294 = math.rsqrt %293 : vector<16x1xf32>
    %295 = vector.broadcast %294 : vector<16x1xf32> to vector<16x32xf32>
    %296 = arith.mulf %291, %295 : vector<16x32xf32>
    %297 = arith.mulf %296, %32 : vector<16x32xf32>
    %298 = arith.addf %297, %35 : vector<16x32xf32>
    %c0_76 = arith.constant 0 : index
    %c0_77 = arith.constant 0 : index
    %299 = vector.load %arg9[%c0_76, %c0_77] : memref<16x32xf32, #tpu.memory_space<vmem>>, vector<16x32xf32>
    tpu.vector_store %arg9[%c0_76, %c0_77], %298 {strides = array<i32>} : memref<16x32xf32, #tpu.memory_space<vmem>>, vector<16x32xf32>,
    return
  }
  func.func @transform_0(%arg0: i32) -> (i32, i32) {
    %c0_i32 = arith.constant 0 : i32
    %c0_i32_0 = arith.constant 0 : i32
    return %arg0, %c0_i32 : i32, i32
  }
  func.func @transform_1(%arg0: i32) -> (i32, i32) {
    %c0_i32 = arith.constant 0 : i32
    %c0_i32_0 = arith.constant 0 : i32
    %c0_i32_1 = arith.constant 0 : i32
    return %c0_i32, %c0_i32_0 : i32, i32
  }
  func.func @transform_2(%arg0: i32) -> (i32, i32) {
    %c0_i32 = arith.constant 0 : i32
    %c0_i32_0 = arith.constant 0 : i32
    %c0_i32_1 = arith.constant 0 : i32
    return %c0_i32, %c0_i32_0 : i32, i32
  }
  func.func @transform_3(%arg0: i32) -> (i32, i32) {
    %c0_i32 = arith.constant 0 : i32
    %c0_i32_0 = arith.constant 0 : i32
    %c0_i32_1 = arith.constant 0 : i32
    return %c0_i32, %c0_i32_0 : i32, i32
  }
  func.func @transform_4(%arg0: i32) -> (i32, i32) {
    %c0_i32 = arith.constant 0 : i32
    %c0_i32_0 = arith.constant 0 : i32
    %c0_i32_1 = arith.constant 0 : i32
    return %c0_i32, %c0_i32_0 : i32, i32
  }
  func.func @transform_5(%arg0: i32) -> (i32, i32) {
    %c0_i32 = arith.constant 0 : i32
    %c0_i32_0 = arith.constant 0 : i32
    %c0_i32_1 = arith.constant 0 : i32
    return %c0_i32, %c0_i32_0 : i32, i32
  }
  func.func @transform_6(%arg0: i32) -> (i32, i32) {
    %c0_i32 = arith.constant 0 : i32
    %c0_i32_0 = arith.constant 0 : i32
    %c0_i32_1 = arith.constant 0 : i32
    return %c0_i32, %c0_i32_0 : i32, i32
  }
  func.func @transform_7(%arg0: i32) -> (i32, i32) {
    %c0_i32 = arith.constant 0 : i32
    %c0_i32_0 = arith.constant 0 : i32
    %c0_i32_1 = arith.constant 0 : i32
    return %c0_i32, %c0_i32_0 : i32, i32
  }
  func.func @transform_8(%arg0: i32) -> (i32, i32) {
    %c0_i32 = arith.constant 0 : i32
    %c0_i32_0 = arith.constant 0 : i32
    return %arg0, %c0_i32 : i32, i32
  }
}

</mosaic_0001>

<bundles_post_ra>
// kernel: tpu_custom_call.1
= control target key start
LH: loop header
LB: loop body
LE: loop exit
PB: predicated region body
PF: predicated region fallthrough
CT: control target
= control target key end

     0   :  { %13 = vsyncpa [#allocation3], 0  ;;  %s8516_s0 = inlined_call_operand.vmem [shape: f32[16,32], index: 0, kind: input, shape index: {}]   ;;  %s8517_s1 = inlined_call_operand.vmem [shape: bf16[32,96], index: 1, kind: input, shape index: {}]   ;;  %s8518_s2 = inlined_call_operand.vmem [shape: bf16[32,32], index: 2, kind: input, shape index: {}]   ;;  %s8519_s3 = inlined_call_operand.hbm [shape: bf16[32,64], index: 3, kind: input, shape index: {}]   ;;  %s8520_s4 = inlined_call_operand.vmem [shape: bf16[64,32], index: 4, kind: input, shape index: {}]   ;;  %s8521_s5 = inlined_call_operand.vmem [shape: f32[1,96], index: 5, kind: input, shape index: {}]   ;;  %s8522_s6 = inlined_call_operand.vmem [shape: f32[1,64], index: 6, kind: input, shape index: {}]   ;;  %s8523_s7 = inlined_call_operand.vmem [shape: f32[8,32], index: 7, kind: input, shape index: {}]   ;;  %s8524_s8 = inlined_call_operand.hbm [shape: f32[16,32], index: 8, kind: output, shape index: {}]  }
   0x1   :  { %14 = vsyncpa [#allocation4], 0  ;;  %s7259_s27 = smov [#allocation2]  }
   0x2   :  { %s26_s28 = sshll.u32 %s7259_s27, 4  ;;  %s27_s28 = int_to_ptr.vmem [resolvable:$true] %s26_s28 }
   0x3   :  { %s7223_s29 = scalar_lea.vmem %s27_s28, 256  ;;  %p7228_p1 = scmp.lt.s32.totalorder %s27_s28, %s27_s28 }
   0x4   :  { %p7224_p0 = scmp.ne.s32.totalorder %s27_s28, %s7223_s29  ;;  %p7229_p2 = scmp.lt.s32.totalorder %s7223_s29, %s7223_s29 }
   0x6   :  { %p7230_p3 = por %p7229_p2, %p7228_p1 }
   0x8   :  { %p7231_p4 = pnand %p7230_p3, %p7224_p0 }
   0xa   :  { %7234 = shalt.err (!%p7231_p4)
}
   0xb   :  { %s7260_s30 = smov 64   ;;  %s7261_s9 = smov 4  }
   0xc   :  { %32 = dma.hbm_to_vmem [thread:$0]  %s8519_s3, 256, %s27_s28, [#allocation3], %s7260_s30, %s7260_s30, %s7261_s9  }
   0xd   :  { %7255 = dma.done.wait [#allocation3], 256  }
   0xe   :  { %7256 = vsyncadd [#allocation3], 4294967040  ;;  %v7262_v0 = vmov 0.0   ;;  %vm7263_vm0 = vmmov 0   ;;  %v7054_v1 = vld [vmem:[%s8517_s1 + $0x8] sm:$0xff]   ;;  %v7055_v2 = vld [vmem:[%s8517_s1] sm:$0xff]   ;;  %v82_v17 = vlaneseq }
   0xf   :  { %6590 = vmatprep.subr.bf16.mxu0 %v7262_v0  ;;  %6594 = vmatprep.mubr.msk.bf16.mxu0 %vm7263_vm0, %v7262_v0  ;;  %v45_v3 = vld [vmem:[%s8516_s0] sm:$0xff]  ;;  %v46_v4 = vld [vmem:[%s8516_s0 + $0x8] sm:$0xff]  ;;  %vm127_vm1 = vcmask 261120   ;;  %s7264_s21 = smov 104   ;;  %s7265_s22 = smov 120   ;;  %vm826_vm2 = vcmask 64512  }
  0x10   :  { %6598 = vmatprep.subr.bf16.mxu1 %v7262_v0  ;;  %6600 = vmatprep.mubr.msk.bf16.mxu1 %vm7263_vm0, %v7262_v0  ;;  %v114_v5 = vpack.c.bf16 %v46_v4, %v45_v3  ;;  %v6320_v7 = vld [vmem:[%s8521_s5] ss:$0 sm:$0xff]  ;;  %s7266_s23 = smov 96   ;;  %s7267_s24 = smov 112   ;;  %v7271_v18 = vmov 1983009808  }
  0x11   :  { %6591 = vmatpush3.bf16.msra.mxu0 %v7054_v1  ;;  %s7268_s25 = smov 80   ;;  %s7269_s26 = smov 88   ;;  %v253_v19 = vunpack.c.l.s4 %v7271_v18  ;;  %v7374_v21 = vshrl.u32 %v82_v17, 7  ;;  %v7272_v25 = vmov 1934713408   ;;  %vm1294_vm3 = vcmask 1043456  }
  0x12   :  { %6592 = vmatprep.subr.bf16.mxu0 %v7262_v0  ;;  %s7270_s27 = smov 72   ;;  %v315_v26 = vunpack.c.l.s4 %v7272_v25  ;;  %s7274_s28 = smov 56   ;;  %vm1958_vm4 = vcmask 130048   ;;  %vm1961_vm5 = vcmask 195584   ;;  %vm2138_vm6 = vcmask 523264  }
  0x13   :  { %v254_v22 = vunpack.c.0.s8 %v253_v19  ;;  %s7275_s29 = smov 48   ;;  %s7276_s9 = smov 40  }
  0x14   :  { %v316_v39 = vunpack.c.0.s8 %v315_v26  ;;  %s7277_s3 = smov 16   ;;  %s7278_s14 = smov 8  }
  0x15   :  { %6593 = vmatpush3.bf16.msra.mxu0 %v7055_v2  ;;  %v7379_v34 = vsub.s32 %v254_v22, %v7374_v21  ;;  %s7279_s15 = smov 24  }
  0x16   :  { %6604 = vmatprep.subr.bf16.mxu0 %v7262_v0  ;;  %v7382_v52 = vsub.s32 %v316_v39, %v7374_v21 }
  0x18   :  { %6595 = vmatmul.mubr.msk.bf16.vlgmr.msra.gmra.mxu0 %vm127_vm1, %v114_v5 }
  0x19   :  { %6606 = vmatprep.mubr.msk.bf16.mxu0 %vm7263_vm0, %v7262_v0 }
  0xd8   :  { %v165_v6 = vpop.f32.mrf.mxu0 }
  0xd9   :  { %v166_v10 = vadd.f32 %v6320_v7, %v165_v6 }
  0xda   :  { %v6596_v8 = vpop.f32.mrf.mxu0 }
  0xdc   :  { %v168_v9 = vpop.f32.mrf.mxu0 }
  0xdd   :  { %v169_v11 = vadd.f32 %v6320_v7, %v168_v9 }
  0xde   :  { %v6597_v12 = vpop.f32.mrf.mxu0 }
  0xdf   :  { %v7358_v13 = vpack.c.bf16 %v169_v11, %v166_v10 }
  0xe1   :  { %178 = vrot.lane.b32.xlu1 %v7358_v13, %s7264_s21  ;;  %174 = vrot.lane.b32.xlu0 %v7358_v13, %s7265_s22  ;;  %v200_v32 = vshrl.u32 %v7358_v13, 16 }
  0xe5   :  { %180 = vrot.lane.b32.xlu1 %v7358_v13, %s7266_s23  ;;  %176 = vrot.lane.b32.xlu0 %v7358_v13, %s7267_s24 }
  0xe9   :  { %184 = vrot.lane.b32.xlu1 %v7358_v13, %s7268_s25  ;;  %182 = vrot.lane.b32.xlu0 %v7358_v13, %s7269_s26 }
  0xed   :  { %186 = vrot.lane.b32.xlu0 %v7358_v13, %s7270_s27 }
 0x153   :  { %v179_v14 = vpop.permute.xlu1 %178  ;;  %v175_v15 = vpop.permute.xlu0 %174 }
 0x154   :  { %v201_v28 = vshrl.u32 %v175_v15, 16  ;;  %v198_v31 = vpack.i.b16 %v175_v15, %v7358_v13  ;;  %v209_v36 = vshrl.u32 %v179_v14, 16 }
 0x156   :  { %v202_v44 = vpack.i.b16 %v201_v28, %v200_v32 }
 0x157   :  { %v177_v16 = vpop.permute.xlu0 %176  ;;  %v181_v20 = vpop.permute.xlu1 %180 }
 0x158   :  { %v216_v29 = vshrl.u32 %v181_v20, 16  ;;  %v208_v33 = vshrl.u32 %v177_v16, 16  ;;  %v206_v37 = vpack.i.b16 %v179_v14, %v177_v16 }
 0x15a   :  { %v210_v45 = vpack.i.b16 %v209_v36, %v208_v33 }
 0x15b   :  { %v183_v23 = vpop.permute.xlu0 %182  ;;  %v185_v30 = vpop.permute.xlu1 %184 }
 0x15c   :  { %v217_v24 = vshrl.u32 %v183_v23, 16  ;;  %v214_v27 = vpack.i.b16 %v183_v23, %v181_v20  ;;  %v224_v40 = vshrl.u32 %v185_v30, 16 }
 0x15e   :  { %v218_v38 = vpack.i.b16 %v217_v24, %v216_v29  ;;  %v250_v41 = vcombine.low %v198_v31, %v214_v27  ;;  %v251_v49 = vcombine.high %v198_v31, %v214_v27 }
 0x15f   :  { %v187_v35 = vpop.permute.xlu0 %186 }
 0x160   :  { %v222_v42 = vpack.i.b16 %v187_v35, %v185_v30  ;;  %v225_v43 = vshrl.u32 %v187_v35, 16  ;;  %v384_v50 = vcombine.low %v202_v44, %v218_v38  ;;  %v385_v51 = vcombine.high %v202_v44, %v218_v38 }
 0x161   :  { %v258_v53 = vrot.slane %v250_v41, %v7379_v34  ;;  %v265_v1 = vrot.slane %v251_v49, %v7379_v34 }
 0x162   :  { %v226_v46 = vpack.i.b16 %v225_v43, %v224_v40  ;;  %v266_v47 = vcombine.low %v206_v37, %v222_v42  ;;  %v267_v48 = vcombine.high %v206_v37, %v222_v42  ;;  %v392_v60 = vrot.slane %v384_v50, %v7379_v34 }
 0x163   :  { %v399_v61 = vrot.slane %v385_v51, %v7379_v34  ;;  %v7273_v42 = vmov 0  }
 0x164   :  { %v274_v54 = vrot.slane %v266_v47, %v7379_v34  ;;  %v400_v55 = vcombine.low %v210_v45, %v226_v46  ;;  %v401_v56 = vcombine.high %v210_v45, %v226_v46  ;;  %v281_v57 = vrot.slane %v267_v48, %v7379_v34 }
 0x166   :  { %v312_v58 = vcombine.low %v258_v53, %v274_v54  ;;  %v313_v59 = vcombine.high %v258_v53, %v274_v54  ;;  %v408_v62 = vrot.slane %v400_v55, %v7379_v34  ;;  %v415_v63 = vrot.slane %v401_v56, %v7379_v34 }
 0x167   :  { %v328_v8 = vcombine.low %v265_v1, %v281_v57  ;;  %v329_v9 = vcombine.high %v265_v1, %v281_v57 }
 0x168   :  { %v320_v2 = vrot.slane %v312_v58, %v7382_v52  ;;  %v327_v3 = vrot.slane %v313_v59, %v7382_v52  ;;  %v446_v4 = vcombine.low %v392_v60, %v408_v62  ;;  %v447_v5 = vcombine.high %v392_v60, %v408_v62 }
 0x169   :  { %v462_v6 = vcombine.low %v399_v61, %v415_v63  ;;  %v463_v7 = vcombine.high %v399_v61, %v415_v63  ;;  %v336_v22 = vrot.slane %v328_v8, %v7382_v52  ;;  %v343_v23 = vrot.slane %v329_v9, %v7382_v52 }
 0x16a   :  { %v6325_v10 = vcombine.low %v320_v2, %v327_v3  ;;  %v6327_v11 = vcombine.high %v320_v2, %v327_v3  ;;  %v454_v12 = vrot.slane %v446_v4, %v7382_v52  ;;  %v461_v14 = vrot.slane %v447_v5, %v7382_v52 }
 0x16b   :  { %v470_v15 = vrot.slane %v462_v6, %v7382_v52  ;;  %v477_v16 = vrot.slane %v463_v7, %v7382_v52  ;;  %v6333_v31 = vcombine.low %v336_v22, %v343_v23  ;;  %v6335_v32 = vcombine.high %v336_v22, %v343_v23 }
 0x16c   :  { %v526_v17 = vrot.slane %v6325_v10, %v7379_v34  ;;  %v542_v18 = vrot.slane %v6327_v11, %v7379_v34  ;;  %v6329_v19 = vcombine.low %v454_v12, %v461_v14  ;;  %v6331_v20 = vcombine.high %v454_v12, %v461_v14 }
 0x16d   :  { %v6337_v27 = vcombine.low %v470_v15, %v477_v16  ;;  %v6339_v28 = vcombine.high %v470_v15, %v477_v16  ;;  %v644_v44 = vrot.slane %v6333_v31, %v7379_v34  ;;  %v660_v45 = vrot.slane %v6335_v32, %v7379_v34 }
 0x16e   :  { %v551_v24 = vcombine.high %v526_v17, %v542_v18  ;;  %v585_v25 = vrot.slane %v6329_v19, %v7379_v34  ;;  %v601_v26 = vrot.slane %v6331_v20, %v7379_v34  ;;  %v550_v36 = vcombine.low %v526_v17, %v542_v18 }
 0x16f   :  { %v703_v37 = vrot.slane %v6337_v27, %v7379_v34  ;;  %v719_v38 = vrot.slane %v6339_v28, %v7379_v34  ;;  %v669_v58 = vcombine.high %v644_v44, %v660_v45  ;;  %v668_v11 = vcombine.low %v644_v44, %v660_v45 }
 0x170   :  { %v565_v29 = vrot.slane %v551_v24, %v7382_v52  ;;  %v610_v30 = vcombine.high %v585_v25, %v601_v26  ;;  %v609_v33 = vcombine.low %v585_v25, %v601_v26  ;;  %v558_v51 = vrot.slane %v550_v36, %v7382_v52 }
 0x171   :  { %v728_v54 = vcombine.high %v703_v37, %v719_v38  ;;  %v683_v3 = vrot.slane %v669_v58, %v7382_v52  ;;  %v727_v7 = vcombine.low %v703_v37, %v719_v38  ;;  %v676_v23 = vrot.slane %v668_v11, %v7382_v52 }
 0x172   :  { %v624_v35 = vrot.slane %v610_v30, %v7382_v52  ;;  %v769_v40 = vshrl.u32 %v565_v29, 16  ;;  %v617_v48 = vrot.slane %v609_v33, %v7382_v52  ;;  %v575_v49 = vcombine.high %v565_v29, %v7273_v42 }
 0x173   :  { %v757_v60 = vshrl.u32 %v558_v51, 16  ;;  %v742_v62 = vrot.slane %v728_v54, %v7382_v52  ;;  %v574_v5 = vcombine.high %v558_v51, %v7273_v42  ;;  %v805_v10 = vshrl.u32 %v683_v3, 16 }
 0x174   :  { %v768_v39 = vpack.i.b16 %v624_v35, %v565_v29  ;;  %v770_v41 = vshrl.u32 %v624_v35, 16  ;;  %v634_v43 = vcombine.high %v624_v35, %v7273_v42  ;;  %v758_v56 = vshrl.u32 %v617_v48, 16 }
 0x175   :  { %v775_v57 = vshrl.u32 %v575_v49, 16  ;;  %v756_v59 = vpack.i.b16 %v617_v48, %v558_v51  ;;  %v633_v2 = vcombine.high %v617_v48, %v7273_v42  ;;  %v806_v6 = vshrl.u32 %v742_v62, 16 }
 0x176   :  { %v831_v46 = vsel %vm826_vm2, %v768_v39, 0  ;;  %v771_v47 = vpack.i.b16 %v770_v41, %v769_v40  ;;  %v776_v53 = vshrl.u32 %v634_v43, 16  ;;  %v774_v55 = vpack.i.b16 %v634_v43, %v575_v49 }
 0x177   :  { %6599 = vmatpush3.bf16.xpose.msra.mxu1 %v831_v46  ;;  %v759_v1 = vpack.i.b16 %v758_v56, %v757_v60  ;;  %v804_v8 = vpack.i.b16 %v742_v62, %v683_v3  ;;  %v764_v9 = vshrl.u32 %v633_v2, 16  ;;  %v762_v12 = vpack.i.b16 %v633_v2, %v574_v5 }
 0x178   :  { %v877_v50 = vsel %vm826_vm2, %v771_v47, 0  ;;  %6610 = vmatprep.subr.bf16.mxu1 %v7262_v0  ;;  %v777_v61 = vpack.i.b16 %v776_v53, %v775_v57  ;;  %v923_v63 = vsel %vm826_vm2, %v774_v55, 0  ;;  %v763_v14 = vshrl.u32 %v574_v5, 16 }
 0x179   :  { %6605 = vmatpush3.bf16.xpose.msra.mxu0 %v877_v50  ;;  %v807_v15 = vpack.i.b16 %v806_v6, %v805_v10  ;;  %v752_v16 = vcombine.high %v742_v62, %v7273_v42  ;;  %v1015_v17 = vsel %vm826_vm2, %v804_v8, 0  ;;  %v735_v19 = vrot.slane %v727_v7, %v7382_v52 }
 0x17a   :  { %6616 = vmatprep.subr.bf16.mxu0 %v7262_v0  ;;  %v969_v4 = vsel %vm826_vm2, %v777_v61, 0  ;;  %v765_v18 = vpack.i.b16 %v764_v9, %v763_v14  ;;  %v693_v20 = vcombine.high %v683_v3, %v7273_v42  ;;  %v793_v29 = vshrl.u32 %v676_v23, 16 }
 0x17b   :  { %v1061_v22 = vsel %vm826_vm2, %v807_v15, 0  ;;  %v812_v24 = vshrl.u32 %v752_v16, 16  ;;  %v794_v26 = vshrl.u32 %v735_v19, 16  ;;  %v792_v28 = vpack.i.b16 %v735_v19, %v676_v23 }
 0x17c   :  { %v810_v25 = vpack.i.b16 %v752_v16, %v693_v20  ;;  %v811_v27 = vshrl.u32 %v693_v20, 16  ;;  %v751_v33 = vcombine.high %v735_v19, %v7273_v42  ;;  %v692_v36 = vcombine.high %v676_v23, %v7273_v42 }
 0x17d   :  { %v795_v32 = vpack.i.b16 %v794_v26, %v793_v29 }
 0x17e   :  { %6601 = vmatmul.mubr.msk.bf16.vlgmr.msra.gmra.mxu1 %vm826_vm2, %v756_v59  ;;  %v813_v30 = vpack.i.b16 %v812_v24, %v811_v27  ;;  %v1107_v31 = vsel %vm826_vm2, %v810_v25, 0  ;;  %v800_v37 = vshrl.u32 %v751_v33, 16  ;;  %v798_v38 = vpack.i.b16 %v751_v33, %v692_v36 }
 0x17f   :  { %6611 = vmatpush3.bf16.xpose.msra.mxu1 %v923_v63  ;;  %6612 = vmatprep.mubr.msk.bf16.mxu1 %vm7263_vm0, %v7262_v0  ;;  %v799_v39 = vshrl.u32 %v692_v36, 16 }
 0x180   :  { %6607 = vmatmul.mubr.msk.bf16.vlgmr.msra.gmra.mxu0 %vm826_vm2, %v759_v1  ;;  %6622 = vmatprep.subr.bf16.mxu1 %v7262_v0  ;;  %v1153_v35 = vsel %vm826_vm2, %v813_v30, 0 }
 0x181   :  { %6617 = vmatpush3.bf16.xpose.msra.mxu0 %v969_v4  ;;  %6618 = vmatprep.mubr.msk.bf16.mxu0 %vm7263_vm0, %v7262_v0  ;;  %v801_v40 = vpack.i.b16 %v800_v37, %v799_v39 }
 0x182   :  { %6628 = vmatprep.subr.bf16.mxu0 %v7262_v0 }
 0x186   :  { %6613 = vmatmul.mubr.msk.bf16.vlgmr.msra.gmra.mxu1 %vm826_vm2, %v762_v12 }
 0x187   :  { %6623 = vmatpush3.bf16.xpose.msra.mxu1 %v1015_v17  ;;  %6624 = vmatprep.mubr.msk.bf16.mxu1 %vm7263_vm0, %v7262_v0 }
 0x188   :  { %6619 = vmatmul.mubr.msk.bf16.vlgmr.msra.gmra.mxu0 %vm826_vm2, %v765_v18  ;;  %6634 = vmatprep.subr.bf16.mxu1 %v7262_v0 }
 0x189   :  { %6629 = vmatpush3.bf16.xpose.msra.mxu0 %v1061_v22  ;;  %6630 = vmatprep.mubr.msk.bf16.mxu0 %vm7263_vm0, %v7262_v0 }
 0x18a   :  { %6640 = vmatprep.subr.bf16.mxu0 %v7262_v0 }
 0x18e   :  { %6625 = vmatmul.mubr.msk.bf16.vlgmr.msra.gmra.mxu1 %vm826_vm2, %v792_v28 }
 0x18f   :  { %6635 = vmatpush3.bf16.xpose.msra.mxu1 %v1107_v31  ;;  %6636 = vmatprep.mubr.msk.bf16.mxu1 %vm7263_vm0, %v7262_v0 }
 0x190   :  { %6631 = vmatmul.mubr.msk.bf16.vlgmr.msra.gmra.mxu0 %vm826_vm2, %v795_v32  ;;  %6646 = vmatprep.subr.bf16.mxu1 %v7262_v0 }
 0x191   :  { %6641 = vmatpush3.bf16.xpose.msra.mxu0 %v1153_v35  ;;  %6642 = vmatprep.mubr.msk.bf16.mxu0 %vm7263_vm0, %v7262_v0 }
 0x192   :  { %6652 = vmatprep.subr.bf16.mxu0 %v7262_v0 }
 0x196   :  { %6637 = vmatmul.mubr.msk.bf16.vlgmr.msra.gmra.mxu1 %vm826_vm2, %v798_v38 }
 0x197   :  { %6648 = vmatprep.mubr.msk.bf16.mxu1 %vm7263_vm0, %v7262_v0 }
 0x198   :  { %6643 = vmatmul.mubr.msk.bf16.vlgmr.msra.gmra.mxu0 %vm826_vm2, %v801_v40 }
 0x199   :  { %6654 = vmatprep.mubr.msk.bf16.mxu0 %vm7263_vm0, %v7262_v0 }
 0x23e   :  { %v867_v41 = vpop.f32.mrf.mxu1 }
 0x23f   :  { %v1195_v43 = vsel %vm826_vm2, %v867_v41, -inf }
 0x240   :  { %1196 = vmax.xlane.f32.xlu1 %v1195_v43  ;;  %v6602_v44 = vpop.f32.mrf.mxu1  ;;  %v913_v45 = vpop.f32.mrf.mxu0 }
 0x241   :  { %v1198_v46 = vsel %vm826_vm2, %v913_v45, -inf }
 0x242   :  { %v870_v47 = vpop.f32.mrf.mxu1  ;;  %1199 = vmax.xlane.f32.xlu0 %v1198_v46  ;;  %v6608_v48 = vpop.f32.mrf.mxu0 }
 0x244   :  { %v6603_v49 = vpop.f32.mrf.mxu1  ;;  %v916_v50 = vpop.f32.mrf.mxu0 }
 0x246   :  { %v6609_v51 = vpop.f32.mrf.mxu0  ;;  %v7466_v53 = vpop.f32.mrf.mxu1 }
 0x247   :  { %v1201_v54 = vsel %vm826_vm2, %v7466_v53, -inf }
 0x248   :  { %v6614_v55 = vpop.f32.mrf.mxu1  ;;  %1202 = vmax.xlane.f32.xlu0 %v1201_v54  ;;  %v1005_v56 = vpop.f32.mrf.mxu0 }
 0x249   :  { %v1204_v57 = vsel %vm826_vm2, %v1005_v56, -inf }
 0x24a   :  { %v962_v58 = vpop.f32.mrf.mxu1  ;;  %1205 = vmax.xlane.f32.xlu1 %v1204_v57  ;;  %v6620_v59 = vpop.f32.mrf.mxu0 }
 0x24c   :  { %v6615_v60 = vpop.f32.mrf.mxu1  ;;  %v1008_v61 = vpop.f32.mrf.mxu0 }
 0x24e   :  { %v6621_v62 = vpop.f32.mrf.mxu0  ;;  %v1051_v63 = vpop.f32.mrf.mxu1 }
 0x24f   :  { %v1207_v1 = vsel %vm826_vm2, %v1051_v63, -inf }
 0x250   :  { %v6626_v2 = vpop.f32.mrf.mxu1  ;;  %1208 = vmax.xlane.f32.xlu0 %v1207_v1  ;;  %v1097_v3 = vpop.f32.mrf.mxu0 }
 0x251   :  { %v1210_v4 = vsel %vm826_vm2, %v1097_v3, -inf }
 0x252   :  { %v1054_v5 = vpop.f32.mrf.mxu1  ;;  %1211 = vmax.xlane.f32.xlu1 %v1210_v4  ;;  %v6632_v6 = vpop.f32.mrf.mxu0 }
 0x254   :  { %v6627_v7 = vpop.f32.mrf.mxu1  ;;  %v1100_v8 = vpop.f32.mrf.mxu0 }
 0x256   :  { %v6633_v9 = vpop.f32.mrf.mxu0  ;;  %v1143_v10 = vpop.f32.mrf.mxu1 }
 0x257   :  { %v1213_v11 = vsel %vm826_vm2, %v1143_v10, -inf }
 0x258   :  { %v6638_v12 = vpop.f32.mrf.mxu1  ;;  %1214 = vmax.xlane.f32.xlu0 %v1213_v11  ;;  %v1189_v14 = vpop.f32.mrf.mxu0 }
 0x259   :  { %v1216_v15 = vsel %vm826_vm2, %v1189_v14, -inf }
 0x25a   :  { %v1146_v16 = vpop.f32.mrf.mxu1  ;;  %1217 = vmax.xlane.f32.xlu1 %v1216_v15  ;;  %v6644_v17 = vpop.f32.mrf.mxu0 }
 0x25c   :  { %v6639_v18 = vpop.f32.mrf.mxu1  ;;  %v1192_v19 = vpop.f32.mrf.mxu0 }
 0x25e   :  { %v6645_v20 = vpop.f32.mrf.mxu0 }
 0x26b   :  { %190 = vrot.lane.b32.xlu1 %v7358_v13, %s7274_s28 }
 0x26e   :  { %188 = vrot.lane.b32.xlu0 %v7358_v13, %s7260_s30 }
 0x2c9   :  { %v1197_v22 = vpop.xlane.xlu1 %1196 }
 0x2ca   :  { %v1219_v23 = vsub.f32 %v867_v41, %v1197_v22 }
 0x2cb   :  { %v1200_v24 = vpop.xlane.xlu0 %1199 }
 0x2cc   :  { %v1227_v25 = vmul.f32 1.442695, %v1219_v23  ;;  %v1220_v26 = vsub.f32 %v913_v45, %v1200_v24 }
 0x2ce   :  { %7064 = vpow2.f32 %v1227_v25  ;;  %v1229_v27 = vmul.f32 1.442695, %v1220_v26 }
 0x2d0   :  { %7066 = vpow2.f32 %v1229_v27 }
 0x2d1   :  { %v1203_v32 = vpop.xlane.xlu0 %1202 }
 0x2d2   :  { %v1221_v37 = vsub.f32 %v7466_v53, %v1203_v32 }
 0x2d3   :  { %v1206_v33 = vpop.xlane.xlu1 %1205 }
 0x2d4   :  { %v1222_v35 = vsub.f32 %v1005_v56, %v1206_v33  ;;  %v1231_v43 = vmul.f32 1.442695, %v1221_v37 }
 0x2d6   :  { %v1233_v39 = vmul.f32 1.442695, %v1222_v35 }
 0x2d8   :  { %7068 = vpow2.f32 %v1233_v39 }
 0x2d9   :  { %v1209_v36 = vpop.xlane.xlu0 %1208  ;;  %7070 = vpow2.f32 %v1231_v43 }
 0x2da   :  { %v1223_v40 = vsub.f32 %v1051_v63, %v1209_v36 }
 0x2db   :  { %v7479_v28 = vpop.eup %7064  ;;  %v1212_v38 = vpop.xlane.xlu1 %1211 }
 0x2dc   :  { %v1243_v29 = vsel %vm826_vm2, %v7479_v28, 0.0  ;;  %v1224_v44 = vsub.f32 %v1097_v3, %v1212_v38  ;;  %v1235_v46 = vmul.f32 1.442695, %v1223_v40 }
 0x2dd   :  { %v7483_v30 = vpop.eup %7066  ;;  %1244 = vadd.xlane.f32.xlu0 %v1243_v29 }
 0x2de   :  { %v1246_v31 = vsel %vm826_vm2, %v7483_v30, 0.0  ;;  %v1237_v48 = vmul.f32 1.442695, %v1224_v44  ;;  %7072 = vpow2.f32 %v1235_v46 }
 0x2df   :  { %1247 = vadd.xlane.f32.xlu1 %v1246_v31 }
 0x2e0   :  { %7074 = vpow2.f32 %v1237_v48 }
 0x2e1   :  { %v1215_v41 = vpop.xlane.xlu0 %1214 }
 0x2e2   :  { %v1225_v47 = vsub.f32 %v1143_v10, %v1215_v41 }
 0x2e3   :  { %v1218_v45 = vpop.xlane.xlu1 %1217 }
 0x2e4   :  { %v1226_v49 = vsub.f32 %v1189_v14, %v1218_v45 }
 0x2e5   :  { %v7492_v51 = vpop.eup %7068  ;;  %v189_v1 = vpop.permute.xlu0 %188 }
 0x2e6   :  { %v1241_v50 = vmul.f32 1.442695, %v1226_v49  ;;  %v7494_v53 = vpop.eup %7070  ;;  %v1252_v54 = vsel %vm826_vm2, %v7492_v51, 0.0  ;;  %v232_v8 = vshrl.u32 %v189_v1, 16 }
 0x2e7   :  { %v1249_v56 = vsel %vm826_vm2, %v7494_v53, 0.0  ;;  %v191_v2 = vpop.permute.xlu1 %190 }
 0x2e8   :  { %v233_v5 = vshrl.u32 %v191_v2, 16  ;;  %v7516_v7 = vpack.i.b16 %v191_v2, %v189_v1  ;;  %v7549_v2 = vpack.i.b16 %v7273_v42, %v7273_v42 }
 0x2ea   :  { %v7520_v14 = vpack.i.b16 %v233_v5, %v232_v8  ;;  %v289_v15 = vrot.slane %v7516_v7, %v7379_v34 }
 0x2eb   :  { %v7498_v55 = vpop.eup %7072 }
 0x2ec   :  { %v1255_v58 = vsel %vm826_vm2, %v7498_v55, 0.0  ;;  %v423_v20 = vrot.slane %v7520_v14, %v7379_v34  ;;  %v416_v8 = vcombine.high %v7520_v14, %v7549_v2 }
 0x2ed   :  { %v7502_v57 = vpop.eup %7074 }
 0x2ee   :  { %v1258_v60 = vsel %vm826_vm2, %v7502_v57, 0.0  ;;  %v430_v14 = vrot.slane %v416_v8, %v7379_v34 }
 0x2f0   :  { %192 = vrot.lane.b32.xlu1 %v7358_v13, %s7275_s29 }
 0x2f3   :  { %194 = vrot.lane.b32.xlu0 %v7358_v13, %s7276_s9  ;;  %v1239_v13 = vmul.f32 1.442695, %v1225_v47 }
 0x2f5   :  { %7076 = vpow2.f32 %v1239_v13 }
 0x2f6   :  { %7078 = vpow2.f32 %v1241_v50 }
 0x302   :  { %v7506_v59 = vpop.eup %7076 }
 0x303   :  { %v7510_v61 = vpop.eup %7078  ;;  %v1261_v62 = vsel %vm826_vm2, %v7506_v59, 0.0 }
 0x304   :  { %v1264_v63 = vsel %vm826_vm2, %v7510_v61, 0.0 }
 0x312   :  { %1253 = vadd.xlane.f32.xlu0 %v1252_v54 }
 0x314   :  { %1250 = vadd.xlane.f32.xlu1 %v1249_v56 }
 0x316   :  { %1256 = vadd.xlane.f32.xlu0 %v1255_v58 }
 0x318   :  { %1259 = vadd.xlane.f32.xlu1 %v1258_v60 }
 0x31a   :  { %1262 = vadd.xlane.f32.xlu0 %v1261_v62 }
 0x31c   :  { %1265 = vadd.xlane.f32.xlu1 %v1264_v63 }
 0x366   :  { %v1245_v3 = vpop.xlane.xlu0 %1244 }
 0x367   :  { %7080 = vrcp.f32 %v1245_v3 }
 0x368   :  { %v1248_v4 = vpop.xlane.xlu1 %1247 }
 0x369   :  { %7082 = vrcp.f32 %v1248_v4 }
 0x36a   :  { %v195_v6 = vpop.permute.xlu0 %194 }
 0x36b   :  { %v241_v10 = vshrl.u32 %v195_v6, 16 }
 0x36c   :  { %v193_v9 = vpop.permute.xlu1 %192 }
 0x36d   :  { %v7518_v11 = vpack.i.b16 %v195_v6, %v193_v9  ;;  %v240_v12 = vshrl.u32 %v193_v9, 16 }
 0x36f   :  { %v7524_v16 = vpack.i.b16 %v241_v10, %v240_v12  ;;  %v304_v17 = vrot.slane %v7518_v11, %v7379_v34  ;;  %v297_v9 = vcombine.high %v7518_v11, %v7549_v2  ;;  %v282_v12 = vcombine.high %v7516_v7, %v7549_v2 }
 0x371   :  { %v344_v18 = vcombine.low %v289_v15, %v304_v17  ;;  %v345_v19 = vcombine.high %v289_v15, %v304_v17  ;;  %v438_v22 = vrot.slane %v7524_v16, %v7379_v34  ;;  %v311_v11 = vrot.slane %v297_v9, %v7379_v34 }
 0x373   :  { %v352_v23 = vrot.slane %v344_v18, %v7382_v52  ;;  %v359_v24 = vrot.slane %v345_v19, %v7382_v52  ;;  %v478_v25 = vcombine.low %v423_v20, %v438_v22  ;;  %v479_v26 = vcombine.high %v423_v20, %v438_v22 }
 0x374   :  { %v7081_v43 = vpop.eup %7080 }
 0x375   :  { %v6326_v27 = vcombine.low %v352_v23, %v359_v24  ;;  %v6328_v29 = vcombine.high %v352_v23, %v359_v24  ;;  %v486_v31 = vrot.slane %v478_v25, %v7382_v52  ;;  %v493_v32 = vrot.slane %v479_v26, %v7382_v52 }
 0x376   :  { %v7083_v46 = vpop.eup %7082  ;;  %v1275_v48 = vmul.f32 %v7081_v43, %v7479_v28 }
 0x377   :  { %v533_v33 = vrot.slane %v6326_v27, %v7379_v34  ;;  %v549_v35 = vrot.slane %v6328_v29, %v7379_v34  ;;  %v6330_v36 = vcombine.low %v486_v31, %v493_v32  ;;  %v6332_v37 = vcombine.high %v486_v31, %v493_v32 }
 0x378   :  { %v1276_v56 = vmul.f32 %v7083_v46, %v7483_v30  ;;  %v1283_v3 = vpack.c.bf16 %v1275_v48, %v1275_v48  ;;  %v431_v30 = vcombine.high %v7524_v16, %v7549_v2  ;;  %v296_v16 = vrot.slane %v282_v12, %v7379_v34 }
 0x379   :  { %v566_v38 = vcombine.low %v533_v33, %v549_v35  ;;  %v592_v39 = vrot.slane %v6330_v36, %v7379_v34  ;;  %v608_v40 = vrot.slane %v6332_v37, %v7379_v34 }
 0x37a   :  { %v1284_v6 = vpack.c.bf16 %v1276_v56, %v1276_v56  ;;  %v445_v15 = vrot.slane %v431_v30, %v7379_v34  ;;  %v360_v19 = vcombine.low %v296_v16, %v311_v11  ;;  %v361_v20 = vcombine.high %v296_v16, %v311_v11 }
 0x37b   :  { %v573_v41 = vrot.slane %v566_v38, %v7382_v52  ;;  %v625_v44 = vcombine.low %v592_v39, %v608_v40 }
 0x37c   :  { %v494_v17 = vcombine.low %v430_v14, %v445_v15  ;;  %v495_v18 = vcombine.high %v430_v14, %v445_v15  ;;  %v368_v7 = vrot.slane %v360_v19, %v7382_v52  ;;  %v375_v24 = vrot.slane %v361_v20, %v7382_v52 }
 0x37d   :  { %v576_v45 = vcombine.high %v573_v41, %v7273_v42  ;;  %v632_v47 = vrot.slane %v625_v44, %v7382_v52  ;;  %v781_v13 = vshrl.u32 %v573_v41, 16 }
 0x37e   :  { %v502_v22 = vrot.slane %v494_v17, %v7382_v52  ;;  %v509_v23 = vrot.slane %v495_v18, %v7382_v52  ;;  %v6334_v27 = vcombine.low %v368_v7, %v375_v24  ;;  %v6336_v29 = vcombine.high %v368_v7, %v375_v24 }
 0x37f   :  { %v780_v49 = vpack.i.b16 %v632_v47, %v573_v41  ;;  %v782_v50 = vshrl.u32 %v632_v47, 16  ;;  %v635_v54 = vcombine.high %v632_v47, %v7273_v42  ;;  %v787_v58 = vshrl.u32 %v576_v45, 16 }
 0x380   :  { %v6338_v25 = vcombine.low %v502_v22, %v509_v23  ;;  %v6340_v26 = vcombine.high %v502_v22, %v509_v23  ;;  %v651_v35 = vrot.slane %v6334_v27, %v7379_v34  ;;  %v667_v36 = vrot.slane %v6336_v29, %v7379_v34 }
 0x381   :  { %v1296_v60 = vsel %vm1294_vm3, %v780_v49, 0  ;;  %v783_v62 = vpack.i.b16 %v782_v50, %v781_v13  ;;  %v786_v63 = vpack.i.b16 %v635_v54, %v576_v45  ;;  %v788_v1 = vshrl.u32 %v635_v54, 16 }
 0x382   :  { %6647 = vmatpush3.bf16.msra.mxu1 %v1296_v60  ;;  %v710_v31 = vrot.slane %v6338_v25, %v7379_v34  ;;  %v726_v32 = vrot.slane %v6340_v26, %v7379_v34  ;;  %v684_v40 = vcombine.low %v651_v35, %v667_v36 }
 0x383   :  { %v1342_v28 = vsel %vm1294_vm3, %v783_v62, 0  ;;  %6658 = vmatprep.subr.bf16.mxu1 %v7262_v0  ;;  %v789_v4 = vpack.i.b16 %v788_v1, %v787_v58  ;;  %v1388_v5 = vsel %vm1294_vm3, %v786_v63, 0 }
 0x384   :  { %6653 = vmatpush3.bf16.msra.mxu0 %v1342_v28  ;;  %v743_v38 = vcombine.low %v710_v31, %v726_v32  ;;  %v691_v44 = vrot.slane %v684_v40, %v7382_v52 }
 0x385   :  { %6649 = vmatmul.mubr.msk.bf16.vlgmr.msra.gmra.mxu1 %vm826_vm2, %v1283_v3  ;;  %6664 = vmatprep.subr.bf16.mxu0 %v7262_v0  ;;  %v1434_v10 = vsel %vm1294_vm3, %v789_v4, 0 }
 0x386   :  { %6659 = vmatpush3.bf16.msra.mxu1 %v1388_v5  ;;  %6660 = vmatprep.mubr.msk.bf16.mxu1 %vm7263_vm0, %v7262_v0  ;;  %v750_v43 = vrot.slane %v743_v38, %v7382_v52  ;;  %v817_v48 = vshrl.u32 %v691_v44, 16  ;;  %v694_v63 = vcombine.high %v691_v44, %v7273_v42 }
 0x387   :  { %6655 = vmatmul.mubr.msk.bf16.vlgmr.msra.gmra.mxu0 %vm826_vm2, %v1284_v6  ;;  %6670 = vmatprep.subr.bf16.mxu1 %v7262_v0 }
 0x388   :  { %6665 = vmatpush3.bf16.msra.mxu0 %v1434_v10  ;;  %6666 = vmatprep.mubr.msk.bf16.mxu0 %vm7263_vm0, %v7262_v0  ;;  %v818_v46 = vshrl.u32 %v750_v43, 16  ;;  %v753_v54 = vcombine.high %v750_v43, %v7273_v42  ;;  %v816_v62 = vpack.i.b16 %v750_v43, %v691_v44  ;;  %v823_v5 = vshrl.u32 %v694_v63, 16 }
 0x389   :  { %6676 = vmatprep.subr.bf16.mxu0 %v7262_v0 }
 0x38a   :  { %v819_v50 = vpack.i.b16 %v818_v46, %v817_v48  ;;  %v824_v4 = vshrl.u32 %v753_v54, 16  ;;  %v822_v10 = vpack.i.b16 %v753_v54, %v694_v63 }
 0x38c   :  { %v1526_v28 = vsel %vm1294_vm3, %v819_v50, 0  ;;  %v825_v6 = vpack.i.b16 %v824_v4, %v823_v5 }
 0x38e   :  { %v1618_v15 = vsel %vm1294_vm3, %v825_v6, 0 }
 0x39b   :  { %v1254_v33 = vpop.xlane.xlu0 %1253 }
 0x39c   :  { %7084 = vrcp.f32 %v1254_v33 }
 0x39d   :  { %v1251_v37 = vpop.xlane.xlu1 %1250 }
 0x39e   :  { %7086 = vrcp.f32 %v1251_v37 }
 0x39f   :  { %v1257_v39 = vpop.xlane.xlu0 %1256 }
 0x3a0   :  { %7088 = vrcp.f32 %v1257_v39 }
 0x3a1   :  { %v1260_v41 = vpop.xlane.xlu1 %1259 }
 0x3a2   :  { %7090 = vrcp.f32 %v1260_v41 }
 0x3a3   :  { %v1263_v47 = vpop.xlane.xlu0 %1262 }
 0x3a5   :  { %v1266_v45 = vpop.xlane.xlu1 %1265 }
 0x3a6   :  { %7092 = vrcp.f32 %v1266_v45 }
 0x3a7   :  { %7094 = vrcp.f32 %v1263_v47 }
 0x3a9   :  { %v7085_v49 = vpop.eup %7084 }
 0x3aa   :  { %v1278_v13 = vmul.f32 %v7085_v49, %v7492_v51  ;;  %v1480_v51 = vsel %vm1294_vm3, %v816_v62, 0 }
 0x3ab   :  { %v7087_v56 = vpop.eup %7086 }
 0x3ac   :  { %v1286_v58 = vpack.c.bf16 %v1278_v13, %v1278_v13  ;;  %v1277_v60 = vmul.f32 %v7087_v56, %v7494_v53 }
 0x3ad   :  { %v7089_v1 = vpop.eup %7088 }
 0x3ae   :  { %6667 = vmatmul.mubr.msk.bf16.vlgmr.msra.gmra.mxu0 %vm826_vm2, %v1286_v58  ;;  %v1285_v3 = vpack.c.bf16 %v1277_v60, %v1277_v60  ;;  %v1279_v8 = vmul.f32 %v7089_v1, %v7498_v55 }
 0x3af   :  { %v7091_v30 = vpop.eup %7090  ;;  %6677 = vmatpush3.bf16.msra.mxu0 %v1526_v28  ;;  %6678 = vmatprep.mubr.msk.bf16.mxu0 %vm7263_vm0, %v7262_v0 }
 0x3b0   :  { %6661 = vmatmul.mubr.msk.bf16.vlgmr.msra.gmra.mxu1 %vm826_vm2, %v1285_v3  ;;  %6688 = vmatprep.subr.bf16.mxu0 %v7262_v0  ;;  %v1280_v53 = vmul.f32 %v7091_v30, %v7502_v57  ;;  %v1287_v14 = vpack.c.bf16 %v1279_v8, %v1279_v8  ;;  %v1572_v57 = vsel %vm1294_vm3, %v822_v10, 0 }
 0x3b1   :  { %6671 = vmatpush3.bf16.msra.mxu1 %v1480_v51  ;;  %6672 = vmatprep.mubr.msk.bf16.mxu1 %vm7263_vm0, %v7262_v0 }
 0x3b2   :  { %6682 = vmatprep.subr.bf16.mxu1 %v7262_v0  ;;  %v1288_v9 = vpack.c.bf16 %v1280_v53, %v1280_v53 }
 0x3b3   :  { %v7093_v12 = vpop.eup %7092 }
 0x3b4   :  { %v7095_v11 = vpop.eup %7094  ;;  %v1282_v16 = vmul.f32 %v7093_v12, %v7510_v61 }
 0x3b5   :  { %v1281_v55 = vmul.f32 %v7095_v11, %v7506_v59 }
 0x3b6   :  { %6679 = vmatmul.mubr.msk.bf16.vlgmr.msra.gmra.mxu0 %vm826_vm2, %v1288_v9  ;;  %v1290_v17 = vpack.c.bf16 %v1282_v16, %v1282_v16 }
 0x3b7   :  { %6689 = vmatpush3.bf16.msra.mxu0 %v1618_v15  ;;  %6690 = vmatprep.mubr.msk.bf16.mxu0 %vm7263_vm0, %v7262_v0  ;;  %v1289_v18 = vpack.c.bf16 %v1281_v55, %v1281_v55 }
 0x3b8   :  { %6673 = vmatmul.mubr.msk.bf16.vlgmr.msra.gmra.mxu1 %vm826_vm2, %v1287_v14  ;;  %6702 = vmatprep.subr.bf16.mxu0 %v7262_v0 }
 0x3b9   :  { %6683 = vmatpush3.bf16.msra.mxu1 %v1572_v57  ;;  %6684 = vmatprep.mubr.msk.bf16.mxu1 %vm7263_vm0, %v7262_v0 }
 0x3ba   :  { %6694 = vmatprep.subr.bf16.mxu1 %v7262_v0 }
 0x3be   :  { %6691 = vmatmul.mubr.msk.bf16.vlgmr.msra.gmra.mxu0 %vm826_vm2, %v1290_v17 }
 0x3bf   :  { %6706 = vmatprep.mubr.msk.bf16.mxu0 %vm7263_vm0, %v7262_v0 }
 0x3c0   :  { %6685 = vmatmul.mubr.msk.bf16.vlgmr.msra.gmra.mxu1 %vm826_vm2, %v1289_v18 }
 0x3c1   :  { %6698 = vmatprep.mubr.msk.bf16.mxu1 %vm7263_vm0, %v7262_v0 }
 0x445   :  { %v1332_v61 = vpop.f32.mrf.mxu1 }
 0x447   :  { %v6650_v19 = vpop.f32.mrf.mxu1  ;;  %v1378_v20 = vpop.f32.mrf.mxu0 }
 0x449   :  { %v1335_v22 = vpop.f32.mrf.mxu1  ;;  %v6656_v23 = vpop.f32.mrf.mxu0 }
 0x44b   :  { %v6651_v59 = vpop.f32.mrf.mxu1  ;;  %v1381_v7 = vpop.f32.mrf.mxu0 }
 0x44d   :  { %v6657_v24 = vpop.f32.mrf.mxu0 }
 0x46e   :  { %v1470_v25 = vpop.f32.mrf.mxu0 }
 0x46f   :  { %v1676_v26 = vcombine.low %v1378_v20, %v1470_v25  ;;  %v1677_v27 = vcombine.high %v1378_v20, %v1470_v25 }
 0x470   :  { %v1424_v29 = vpop.f32.mrf.mxu1  ;;  %v6668_v31 = vpop.f32.mrf.mxu0 }
 0x471   :  { %v1660_v32 = vcombine.low %v1332_v61, %v1424_v29  ;;  %v1661_v33 = vcombine.high %v1332_v61, %v1424_v29  ;;  %v1684_v37 = vrot.slane %v1676_v26, %v7379_v34  ;;  %v1691_v38 = vrot.slane %v1677_v27, %v7379_v34 }
 0x472   :  { %v6662_v35 = vpop.f32.mrf.mxu1  ;;  %v1473_v36 = vpop.f32.mrf.mxu0 }
 0x473   :  { %v1668_v39 = vrot.slane %v1660_v32, %v7379_v34  ;;  %v1675_v40 = vrot.slane %v1661_v33, %v7379_v34 }
 0x474   :  { %v1427_v41 = vpop.f32.mrf.mxu1  ;;  %v6669_v43 = vpop.f32.mrf.mxu0 }
 0x475   :  { %v1692_v44 = vcombine.low %v1668_v39, %v1684_v37  ;;  %v1693_v45 = vcombine.high %v1668_v39, %v1684_v37  ;;  %v1708_v46 = vcombine.low %v1675_v40, %v1691_v38  ;;  %v1709_v47 = vcombine.high %v1675_v40, %v1691_v38 }
 0x476   :  { %v6663_v48 = vpop.f32.mrf.mxu1  ;;  %v1562_v49 = vpop.f32.mrf.mxu0 }
 0x477   :  { %v1700_v13 = vrot.slane %v1692_v44, %v7382_v52  ;;  %v1707_v50 = vrot.slane %v1693_v45, %v7382_v52  ;;  %v1716_v54 = vrot.slane %v1708_v46, %v7382_v52  ;;  %v1723_v56 = vrot.slane %v1709_v47, %v7382_v52  ;;  %v7056_v46 = vld [vmem:[%s8518_s2 + $0x8] sm:$0xff]  }
 0x478   :  { %v1516_v58 = vpop.f32.mrf.mxu1  ;;  %v6680_v60 = vpop.f32.mrf.mxu0  ;;  %6695 = vmatpush3.bf16.msra.mxu1 %v7056_v46 }
 0x479   :  { %v1796_v62 = vcombine.low %v1700_v13, %v1707_v50  ;;  %v6357_v63 = vcombine.high %v1700_v13, %v1707_v50  ;;  %v1812_v1 = vcombine.low %v1716_v54, %v1723_v56  ;;  %v6358_v28 = vcombine.high %v1716_v54, %v1723_v56  ;;  %6696 = vmatprep.subr.bf16.mxu1 %v7262_v0 }
 0x47a   :  { %v6674_v3 = vpop.f32.mrf.mxu1  ;;  %v1565_v4 = vpop.f32.mrf.mxu0 }
 0x47b   :  { %v1803_v30 = vrot.slane %v1796_v62, %v7379_v34  ;;  %v1811_v51 = vrot.slane %v6357_v63, %v7379_v34  ;;  %v1819_v53 = vrot.slane %v1812_v1, %v7379_v34  ;;  %v1827_v5 = vrot.slane %v6358_v28, %v7379_v34  ;;  %v7057_v4 = vld [vmem:[%s8518_s2] sm:$0xff]  }
 0x47c   :  { %v1519_v6 = vpop.f32.mrf.mxu1  ;;  %v6681_v8 = vpop.f32.mrf.mxu0  ;;  %6697 = vmatpush3.bf16.msra.mxu1 %v7057_v4 }
 0x47d   :  { %v1828_v9 = vcombine.low %v1803_v30, %v1811_v51  ;;  %v1844_v10 = vcombine.low %v1819_v53, %v1827_v5  ;;  %v1829_v39 = vcombine.high %v1803_v30, %v1811_v51  ;;  %v1845_v40 = vcombine.high %v1819_v53, %v1827_v5  ;;  %6710 = vmatprep.subr.bf16.mxu1 %v7262_v0 }
 0x47e   :  { %v6675_v12 = vpop.f32.mrf.mxu1  ;;  %v1654_v15 = vpop.f32.mrf.mxu0 }
 0x47f   :  { %v1744_v14 = vcombine.low %v1562_v49, %v1654_v15  ;;  %v1745_v11 = vcombine.high %v1562_v49, %v1654_v15  ;;  %v7633_v55 = vrot.slane %v1828_v9, %v7382_v52  ;;  %v7636_v17 = vrot.slane %v1844_v10, %v7382_v52 }
 0x480   :  { %v1608_v57 = vpop.f32.mrf.mxu1  ;;  %v6692_v16 = vpop.f32.mrf.mxu0  ;;  %v1843_v50 = vrot.slane %v1829_v39, %v7382_v52  ;;  %v1859_v54 = vrot.slane %v1845_v40, %v7382_v52 }
 0x481   :  { %v1728_v18 = vcombine.low %v1516_v58, %v1608_v57  ;;  %v1729_v61 = vcombine.high %v1516_v58, %v1608_v57  ;;  %v1860_v22 = vcombine.low %v7633_v55, %v7636_v17  ;;  %v1752_v23 = vrot.slane %v1744_v14, %v7379_v34 }
 0x482   :  { %v6686_v19 = vpop.f32.mrf.mxu1  ;;  %v1657_v20 = vpop.f32.mrf.mxu0  ;;  %v1759_v59 = vrot.slane %v1745_v11, %v7379_v34  ;;  %v1862_v30 = vcombine.low %v1843_v50, %v1859_v54  ;;  %v1861_v53 = vcombine.high %v7633_v55, %v7636_v17  ;;  %v1863_v12 = vcombine.high %v1843_v50, %v1859_v54  ;;  %v7687_v17 = vld [vmem:[%s8523_s7] sm:$0xff] }
 0x483   :  { %v1736_v7 = vrot.slane %v1728_v18, %v7379_v34  ;;  %v1743_v24 = vrot.slane %v1729_v61, %v7379_v34  ;;  %v84_v55 = vsub.s32 0, %v7374_v21 }
 0x484   :  { %v1611_v25 = vpop.f32.mrf.mxu1  ;;  %v6693_v26 = vpop.f32.mrf.mxu0 }
 0x485   :  { %v1760_v27 = vcombine.low %v1736_v7, %v1752_v23  ;;  %v1761_v29 = vcombine.high %v1736_v7, %v1752_v23  ;;  %v1776_v31 = vcombine.low %v1743_v24, %v1759_v59  ;;  %v1777_v32 = vcombine.high %v1743_v24, %v1759_v59 }
 0x486   :  { %v6687_v33 = vpop.f32.mrf.mxu1 }
 0x487   :  { %v1768_v35 = vrot.slane %v1760_v27, %v7382_v52  ;;  %v1775_v36 = vrot.slane %v1761_v29, %v7382_v52  ;;  %v1784_v37 = vrot.slane %v1776_v31, %v7382_v52  ;;  %v1791_v38 = vrot.slane %v1777_v32, %v7382_v52 }
 0x489   :  { %v1864_v41 = vcombine.low %v1768_v35, %v1775_v36  ;;  %v6359_v43 = vcombine.high %v1768_v35, %v1775_v36  ;;  %v1880_v44 = vcombine.low %v1784_v37, %v1791_v38  ;;  %v6360_v45 = vcombine.high %v1784_v37, %v1791_v38  ;;  %v7188_v35 = vld [vmem:[%s8516_s0] sm:$0xff] }
 0x48b   :  { %v1871_v47 = vrot.slane %v1864_v41, %v7379_v34  ;;  %v1879_v48 = vrot.slane %v6359_v43, %v7379_v34  ;;  %v1887_v49 = vrot.slane %v1880_v44, %v7379_v34  ;;  %v1895_v13 = vrot.slane %v6360_v45, %v7379_v34  ;;  %v7189_v41 = vld [vmem:[%s8516_s0 + $0x8] sm:$0xff] }
 0x48d   :  { %v1897_v56 = vcombine.high %v1871_v47, %v1879_v48  ;;  %v1913_v58 = vcombine.high %v1887_v49, %v1895_v13  ;;  %v1896_v60 = vcombine.low %v1871_v47, %v1879_v48  ;;  %v1912_v62 = vcombine.low %v1887_v49, %v1895_v13 }
 0x48f   :  { %v1911_v63 = vrot.slane %v1897_v56, %v7382_v52  ;;  %v1927_v1 = vrot.slane %v1913_v58, %v7382_v52  ;;  %v1904_v28 = vrot.slane %v1896_v60, %v7382_v52  ;;  %v1920_v3 = vrot.slane %v1912_v62, %v7382_v52  ;;  %v7058_v60 = vld [vmem:[#allocation2 + $0x8] sm:$0xff]   ;;  %v7059_v62 = vld [vmem:[#allocation2] sm:$0xff]  }
 0x490   :  { %6703 = vmatpush3.bf16.msra.mxu0 %v7058_v60 }
 0x491   :  { %v1930_v51 = vcombine.low %v1911_v63, %v1927_v1  ;;  %v1929_v5 = vcombine.high %v1904_v28, %v1920_v3  ;;  %v1928_v6 = vcombine.low %v1904_v28, %v1920_v3  ;;  %v1931_v10 = vcombine.high %v1911_v63, %v1927_v1  ;;  %6704 = vmatprep.subr.bf16.mxu0 %v7262_v0  ;;  %v7060_v63 = vld [vmem:[%s8520_s4 + $0x18] sm:$0xff]  }
 0x493   :  { %v7014_v8 = vpack.i.bf16 %v1930_v51, %v1862_v30  ;;  %v7009_v9 = vpack.i.bf16 %v1929_v5, %v1861_v53  ;;  %v7019_v15 = vpack.i.bf16 %v1931_v10, %v1863_v12  ;;  %v92_v53 = vsub.s32 2, %v7374_v21 }
 0x494   :  { %6705 = vmatpush3.bf16.msra.mxu0 %v7059_v62 }
 0x495   :  { %7015 = vrot.lane.b32.xlu1 %v7014_v8, %s7277_s3  ;;  %7010 = vrot.lane.b32.xlu0 %v7009_v9, %s7278_s14  ;;  %v7712_v8 = vrot.slane %v7687_v17, %v92_v53  ;;  %v96_v9 = vsub.s32 3, %v7374_v21  ;;  %v100_v53 = vsub.s32 4, %v7374_v21 }
 0x496   :  { %6722 = vmatprep.subr.bf16.mxu0 %v7262_v0 }
 0x499   :  { %7020 = vrot.lane.b32.xlu1 %v7019_v15, %s7279_s15  ;;  %v7716_v15 = vrot.slane %v7687_v17, %v96_v9  ;;  %v7763_v9 = vrot.slane %v7687_v17, %v100_v53 }
 0x507   :  { %v7016_v14 = vpop.permute.xlu1 %7015  ;;  %v7011_v11 = vpop.permute.xlu0 %7010 }
 0x508   :  { %v7013_v57 = vunpack.i.h.bf16 %v7011_v11  ;;  %v7012_v16 = vunpack.i.l.bf16 %v7011_v11  ;;  %v7018_v18 = vunpack.i.h.bf16 %v7016_v14  ;;  %v7017_v61 = vunpack.i.l.bf16 %v7016_v14 }
 0x50a   :  { %v1956_v19 = vsel %vm826_vm2, %v1860_v22, %v7012_v16  ;;  %v1957_v20 = vsel %vm826_vm2, %v1928_v6, %v7013_v57  ;;  %v7690_v22 = vrot.slane %v7687_v17, %v84_v55 }
 0x50b   :  { %v7021_v23 = vpop.permute.xlu1 %7020  ;;  %v1959_v24 = vsel %vm1958_vm4, %v1956_v19, %v7017_v61  ;;  %v1960_v25 = vsel %vm1958_vm4, %v1957_v20, %v7018_v18  ;;  %v7190_v61 = vld [vmem:[%s8517_s1 + $0x8] sm:$0xff]   ;;  %v7191_v19 = vld [vmem:[%s8517_s1] sm:$0xff]   ;;  %v7061_v20 = vld [vmem:[%s8520_s4 + $0x10] sm:$0xff]  }
 0x50c   :  { %v7023_v59 = vunpack.i.h.bf16 %v7021_v23  ;;  %v7022_v7 = vunpack.i.l.bf16 %v7021_v23  ;;  %v7062_v23 = vld [vmem:[%s8520_s4 + $0x8] sm:$0xff]  }
 0x50e   :  { %v1962_v26 = vsel %vm1961_vm5, %v1959_v24, %v7022_v7  ;;  %v1963_v27 = vsel %vm1961_vm5, %v1960_v25, %v7023_v59  ;;  %v7063_v59 = vld [vmem:[%s8520_s4] sm:$0xff]  }
 0x50f   :  { %v1964_v29 = vpack.c.bf16 %v1963_v27, %v1962_v26  ;;  %v6321_v7 = vld [vmem:[%s8522_s6] ss:$0 sm:$0xff] }
 0x511   :  { %6699 = vmatmul.mubr.msk.bf16.vlgmr.msra.gmra.mxu1 %vm127_vm1, %v1964_v29 }
 0x512   :  { %6718 = vmatprep.mubr.msk.bf16.mxu1 %vm7263_vm0, %v7262_v0  ;;  %6711 = vmatpush3.bf16.msra.mxu1 %v7060_v63 }
 0x513   :  { %6712 = vmatprep.subr.bf16.mxu1 %v7262_v0 }
 0x516   :  { %6713 = vmatpush3.bf16.msra.mxu1 %v7061_v20 }
 0x517   :  { %6714 = vmatprep.subr.bf16.mxu1 %v7262_v0 }
 0x51a   :  { %6715 = vmatpush3.bf16.msra.mxu1 %v7062_v23 }
 0x51b   :  { %6716 = vmatprep.subr.bf16.mxu1 %v7262_v0 }
 0x51e   :  { %6717 = vmatpush3.bf16.msra.mxu1 %v7063_v59  ;;  %v7192_v59 = vld [vmem:[%s8521_s5] ss:$0 sm:$0xff] }
 0x51f   :  { %6736 = vmatprep.subr.bf16.mxu1 %v7262_v0 }
 0x5d1   :  { %v2014_v31 = vpop.f32.mrf.mxu1 }
 0x5d2   :  { %v2015_v32 = vadd.f32 %v2014_v31, %v7690_v22 }
 0x5d3   :  { %v6700_v33 = vpop.f32.mrf.mxu1 }
 0x5d4   :  { %v2021_v36 = vadd.f32 %v7188_v35, %v2015_v32  ;;  %v88_v35 = vsub.s32 1, %v7374_v21 }
 0x5d5   :  { %v2017_v37 = vpop.f32.mrf.mxu1 }
 0x5d6   :  { %v2018_v38 = vadd.f32 %v2017_v37, %v7690_v22  ;;  %v2023_v39 = vsel %vm127_vm1, %v2021_v36, 0.0 }
 0x5d7   :  { %2024 = vadd.xlane.f32.xlu0 %v2023_v39  ;;  %v6701_v40 = vpop.f32.mrf.mxu1 }
 0x5d8   :  { %v2022_v43 = vadd.f32 %v7189_v41, %v2018_v38 }
 0x5da   :  { %v2026_v44 = vsel %vm127_vm1, %v2022_v43, 0.0 }
 0x5db   :  { %2027 = vadd.xlane.f32.xlu1 %v2026_v44 }
 0x660   :  { %v2025_v45 = vpop.xlane.xlu0 %2024 }
 0x661   :  { %v2030_v46 = vmul.f32 0.03125, %v2025_v45 }
 0x663   :  { %v2032_v47 = vsub.f32 %v2021_v36, %v2030_v46  ;;  %v7753_v36 = vrot.slane %v7687_v17, %v88_v35 }
 0x664   :  { %v2028_v48 = vpop.xlane.xlu1 %2027 }
 0x665   :  { %v2031_v49 = vmul.f32 0.03125, %v2028_v48  ;;  %v2034_v13 = vmul.f32 %v2032_v47, %v2032_v47 }
 0x667   :  { %v2033_v50 = vsub.f32 %v2022_v43, %v2031_v49  ;;  %v2036_v54 = vsel %vm127_vm1, %v2034_v13, 0.0 }
 0x668   :  { %2037 = vadd.xlane.f32.xlu0 %v2036_v54 }
 0x669   :  { %v2035_v56 = vmul.f32 %v2033_v50, %v2033_v50 }
 0x66b   :  { %v2039_v58 = vsel %vm127_vm1, %v2035_v56, 0.0 }
 0x66c   :  { %2040 = vadd.xlane.f32.xlu0 %v2039_v58 }
 0x6f1   :  { %v2038_v1 = vpop.xlane.xlu0 %2037 }
 0x6f2   :  { %v2042_v28 = vmul.f32 0.03125, %v2038_v1 }
 0x6f4   :  { %v2044_v3 = vadd.f32 1e-05, %v2042_v28 }
 0x6f5   :  { %v2041_v4 = vpop.xlane.xlu0 %2040 }
 0x6f6   :  { %7096 = vrsqrt.f32 %v2044_v3  ;;  %v2043_v30 = vmul.f32 0.03125, %v2041_v4 }
 0x6f8   :  { %v2045_v51 = vadd.f32 1e-05, %v2043_v30 }
 0x6fa   :  { %7098 = vrsqrt.f32 %v2045_v51 }
 0x703   :  { %v7097_v5 = vpop.eup %7096 }
 0x704   :  { %v2048_v6 = vmul.f32 %v7097_v5, %v2032_v47 }
 0x706   :  { %v2050_v14 = vmul.f32 %v2048_v6, %v7712_v8 }
 0x707   :  { %v7099_v10 = vpop.eup %7098 }
 0x708   :  { %v2049_v12 = vmul.f32 %v7099_v10, %v2033_v50  ;;  %v2052_v57 = vadd.f32 %v2050_v14, %v7716_v15  ;;  %v104_v10 = vsub.s32 5, %v7374_v21 }
 0x70a   :  { %v2051_v11 = vmul.f32 %v2049_v12, %v7712_v8 }
 0x70c   :  { %v2053_v16 = vadd.f32 %v2051_v11, %v7716_v15  ;;  %v7767_v11 = vrot.slane %v7687_v17, %v104_v10 }
 0x70e   :  { %v2054_v18 = vpack.c.bf16 %v2053_v16, %v2052_v57 }
 0x710   :  { %6707 = vmatmul.mubr.msk.bf16.vlgmr.msra.gmra.mxu0 %vm127_vm1, %v2054_v18 }
 0x711   :  { %6723 = vmatpush3.bf16.msra.mxu0 %v7190_v61  ;;  %6726 = vmatprep.mubr.msk.bf16.mxu0 %vm7263_vm0, %v7262_v0 }
 0x712   :  { %6724 = vmatprep.subr.bf16.mxu0 %v7262_v0 }
 0x715   :  { %6725 = vmatpush3.bf16.msra.mxu0 %v7191_v19 }
 0x716   :  { %6730 = vmatprep.subr.bf16.mxu0 %v7262_v0 }
 0x7d0   :  { %v2104_v24 = vpop.f32.mrf.mxu0 }
 0x7d1   :  { %v2105_v26 = vadd.f32 %v6321_v7, %v2104_v24 }
 0x7d2   :  { %v6708_v25 = vpop.f32.mrf.mxu0 }
 0x7d3   :  { %v2111_v31 = vmax.f32 %v2105_v26, 0.0 }
 0x7d4   :  { %v2107_v27 = vpop.f32.mrf.mxu0 }
 0x7d5   :  { %v2108_v29 = vadd.f32 %v6321_v7, %v2107_v27 }
 0x7d6   :  { %v6709_v55 = vpop.f32.mrf.mxu0 }
 0x7d7   :  { %v2112_v32 = vmax.f32 %v2108_v29, 0.0 }
 0x7d9   :  { %v2113_v33 = vpack.c.bf16 %v2112_v32, %v2111_v31 }
 0x7db   :  { %6719 = vmatmul.mubr.msk.bf16.vlgmr.msra.gmra.mxu1 %vm2138_vm6, %v2113_v33 }
 0x7dc   :  { %6738 = vmatprep.mubr.msk.bf16.mxu1 %vm7263_vm0, %v7262_v0 }
 0x89b   :  { %v2176_v37 = vpop.f32.mrf.mxu1 }
 0x89c   :  { %v2177_v38 = vadd.f32 %v2176_v37, %v7753_v36 }
 0x89d   :  { %v6720_v39 = vpop.f32.mrf.mxu1 }
 0x89e   :  { %v2183_v40 = vadd.f32 %v2177_v38, %v2052_v57 }
 0x89f   :  { %v2179_v41 = vpop.f32.mrf.mxu1 }
 0x8a0   :  { %v2180_v43 = vadd.f32 %v2179_v41, %v7753_v36  ;;  %v2185_v44 = vsel %vm127_vm1, %v2183_v40, 0.0 }
 0x8a1   :  { %2186 = vadd.xlane.f32.xlu1 %v2185_v44  ;;  %v6721_v45 = vpop.f32.mrf.mxu1 }
 0x8a2   :  { %v2184_v46 = vadd.f32 %v2180_v43, %v2053_v16 }
 0x8a4   :  { %v2188_v47 = vsel %vm127_vm1, %v2184_v46, 0.0 }
 0x8a5   :  { %2189 = vadd.xlane.f32.xlu0 %v2188_v47 }
 0x92a   :  { %v2187_v48 = vpop.xlane.xlu1 %2186 }
 0x92b   :  { %v2191_v49 = vmul.f32 0.03125, %v2187_v48 }
 0x92d   :  { %v2193_v13 = vsub.f32 %v2183_v40, %v2191_v49 }
 0x92e   :  { %v2190_v50 = vpop.xlane.xlu0 %2189 }
 0x92f   :  { %v2192_v54 = vmul.f32 0.03125, %v2190_v50  ;;  %v2195_v56 = vmul.f32 %v2193_v13, %v2193_v13 }
 0x931   :  { %v2194_v58 = vsub.f32 %v2184_v46, %v2192_v54  ;;  %v2197_v60 = vsel %vm127_vm1, %v2195_v56, 0.0 }
 0x932   :  { %2198 = vadd.xlane.f32.xlu1 %v2197_v60 }
 0x933   :  { %v2196_v62 = vmul.f32 %v2194_v58, %v2194_v58 }
 0x935   :  { %v2200_v63 = vsel %vm127_vm1, %v2196_v62, 0.0 }
 0x936   :  { %2201 = vadd.xlane.f32.xlu0 %v2200_v63 }
 0x9bb   :  { %v2199_v1 = vpop.xlane.xlu1 %2198 }
 0x9bc   :  { %v2203_v28 = vmul.f32 0.03125, %v2199_v1 }
 0x9be   :  { %v2205_v3 = vadd.f32 1e-05, %v2203_v28 }
 0x9bf   :  { %v2202_v4 = vpop.xlane.xlu0 %2201 }
 0x9c0   :  { %7100 = vrsqrt.f32 %v2205_v3  ;;  %v2204_v30 = vmul.f32 0.03125, %v2202_v4 }
 0x9c2   :  { %v2206_v51 = vadd.f32 1e-05, %v2204_v30 }
 0x9c4   :  { %7102 = vrsqrt.f32 %v2206_v51 }
 0x9cd   :  { %v7101_v5 = vpop.eup %7100 }
 0x9ce   :  { %v2209_v6 = vmul.f32 %v7101_v5, %v2193_v13 }
 0x9d0   :  { %v2211_v57 = vmul.f32 %v2209_v6, %v7763_v9 }
 0x9d1   :  { %v7103_v12 = vpop.eup %7102 }
 0x9d2   :  { %v2210_v14 = vmul.f32 %v7103_v12, %v2194_v58  ;;  %v7772_v18 = vadd.f32 %v2211_v57, %v7767_v11 }
 0x9d4   :  { %v2212_v16 = vmul.f32 %v2210_v14, %v7763_v9 }
 0x9d6   :  { %v7775_v61 = vadd.f32 %v2212_v16, %v7767_v11 }
 0x9d8   :  { %v2215_v19 = vpack.c.bf16 %v7775_v61, %v7772_v18 }
 0x9da   :  { %6727 = vmatmul.mubr.msk.bf16.vlgmr.msra.gmra.mxu0 %vm127_vm1, %v2215_v19 }
 0x9db   :  { %6732 = vmatprep.mubr.msk.bf16.mxu0 %vm7263_vm0, %v7262_v0 }
 0xa9a   :  { %v2253_v17 = vpop.f32.mrf.mxu0 }
 0xa9b   :  { %v2254_v7 = vadd.f32 %v7192_v59, %v2253_v17 }
 0xa9c   :  { %v6728_v20 = vpop.f32.mrf.mxu0 }
 0xa9e   :  { %v2256_v23 = vpop.f32.mrf.mxu0 }
 0xa9f   :  { %v2257_v24 = vadd.f32 %v7192_v59, %v2256_v23 }
 0xaa0   :  { %v6729_v25 = vpop.f32.mrf.mxu0 }
 0xaa1   :  { %v7785_v26 = vpack.c.bf16 %v2257_v24, %v2254_v7 }
 0xaa3   :  { %2264 = vrot.lane.b32.xlu0 %v7785_v26, %s7267_s24  ;;  %2262 = vrot.lane.b32.xlu1 %v7785_v26, %s7265_s22  ;;  %v2288_v45 = vshrl.u32 %v7785_v26, 16 }
 0xaa7   :  { %2270 = vrot.lane.b32.xlu0 %v7785_v26, %s7269_s26  ;;  %2266 = vrot.lane.b32.xlu1 %v7785_v26, %s7264_s21 }
 0xaab   :  { %2274 = vrot.lane.b32.xlu0 %v7785_v26, %s7270_s27  ;;  %2268 = vrot.lane.b32.xlu1 %v7785_v26, %s7266_s23 }
 0xaaf   :  { %2272 = vrot.lane.b32.xlu1 %v7785_v26, %s7268_s25 }
 0xb15   :  { %v2265_v27 = vpop.permute.xlu0 %2264  ;;  %v2263_v29 = vpop.permute.xlu1 %2262 }
 0xb16   :  { %v2289_v37 = vshrl.u32 %v2263_v29, 16  ;;  %v2286_v40 = vpack.i.b16 %v2263_v29, %v7785_v26  ;;  %v2296_v44 = vshrl.u32 %v2265_v27, 16 }
 0xb18   :  { %v2290_v54 = vpack.i.b16 %v2289_v37, %v2288_v45 }
 0xb19   :  { %v2267_v55 = vpop.permute.xlu1 %2266  ;;  %v2271_v31 = vpop.permute.xlu0 %2270 }
 0xb1a   :  { %v2305_v38 = vshrl.u32 %v2271_v31, 16  ;;  %v2297_v41 = vshrl.u32 %v2267_v55, 16  ;;  %v2294_v46 = vpack.i.b16 %v2267_v55, %v2265_v27 }
 0xb1c   :  { %v2298_v56 = vpack.i.b16 %v2297_v41, %v2296_v44 }
 0xb1d   :  { %v2269_v32 = vpop.permute.xlu1 %2268  ;;  %v2275_v39 = vpop.permute.xlu0 %2274 }
 0xb1e   :  { %v2304_v33 = vshrl.u32 %v2269_v32, 16  ;;  %v2302_v35 = vpack.i.b16 %v2271_v31, %v2269_v32  ;;  %v2313_v48 = vshrl.u32 %v2275_v39, 16 }
 0xb20   :  { %v2306_v47 = vpack.i.b16 %v2305_v38, %v2304_v33  ;;  %v2332_v49 = vcombine.low %v2286_v40, %v2302_v35  ;;  %v2333_v63 = vcombine.high %v2286_v40, %v2302_v35 }
 0xb21   :  { %v2273_v43 = vpop.permute.xlu1 %2272 }
 0xb22   :  { %v2310_v13 = vpack.i.b16 %v2275_v39, %v2273_v43  ;;  %v2312_v50 = vshrl.u32 %v2273_v43, 16  ;;  %v2466_v1 = vcombine.low %v2290_v54, %v2306_v47  ;;  %v2467_v28 = vcombine.high %v2290_v54, %v2306_v47 }
 0xb23   :  { %v2340_v3 = vrot.slane %v2332_v49, %v7379_v34  ;;  %v2347_v16 = vrot.slane %v2333_v63, %v7379_v34 }
 0xb24   :  { %v2314_v58 = vpack.i.b16 %v2313_v48, %v2312_v50  ;;  %v2348_v60 = vcombine.low %v2294_v46, %v2310_v13  ;;  %v2349_v62 = vcombine.high %v2294_v46, %v2310_v13  ;;  %v2474_v10 = vrot.slane %v2466_v1, %v7379_v34 }
 0xb25   :  { %v2481_v12 = vrot.slane %v2467_v28, %v7379_v34 }
 0xb26   :  { %v2356_v4 = vrot.slane %v2348_v60, %v7379_v34  ;;  %v2482_v30 = vcombine.low %v2298_v56, %v2314_v58  ;;  %v2483_v51 = vcombine.high %v2298_v56, %v2314_v58  ;;  %v2363_v53 = vrot.slane %v2349_v62, %v7379_v34 }
 0xb28   :  { %v2394_v5 = vcombine.low %v2340_v3, %v2356_v4  ;;  %v2395_v6 = vcombine.high %v2340_v3, %v2356_v4  ;;  %v2490_v14 = vrot.slane %v2482_v30, %v7379_v34  ;;  %v2497_v57 = vrot.slane %v2483_v51, %v7379_v34 }
 0xb29   :  { %v2410_v24 = vcombine.low %v2347_v16, %v2363_v53  ;;  %v2411_v25 = vcombine.high %v2347_v16, %v2363_v53 }
 0xb2a   :  { %v2402_v19 = vrot.slane %v2394_v5, %v7382_v52  ;;  %v2409_v17 = vrot.slane %v2395_v6, %v7382_v52  ;;  %v2528_v20 = vcombine.low %v2474_v10, %v2490_v14  ;;  %v2529_v23 = vcombine.high %v2474_v10, %v2490_v14 }
 0xb2b   :  { %v2544_v59 = vcombine.low %v2481_v12, %v2497_v57  ;;  %v2545_v7 = vcombine.high %v2481_v12, %v2497_v57  ;;  %v2418_v40 = vrot.slane %v2410_v24, %v7382_v52  ;;  %v2425_v41 = vrot.slane %v2411_v25, %v7382_v52 }
 0xb2c   :  { %v6373_v27 = vcombine.low %v2402_v19, %v2409_v17  ;;  %v6375_v29 = vcombine.high %v2402_v19, %v2409_v17  ;;  %v2536_v55 = vrot.slane %v2528_v20, %v7382_v52  ;;  %v2543_v31 = vrot.slane %v2529_v23, %v7382_v52 }
 0xb2d   :  { %v2552_v32 = vrot.slane %v2544_v59, %v7382_v52  ;;  %v2559_v33 = vrot.slane %v2545_v7, %v7382_v52  ;;  %v6381_v13 = vcombine.low %v2418_v40, %v2425_v41  ;;  %v6383_v50 = vcombine.high %v2418_v40, %v2425_v41 }
 0xb2e   :  { %v2608_v35 = vrot.slane %v6373_v27, %v7379_v34  ;;  %v2624_v37 = vrot.slane %v6375_v29, %v7379_v34  ;;  %v6377_v38 = vcombine.low %v2536_v55, %v2543_v31  ;;  %v6379_v39 = vcombine.high %v2536_v55, %v2543_v31 }
 0xb2f   :  { %v6385_v46 = vcombine.low %v2552_v32, %v2559_v33  ;;  %v6387_v47 = vcombine.high %v2552_v32, %v2559_v33  ;;  %v2726_v4 = vrot.slane %v6381_v13, %v7379_v34  ;;  %v2742_v30 = vrot.slane %v6383_v50, %v7379_v34 }
 0xb30   :  { %v2633_v43 = vcombine.high %v2608_v35, %v2624_v37  ;;  %v2667_v44 = vrot.slane %v6377_v38, %v7379_v34  ;;  %v2683_v45 = vrot.slane %v6379_v39, %v7379_v34  ;;  %v2632_v58 = vcombine.low %v2608_v35, %v2624_v37 }
 0xb31   :  { %v2785_v60 = vrot.slane %v6385_v46, %v7379_v34  ;;  %v2801_v62 = vrot.slane %v6387_v47, %v7379_v34  ;;  %v2751_v20 = vcombine.high %v2726_v4, %v2742_v30  ;;  %v2750_v40 = vcombine.low %v2726_v4, %v2742_v30 }
 0xb32   :  { %v2647_v48 = vrot.slane %v2633_v43, %v7382_v52  ;;  %v2692_v49 = vcombine.high %v2667_v44, %v2683_v45  ;;  %v2691_v54 = vcombine.low %v2667_v44, %v2683_v45  ;;  %v2640_v12 = vrot.slane %v2632_v58, %v7382_v52 }
 0xb33   :  { %v2810_v57 = vcombine.high %v2785_v60, %v2801_v62  ;;  %v2765_v55 = vrot.slane %v2751_v20, %v7382_v52  ;;  %v2809_v35 = vcombine.low %v2785_v60, %v2801_v62  ;;  %v2758_v50 = vrot.slane %v2750_v40, %v7382_v52 }
 0xb34   :  { %v2706_v56 = vrot.slane %v2692_v49, %v7382_v52  ;;  %v2851_v1 = vshrl.u32 %v2647_v48, 16  ;;  %v2699_v5 = vrot.slane %v2691_v54, %v7382_v52  ;;  %v2657_v6 = vcombine.high %v2647_v48, %v7273_v42 }
 0xb35   :  { %v2839_v59 = vshrl.u32 %v2640_v12, 16  ;;  %v2824_v24 = vrot.slane %v2810_v57, %v7382_v52  ;;  %v2656_v32 = vcombine.high %v2640_v12, %v7273_v42  ;;  %v2887_v39 = vshrl.u32 %v2765_v55, 16 }
 0xb36   :  { %v2850_v63 = vpack.i.b16 %v2706_v56, %v2647_v48  ;;  %v2852_v28 = vshrl.u32 %v2706_v56, 16  ;;  %v2716_v3 = vcombine.high %v2706_v56, %v7273_v42  ;;  %v2840_v19 = vshrl.u32 %v2699_v5, 16 }
 0xb37   :  { %v2857_v17 = vshrl.u32 %v2657_v6, 16  ;;  %v2838_v23 = vpack.i.b16 %v2699_v5, %v2640_v12  ;;  %v2715_v29 = vcombine.high %v2699_v5, %v7273_v42  ;;  %v2888_v33 = vshrl.u32 %v2824_v24, 16 }
 0xb38   :  { %v2912_v51 = vsel %vm826_vm2, %v2850_v63, 0  ;;  %v2853_v53 = vpack.i.b16 %v2852_v28, %v2851_v1  ;;  %v2858_v14 = vshrl.u32 %v2716_v3, 16  ;;  %v2856_v16 = vpack.i.b16 %v2716_v3, %v2657_v6 }
 0xb39   :  { %6731 = vmatpush3.bf16.xpose.msra.mxu0 %v2912_v51  ;;  %v2841_v27 = vpack.i.b16 %v2840_v19, %v2839_v59  ;;  %v2886_v37 = vpack.i.b16 %v2824_v24, %v2765_v55  ;;  %v2846_v38 = vshrl.u32 %v2715_v29, 16  ;;  %v2844_v41 = vpack.i.b16 %v2715_v29, %v2656_v32 }
 0xb3a   :  { %v2958_v10 = vsel %vm826_vm2, %v2853_v53, 0  ;;  %6742 = vmatprep.subr.bf16.mxu0 %v7262_v0  ;;  %v2859_v7 = vpack.i.b16 %v2858_v14, %v2857_v17  ;;  %v3004_v25 = vsel %vm826_vm2, %v2856_v16, 0  ;;  %v2845_v43 = vshrl.u32 %v2656_v32, 16 }
 0xb3b   :  { %6737 = vmatpush3.bf16.xpose.msra.mxu1 %v2958_v10  ;;  %v2889_v44 = vpack.i.b16 %v2888_v33, %v2887_v39  ;;  %v2834_v45 = vcombine.high %v2824_v24, %v7273_v42  ;;  %v3096_v46 = vsel %vm826_vm2, %v2886_v37, 0  ;;  %v2817_v48 = vrot.slane %v2809_v35, %v7382_v52 }
 0xb3c   :  { %6748 = vmatprep.subr.bf16.mxu1 %v7262_v0  ;;  %v3050_v31 = vsel %vm826_vm2, %v2859_v7, 0  ;;  %v2847_v47 = vpack.i.b16 %v2846_v38, %v2845_v43  ;;  %v2775_v49 = vcombine.high %v2765_v55, %v7273_v42  ;;  %v2875_v63 = vshrl.u32 %v2758_v50, 16 }
 0xb3d   :  { %v3142_v13 = vsel %vm826_vm2, %v2889_v44, 0  ;;  %v2894_v54 = vshrl.u32 %v2834_v45, 16  ;;  %v2876_v58 = vshrl.u32 %v2817_v48, 16  ;;  %v2874_v62 = vpack.i.b16 %v2817_v48, %v2758_v50 }
 0xb3e   :  { %v2892_v56 = vpack.i.b16 %v2834_v45, %v2775_v49  ;;  %v2893_v60 = vshrl.u32 %v2775_v49, 16  ;;  %v2833_v4 = vcombine.high %v2817_v48, %v7273_v42  ;;  %v2774_v51 = vcombine.high %v2758_v50, %v7273_v42 }
 0xb3f   :  { %v2877_v3 = vpack.i.b16 %v2876_v58, %v2875_v63 }
 0xb40   :  { %6733 = vmatmul.mubr.msk.bf16.vlgmr.msra.gmra.mxu0 %vm826_vm2, %v2838_v23  ;;  %v2895_v1 = vpack.i.b16 %v2894_v54, %v2893_v60  ;;  %v3188_v28 = vsel %vm826_vm2, %v2892_v56, 0  ;;  %v2882_v53 = vshrl.u32 %v2833_v4, 16  ;;  %v2880_v5 = vpack.i.b16 %v2833_v4, %v2774_v51 }
 0xb41   :  { %6743 = vmatpush3.bf16.xpose.msra.mxu0 %v3004_v25  ;;  %6744 = vmatprep.mubr.msk.bf16.mxu0 %vm7263_vm0, %v7262_v0  ;;  %v2881_v6 = vshrl.u32 %v2774_v51, 16 }
 0xb42   :  { %6739 = vmatmul.mubr.msk.bf16.vlgmr.msra.gmra.mxu1 %vm826_vm2, %v2841_v27  ;;  %6754 = vmatprep.subr.bf16.mxu0 %v7262_v0  ;;  %v3234_v30 = vsel %vm826_vm2, %v2895_v1, 0 }
 0xb43   :  { %6749 = vmatpush3.bf16.xpose.msra.mxu1 %v3050_v31  ;;  %6750 = vmatprep.mubr.msk.bf16.mxu1 %vm7263_vm0, %v7262_v0  ;;  %v2883_v10 = vpack.i.b16 %v2882_v53, %v2881_v6 }
 0xb44   :  { %6760 = vmatprep.subr.bf16.mxu1 %v7262_v0 }
 0xb48   :  { %6745 = vmatmul.mubr.msk.bf16.vlgmr.msra.gmra.mxu0 %vm826_vm2, %v2844_v41 }
 0xb49   :  { %6755 = vmatpush3.bf16.xpose.msra.mxu0 %v3096_v46  ;;  %6756 = vmatprep.mubr.msk.bf16.mxu0 %vm7263_vm0, %v7262_v0 }
 0xb4a   :  { %6751 = vmatmul.mubr.msk.bf16.vlgmr.msra.gmra.mxu1 %vm826_vm2, %v2847_v47  ;;  %6766 = vmatprep.subr.bf16.mxu0 %v7262_v0 }
 0xb4b   :  { %6761 = vmatpush3.bf16.xpose.msra.mxu1 %v3142_v13  ;;  %6762 = vmatprep.mubr.msk.bf16.mxu1 %vm7263_vm0, %v7262_v0 }
 0xb4c   :  { %6772 = vmatprep.subr.bf16.mxu1 %v7262_v0 }
 0xb50   :  { %6757 = vmatmul.mubr.msk.bf16.vlgmr.msra.gmra.mxu0 %vm826_vm2, %v2874_v62 }
 0xb51   :  { %6767 = vmatpush3.bf16.xpose.msra.mxu0 %v3188_v28  ;;  %6768 = vmatprep.mubr.msk.bf16.mxu0 %vm7263_vm0, %v7262_v0 }
 0xb52   :  { %6763 = vmatmul.mubr.msk.bf16.vlgmr.msra.gmra.mxu1 %vm826_vm2, %v2877_v3  ;;  %6778 = vmatprep.subr.bf16.mxu0 %v7262_v0 }
 0xb53   :  { %6773 = vmatpush3.bf16.xpose.msra.mxu1 %v3234_v30  ;;  %6774 = vmatprep.mubr.msk.bf16.mxu1 %vm7263_vm0, %v7262_v0 }
 0xb54   :  { %6784 = vmatprep.subr.bf16.mxu1 %v7262_v0 }
 0xb58   :  { %6769 = vmatmul.mubr.msk.bf16.vlgmr.msra.gmra.mxu0 %vm826_vm2, %v2880_v5 }
 0xb59   :  { %6780 = vmatprep.mubr.msk.bf16.mxu0 %vm7263_vm0, %v7262_v0 }
 0xb5a   :  { %6775 = vmatmul.mubr.msk.bf16.vlgmr.msra.gmra.mxu1 %vm826_vm2, %v2883_v10 }
 0xb5b   :  { %6786 = vmatprep.mubr.msk.bf16.mxu1 %vm7263_vm0, %v7262_v0 }
 0xc00   :  { %v2948_v12 = vpop.f32.mrf.mxu0 }
 0xc01   :  { %v3276_v14 = vsel %vm826_vm2, %v2948_v12, -inf }
 0xc02   :  { %v2994_v57 = vpop.f32.mrf.mxu1  ;;  %3277 = vmax.xlane.f32.xlu1 %v3276_v14  ;;  %v6734_v16 = vpop.f32.mrf.mxu0 }
 0xc03   :  { %v3279_v19 = vsel %vm826_vm2, %v2994_v57, -inf }
 0xc04   :  { %3280 = vmax.xlane.f32.xlu0 %v3279_v19  ;;  %v2951_v17 = vpop.f32.mrf.mxu0  ;;  %v6740_v20 = vpop.f32.mrf.mxu1 }
 0xc06   :  { %v6735_v23 = vpop.f32.mrf.mxu0  ;;  %v2997_v59 = vpop.f32.mrf.mxu1 }
 0xc08   :  { %v6741_v7 = vpop.f32.mrf.mxu1  ;;  %v7885_v24 = vpop.f32.mrf.mxu0 }
 0xc09   :  { %v3282_v25 = vsel %vm826_vm2, %v7885_v24, -inf }
 0xc0a   :  { %v3086_v27 = vpop.f32.mrf.mxu1  ;;  %3283 = vmax.xlane.f32.xlu0 %v3282_v25  ;;  %v6746_v29 = vpop.f32.mrf.mxu0 }
 0xc0b   :  { %v3285_v55 = vsel %vm826_vm2, %v3086_v27, -inf }
 0xc0c   :  { %v6752_v31 = vpop.f32.mrf.mxu1  ;;  %3286 = vmax.xlane.f32.xlu1 %v3285_v55  ;;  %v3043_v32 = vpop.f32.mrf.mxu0 }
 0xc0e   :  { %v6747_v33 = vpop.f32.mrf.mxu0  ;;  %v3089_v35 = vpop.f32.mrf.mxu1 }
 0xc10   :  { %v6753_v37 = vpop.f32.mrf.mxu1  ;;  %v3132_v38 = vpop.f32.mrf.mxu0 }
 0xc11   :  { %v3288_v39 = vsel %vm826_vm2, %v3132_v38, -inf }
 0xc12   :  { %v3178_v40 = vpop.f32.mrf.mxu1  ;;  %3289 = vmax.xlane.f32.xlu0 %v3288_v39  ;;  %v6758_v41 = vpop.f32.mrf.mxu0 }
 0xc13   :  { %v3291_v43 = vsel %vm826_vm2, %v3178_v40, -inf }
 0xc14   :  { %v6764_v44 = vpop.f32.mrf.mxu1  ;;  %3292 = vmax.xlane.f32.xlu1 %v3291_v43  ;;  %v3135_v45 = vpop.f32.mrf.mxu0 }
 0xc16   :  { %v6759_v46 = vpop.f32.mrf.mxu0  ;;  %v3181_v47 = vpop.f32.mrf.mxu1 }
 0xc18   :  { %v6765_v48 = vpop.f32.mrf.mxu1  ;;  %v3224_v49 = vpop.f32.mrf.mxu0 }
 0xc19   :  { %v3294_v13 = vsel %vm826_vm2, %v3224_v49, -inf }
 0xc1a   :  { %v3270_v50 = vpop.f32.mrf.mxu1  ;;  %3295 = vmax.xlane.f32.xlu0 %v3294_v13  ;;  %v6770_v54 = vpop.f32.mrf.mxu0 }
 0xc1b   :  { %v3297_v56 = vsel %vm826_vm2, %v3270_v50, -inf }
 0xc1c   :  { %v6776_v58 = vpop.f32.mrf.mxu1  ;;  %3298 = vmax.xlane.f32.xlu1 %v3297_v56  ;;  %v3227_v60 = vpop.f32.mrf.mxu0 }
 0xc1e   :  { %v6771_v62 = vpop.f32.mrf.mxu0  ;;  %v3273_v63 = vpop.f32.mrf.mxu1 }
 0xc20   :  { %v6777_v1 = vpop.f32.mrf.mxu1 }
 0xc2d   :  { %2278 = vrot.lane.b32.xlu1 %v7785_v26, %s7274_s28 }
 0xc30   :  { %2276 = vrot.lane.b32.xlu0 %v7785_v26, %s7260_s30 }
 0xc8b   :  { %v3278_v28 = vpop.xlane.xlu1 %3277 }
 0xc8c   :  { %v3300_v3 = vsub.f32 %v2948_v12, %v3278_v28 }
 0xc8d   :  { %v3281_v4 = vpop.xlane.xlu0 %3280 }
 0xc8e   :  { %v3308_v30 = vmul.f32 1.442695, %v3300_v3  ;;  %v3301_v51 = vsub.f32 %v2994_v57, %v3281_v4 }
 0xc90   :  { %7104 = vpow2.f32 %v3308_v30  ;;  %v3310_v53 = vmul.f32 1.442695, %v3301_v51 }
 0xc92   :  { %7106 = vpow2.f32 %v3310_v53 }
 0xc93   :  { %v3284_v12 = vpop.xlane.xlu0 %3283 }
 0xc94   :  { %v3302_v17 = vsub.f32 %v7885_v24, %v3284_v12 }
 0xc95   :  { %v3287_v57 = vpop.xlane.xlu1 %3286 }
 0xc96   :  { %v3303_v16 = vsub.f32 %v3086_v27, %v3287_v57  ;;  %v3312_v25 = vmul.f32 1.442695, %v3302_v17 }
 0xc98   :  { %v3314_v23 = vmul.f32 1.442695, %v3303_v16 }
 0xc9a   :  { %7108 = vpow2.f32 %v3314_v23 }
 0xc9b   :  { %v3290_v19 = vpop.xlane.xlu0 %3289  ;;  %7110 = vpow2.f32 %v3312_v25 }
 0xc9c   :  { %v3304_v59 = vsub.f32 %v3132_v38, %v3290_v19 }
 0xc9d   :  { %v7898_v5 = vpop.eup %7104  ;;  %v3293_v20 = vpop.xlane.xlu1 %3292 }
 0xc9e   :  { %v3324_v6 = vsel %vm826_vm2, %v7898_v5, 0.0  ;;  %v3305_v29 = vsub.f32 %v3178_v40, %v3293_v20  ;;  %v3316_v31 = vmul.f32 1.442695, %v3304_v59 }
 0xc9f   :  { %v7902_v10 = vpop.eup %7106  ;;  %3325 = vadd.xlane.f32.xlu0 %v3324_v6 }
 0xca0   :  { %v3327_v14 = vsel %vm826_vm2, %v7902_v10, 0.0  ;;  %v3318_v33 = vmul.f32 1.442695, %v3305_v29  ;;  %7112 = vpow2.f32 %v3316_v31 }
 0xca1   :  { %3328 = vadd.xlane.f32.xlu1 %v3327_v14 }
 0xca2   :  { %7114 = vpow2.f32 %v3318_v33 }
 0xca3   :  { %v3296_v7 = vpop.xlane.xlu0 %3295 }
 0xca4   :  { %v3306_v32 = vsub.f32 %v3224_v49, %v3296_v7 }
 0xca5   :  { %v3299_v55 = vpop.xlane.xlu1 %3298 }
 0xca6   :  { %v3307_v35 = vsub.f32 %v3270_v50, %v3299_v55 }
 0xca7   :  { %v7911_v24 = vpop.eup %7108  ;;  %v2277_v49 = vpop.permute.xlu0 %2276 }
 0xca8   :  { %v3322_v27 = vmul.f32 1.442695, %v3307_v35  ;;  %v7913_v37 = vpop.eup %7110  ;;  %v3333_v38 = vsel %vm826_vm2, %v7911_v24, 0.0  ;;  %v2320_v62 = vshrl.u32 %v2277_v49, 16 }
 0xca9   :  { %v3330_v40 = vsel %vm826_vm2, %v7913_v37, 0.0  ;;  %v2279_v13 = vpop.permute.xlu1 %2278 }
 0xcaa   :  { %v2321_v56 = vshrl.u32 %v2279_v13, 16  ;;  %v7935_v60 = vpack.i.b16 %v2279_v13, %v2277_v49 }
 0xcac   :  { %v7939_v4 = vpack.i.b16 %v2321_v56, %v2320_v62  ;;  %v2371_v30 = vrot.slane %v7935_v60, %v7379_v34 }
 0xcad   :  { %v7917_v39 = vpop.eup %7112 }
 0xcae   :  { %v3336_v43 = vsel %vm826_vm2, %v7917_v39, 0.0  ;;  %v2505_v12 = vrot.slane %v7939_v4, %v7379_v34 }
 0xcaf   :  { %v7921_v41 = vpop.eup %7114 }
 0xcb0   :  { %v3339_v45 = vsel %vm826_vm2, %v7921_v41, 0.0 }
 0xcb2   :  { %2280 = vrot.lane.b32.xlu1 %v7785_v26, %s7275_s29 }
 0xcb5   :  { %2282 = vrot.lane.b32.xlu0 %v7785_v26, %s7276_s9  ;;  %v3320_v26 = vmul.f32 1.442695, %v3306_v32 }
 0xcb7   :  { %7116 = vpow2.f32 %v3320_v26 }
 0xcb8   :  { %7118 = vpow2.f32 %v3322_v27 }
 0xcc4   :  { %v7925_v44 = vpop.eup %7116 }
 0xcc5   :  { %v7929_v46 = vpop.eup %7118  ;;  %v3342_v47 = vsel %vm826_vm2, %v7925_v44, 0.0 }
 0xcc6   :  { %v3345_v48 = vsel %vm826_vm2, %v7929_v46, 0.0 }
 0xcd4   :  { %3334 = vadd.xlane.f32.xlu0 %v3333_v38 }
 0xcd6   :  { %3331 = vadd.xlane.f32.xlu1 %v3330_v40 }
 0xcd8   :  { %3337 = vadd.xlane.f32.xlu0 %v3336_v43 }
 0xcda   :  { %3340 = vadd.xlane.f32.xlu1 %v3339_v45 }
 0xcdc   :  { %3343 = vadd.xlane.f32.xlu0 %v3342_v47 }
 0xcde   :  { %3346 = vadd.xlane.f32.xlu1 %v3345_v48 }
 0xd28   :  { %v3326_v50 = vpop.xlane.xlu0 %3325 }
 0xd29   :  { %7120 = vrcp.f32 %v3326_v50 }
 0xd2a   :  { %v3329_v54 = vpop.xlane.xlu1 %3328 }
 0xd2b   :  { %7122 = vrcp.f32 %v3329_v54 }
 0xd2c   :  { %v2283_v58 = vpop.permute.xlu0 %2282 }
 0xd2d   :  { %v2329_v1 = vshrl.u32 %v2283_v58, 16 }
 0xd2e   :  { %v2281_v63 = vpop.permute.xlu1 %2280 }
 0xd2f   :  { %v7937_v28 = vpack.i.b16 %v2283_v58, %v2281_v63  ;;  %v2328_v3 = vshrl.u32 %v2281_v63, 16 }
 0xd31   :  { %v2330_v51 = vpack.i.b16 %v2329_v1, %v2328_v3  ;;  %v2386_v53 = vrot.slane %v7937_v28, %v7379_v34 }
 0xd33   :  { %v2426_v6 = vcombine.low %v2371_v30, %v2386_v53  ;;  %v2427_v14 = vcombine.high %v2371_v30, %v2386_v53  ;;  %v2520_v57 = vrot.slane %v2330_v51, %v7379_v34 }
 0xd35   :  { %v2434_v16 = vrot.slane %v2426_v6, %v7382_v52  ;;  %v2441_v19 = vrot.slane %v2427_v14, %v7382_v52  ;;  %v2560_v17 = vcombine.low %v2505_v12, %v2520_v57  ;;  %v2561_v20 = vcombine.high %v2505_v12, %v2520_v57 }
 0xd36   :  { %v7121_v38 = vpop.eup %7120  ;;  %v2513_v6 = vcombine.high %v2330_v51, %v7549_v2  ;;  %v2498_v12 = vcombine.high %v7939_v4, %v7549_v2  ;;  %v2379_v57 = vcombine.high %v7937_v28, %v7549_v2 }
 0xd37   :  { %v6374_v23 = vcombine.low %v2434_v16, %v2441_v19  ;;  %v6376_v59 = vcombine.high %v2434_v16, %v2441_v19  ;;  %v2568_v7 = vrot.slane %v2560_v17, %v7382_v52  ;;  %v2575_v25 = vrot.slane %v2561_v20, %v7382_v52 }
 0xd38   :  { %v7123_v45 = vpop.eup %7122  ;;  %v3356_v48 = vmul.f32 %v7121_v38, %v7898_v5  ;;  %v2364_v16 = vcombine.high %v7935_v60, %v7549_v2  ;;  %v2527_v19 = vrot.slane %v2513_v6, %v7379_v34  ;;  %v2512_v4 = vrot.slane %v2498_v12, %v7379_v34 }
 0xd39   :  { %v2615_v29 = vrot.slane %v6374_v23, %v7379_v34  ;;  %v2631_v55 = vrot.slane %v6376_v59, %v7379_v34  ;;  %v6378_v31 = vcombine.low %v2568_v7, %v2575_v25  ;;  %v6380_v32 = vcombine.high %v2568_v7, %v2575_v25 }
 0xd3a   :  { %v3357_v56 = vmul.f32 %v7123_v45, %v7902_v10  ;;  %v3364_v53 = vpack.c.bf16 %v3356_v48, %v3356_v48  ;;  %v2393_v28 = vrot.slane %v2379_v57, %v7379_v34  ;;  %v2378_v17 = vrot.slane %v2364_v16, %v7379_v34 }
 0xd3b   :  { %v2648_v33 = vcombine.low %v2615_v29, %v2631_v55  ;;  %v2674_v35 = vrot.slane %v6378_v31, %v7379_v34  ;;  %v2690_v26 = vrot.slane %v6380_v32, %v7379_v34  ;;  %v2576_v20 = vcombine.low %v2512_v4, %v2527_v19 }
 0xd3c   :  { %v3365_v14 = vpack.c.bf16 %v3357_v56, %v3357_v56  ;;  %v2577_v23 = vcombine.high %v2512_v4, %v2527_v19  ;;  %v2442_v59 = vcombine.low %v2378_v17, %v2393_v28  ;;  %v2443_v7 = vcombine.high %v2378_v17, %v2393_v28 }
 0xd3d   :  { %v2655_v27 = vrot.slane %v2648_v33, %v7382_v52  ;;  %v2707_v40 = vcombine.low %v2674_v35, %v2690_v26  ;;  %v2584_v25 = vrot.slane %v2576_v20, %v7382_v52 }
 0xd3e   :  { %v2591_v29 = vrot.slane %v2577_v23, %v7382_v52  ;;  %v2450_v60 = vrot.slane %v2442_v59, %v7382_v52  ;;  %v2457_v55 = vrot.slane %v2443_v7, %v7382_v52 }
 0xd3f   :  { %v2658_v43 = vcombine.high %v2655_v27, %v7273_v42  ;;  %v2714_v47 = vrot.slane %v2707_v40, %v7382_v52  ;;  %v2863_v13 = vshrl.u32 %v2655_v27, 16 }
 0xd40   :  { %v6386_v31 = vcombine.low %v2584_v25, %v2591_v29  ;;  %v6388_v32 = vcombine.high %v2584_v25, %v2591_v29  ;;  %v6382_v33 = vcombine.low %v2450_v60, %v2457_v55  ;;  %v6384_v35 = vcombine.high %v2450_v60, %v2457_v55 }
 0xd41   :  { %v2862_v49 = vpack.i.b16 %v2714_v47, %v2655_v27  ;;  %v2864_v50 = vshrl.u32 %v2714_v47, 16  ;;  %v2717_v54 = vcombine.high %v2714_v47, %v7273_v42  ;;  %v2869_v58 = vshrl.u32 %v2658_v43, 16 }
 0xd42   :  { %v2792_v26 = vrot.slane %v6386_v31, %v7379_v34  ;;  %v2808_v27 = vrot.slane %v6388_v32, %v7379_v34  ;;  %v2733_v40 = vrot.slane %v6382_v33, %v7379_v34  ;;  %v7193_v33 = vld [vmem:[#allocation2 + $0x8] sm:$0xff]  }
 0xd43   :  { %v3376_v62 = vsel %vm1294_vm3, %v2862_v49, 0  ;;  %v2865_v63 = vpack.i.b16 %v2864_v50, %v2863_v13  ;;  %v2868_v1 = vpack.i.b16 %v2717_v54, %v2658_v43  ;;  %v2870_v3 = vshrl.u32 %v2717_v54, 16 }
 0xd44   :  { %6779 = vmatpush3.bf16.msra.mxu0 %v3376_v62  ;;  %v2749_v43 = vrot.slane %v6384_v35, %v7379_v34  ;;  %v2825_v47 = vcombine.low %v2792_v26, %v2808_v27  ;;  %v7196_v35 = vld [vmem:[%s8518_s2] sm:$0xff]  }
 0xd45   :  { %v3422_v30 = vsel %vm1294_vm3, %v2865_v63, 0  ;;  %6790 = vmatprep.subr.bf16.mxu0 %v7262_v0  ;;  %v2871_v5 = vpack.i.b16 %v2870_v3, %v2869_v58  ;;  %v3468_v10 = vsel %vm1294_vm3, %v2868_v1, 0 }
 0xd46   :  { %6785 = vmatpush3.bf16.msra.mxu1 %v3422_v30  ;;  %v2766_v49 = vcombine.low %v2733_v40, %v2749_v43  ;;  %v2832_v50 = vrot.slane %v2825_v47, %v7382_v52 }
 0xd47   :  { %6781 = vmatmul.mubr.msk.bf16.vlgmr.msra.gmra.mxu0 %vm826_vm2, %v3364_v53  ;;  %6796 = vmatprep.subr.bf16.mxu1 %v7262_v0  ;;  %v3514_v51 = vsel %vm1294_vm3, %v2871_v5, 0 }
 0xd48   :  { %6791 = vmatpush3.bf16.msra.mxu0 %v3468_v10  ;;  %6792 = vmatprep.mubr.msk.bf16.mxu0 %vm7263_vm0, %v7262_v0  ;;  %v2773_v54 = vrot.slane %v2766_v49, %v7382_v52  ;;  %v2900_v58 = vshrl.u32 %v2832_v50, 16  ;;  %v2835_v53 = vcombine.high %v2832_v50, %v7273_v42 }
 0xd49   :  { %6787 = vmatmul.mubr.msk.bf16.vlgmr.msra.gmra.mxu1 %vm826_vm2, %v3365_v14  ;;  %6802 = vmatprep.subr.bf16.mxu0 %v7262_v0 }
 0xd4a   :  { %6797 = vmatpush3.bf16.msra.mxu1 %v3514_v51  ;;  %6798 = vmatprep.mubr.msk.bf16.mxu1 %vm7263_vm0, %v7262_v0  ;;  %v2899_v63 = vshrl.u32 %v2773_v54, 16  ;;  %v2898_v14 = vpack.i.b16 %v2832_v50, %v2773_v54  ;;  %v2776_v12 = vcombine.high %v2773_v54, %v7273_v42  ;;  %v2906_v19 = vshrl.u32 %v2835_v53, 16 }
 0xd4b   :  { %6808 = vmatprep.subr.bf16.mxu1 %v7262_v0 }
 0xd4c   :  { %v2901_v30 = vpack.i.b16 %v2900_v58, %v2899_v63  ;;  %v2905_v28 = vshrl.u32 %v2776_v12, 16  ;;  %v2904_v59 = vpack.i.b16 %v2835_v53, %v2776_v12 }
 0xd4e   :  { %v3606_v51 = vsel %vm1294_vm3, %v2901_v30, 0  ;;  %v2907_v17 = vpack.i.b16 %v2906_v19, %v2905_v28 }
 0xd50   :  { %v3698_v25 = vsel %vm1294_vm3, %v2907_v17, 0 }
 0xd5d   :  { %v3335_v38 = vpop.xlane.xlu0 %3334 }
 0xd5e   :  { %7124 = vrcp.f32 %v3335_v38 }
 0xd5f   :  { %v3332_v45 = vpop.xlane.xlu1 %3331 }
 0xd60   :  { %7126 = vrcp.f32 %v3332_v45 }
 0xd61   :  { %v3338_v48 = vpop.xlane.xlu0 %3337 }
 0xd62   :  { %7128 = vrcp.f32 %v3338_v48 }
 0xd63   :  { %v3341_v13 = vpop.xlane.xlu1 %3340 }
 0xd64   :  { %7130 = vrcp.f32 %v3341_v13 }
 0xd65   :  { %v3344_v62 = vpop.xlane.xlu0 %3343 }
 0xd67   :  { %v3347_v56 = vpop.xlane.xlu1 %3346 }
 0xd68   :  { %7132 = vrcp.f32 %v3347_v56 }
 0xd69   :  { %7134 = vrcp.f32 %v3344_v62 }
 0xd6b   :  { %v7125_v1 = vpop.eup %7124 }
 0xd6c   :  { %v3359_v3 = vmul.f32 %v7125_v1, %v7911_v24  ;;  %v3560_v24 = vsel %vm1294_vm3, %v2898_v14, 0 }
 0xd6d   :  { %v7127_v5 = vpop.eup %7126 }
 0xd6e   :  { %v3367_v6 = vpack.c.bf16 %v3359_v3, %v3359_v3  ;;  %v3358_v10 = vmul.f32 %v7127_v5, %v7913_v37 }
 0xd6f   :  { %v7129_v57 = vpop.eup %7128 }
 0xd70   :  { %6799 = vmatmul.mubr.msk.bf16.vlgmr.msra.gmra.mxu1 %vm826_vm2, %v3367_v6  ;;  %v3366_v16 = vpack.c.bf16 %v3358_v10, %v3358_v10  ;;  %v3360_v20 = vmul.f32 %v7129_v57, %v7917_v39 }
 0xd71   :  { %v7131_v4 = vpop.eup %7130  ;;  %6809 = vmatpush3.bf16.msra.mxu1 %v3606_v51  ;;  %6810 = vmatprep.mubr.msk.bf16.mxu1 %vm7263_vm0, %v7262_v0 }
 0xd72   :  { %6793 = vmatmul.mubr.msk.bf16.vlgmr.msra.gmra.mxu0 %vm826_vm2, %v3366_v16  ;;  %6820 = vmatprep.subr.bf16.mxu1 %v7262_v0  ;;  %v3361_v37 = vmul.f32 %v7131_v4, %v7921_v41  ;;  %v3368_v29 = vpack.c.bf16 %v3360_v20, %v3360_v20  ;;  %v3652_v41 = vsel %vm1294_vm3, %v2904_v59, 0 }
 0xd73   :  { %6803 = vmatpush3.bf16.msra.mxu0 %v3560_v24  ;;  %6804 = vmatprep.mubr.msk.bf16.mxu0 %vm7263_vm0, %v7262_v0 }
 0xd74   :  { %6814 = vmatprep.subr.bf16.mxu0 %v7262_v0  ;;  %v3369_v23 = vpack.c.bf16 %v3361_v37, %v3361_v37 }
 0xd75   :  { %v7133_v7 = vpop.eup %7132 }
 0xd76   :  { %v7135_v60 = vpop.eup %7134  ;;  %v3363_v55 = vmul.f32 %v7133_v7, %v7929_v46  ;;  %v7194_v46 = vld [vmem:[%s8518_s2 + $0x8] sm:$0xff]  }
 0xd77   :  { %v3362_v39 = vmul.f32 %v7135_v60, %v7925_v44  ;;  %v7195_v44 = vld [vmem:[#allocation2] sm:$0xff]  }
 0xd78   :  { %6811 = vmatmul.mubr.msk.bf16.vlgmr.msra.gmra.mxu1 %vm826_vm2, %v3369_v23  ;;  %v3371_v31 = vpack.c.bf16 %v3363_v55, %v3363_v55 }
 0xd79   :  { %6821 = vmatpush3.bf16.msra.mxu1 %v3698_v25  ;;  %6822 = vmatprep.mubr.msk.bf16.mxu1 %vm7263_vm0, %v7262_v0  ;;  %v3370_v32 = vpack.c.bf16 %v3362_v39, %v3362_v39 }
 0xd7a   :  { %6805 = vmatmul.mubr.msk.bf16.vlgmr.msra.gmra.mxu0 %vm826_vm2, %v3368_v29  ;;  %6834 = vmatprep.subr.bf16.mxu1 %v7262_v0 }
 0xd7b   :  { %6815 = vmatpush3.bf16.msra.mxu0 %v3652_v41  ;;  %6816 = vmatprep.mubr.msk.bf16.mxu0 %vm7263_vm0, %v7262_v0 }
 0xd7c   :  { %6826 = vmatprep.subr.bf16.mxu0 %v7262_v0 }
 0xd80   :  { %6823 = vmatmul.mubr.msk.bf16.vlgmr.msra.gmra.mxu1 %vm826_vm2, %v3371_v31 }
 0xd81   :  { %6835 = vmatpush3.bf16.msra.mxu1 %v7193_v33  ;;  %6838 = vmatprep.mubr.msk.bf16.mxu1 %vm7263_vm0, %v7262_v0 }
 0xd82   :  { %6817 = vmatmul.mubr.msk.bf16.vlgmr.msra.gmra.mxu0 %vm826_vm2, %v3370_v32  ;;  %6836 = vmatprep.subr.bf16.mxu1 %v7262_v0 }
 0xd83   :  { %6827 = vmatpush3.bf16.msra.mxu0 %v7194_v46  ;;  %6830 = vmatprep.mubr.msk.bf16.mxu0 %vm7263_vm0, %v7262_v0 }
 0xd84   :  { %6828 = vmatprep.subr.bf16.mxu0 %v7262_v0 }
 0xd85   :  { %6837 = vmatpush3.bf16.msra.mxu1 %v7195_v44 }
 0xd86   :  { %6854 = vmatprep.subr.bf16.mxu1 %v7262_v0 }
 0xd87   :  { %6829 = vmatpush3.bf16.msra.mxu0 %v7196_v35 }
 0xd88   :  { %6842 = vmatprep.subr.bf16.mxu0 %v7262_v0 }
 0xe07   :  { %v3412_v26 = vpop.f32.mrf.mxu0 }
 0xe09   :  { %v6782_v27 = vpop.f32.mrf.mxu0  ;;  %v3458_v38 = vpop.f32.mrf.mxu1 }
 0xe0b   :  { %v3415_v40 = vpop.f32.mrf.mxu0  ;;  %v6788_v43 = vpop.f32.mrf.mxu1 }
 0xe0d   :  { %v6783_v45 = vpop.f32.mrf.mxu0  ;;  %v3461_v47 = vpop.f32.mrf.mxu1 }
 0xe0f   :  { %v6789_v48 = vpop.f32.mrf.mxu1 }
 0xe30   :  { %v3550_v49 = vpop.f32.mrf.mxu1 }
 0xe31   :  { %v3756_v13 = vcombine.low %v3458_v38, %v3550_v49  ;;  %v3757_v50 = vcombine.high %v3458_v38, %v3550_v49 }
 0xe32   :  { %v3504_v54 = vpop.f32.mrf.mxu0  ;;  %v6800_v56 = vpop.f32.mrf.mxu1 }
 0xe33   :  { %v3740_v58 = vcombine.low %v3412_v26, %v3504_v54  ;;  %v3741_v62 = vcombine.high %v3412_v26, %v3504_v54  ;;  %v3764_v3 = vrot.slane %v3756_v13, %v7379_v34  ;;  %v3771_v30 = vrot.slane %v3757_v50, %v7379_v34 }
 0xe34   :  { %v6794_v63 = vpop.f32.mrf.mxu0  ;;  %v3553_v1 = vpop.f32.mrf.mxu1 }
 0xe35   :  { %v3748_v53 = vrot.slane %v3740_v58, %v7379_v34  ;;  %v3755_v5 = vrot.slane %v3741_v62, %v7379_v34 }
 0xe36   :  { %v3507_v6 = vpop.f32.mrf.mxu0  ;;  %v6801_v10 = vpop.f32.mrf.mxu1 }
 0xe37   :  { %v3772_v14 = vcombine.low %v3748_v53, %v3764_v3  ;;  %v3773_v12 = vcombine.high %v3748_v53, %v3764_v3  ;;  %v3788_v57 = vcombine.low %v3755_v5, %v3771_v30  ;;  %v3789_v51 = vcombine.high %v3755_v5, %v3771_v30 }
 0xe38   :  { %v6795_v16 = vpop.f32.mrf.mxu0  ;;  %v3642_v19 = vpop.f32.mrf.mxu1 }
 0xe39   :  { %v3780_v4 = vrot.slane %v3772_v14, %v7382_v52  ;;  %v3787_v24 = vrot.slane %v3773_v12, %v7382_v52  ;;  %v3796_v37 = vrot.slane %v3788_v57, %v7382_v52  ;;  %v3803_v28 = vrot.slane %v3789_v51, %v7382_v52 }
 0xe3a   :  { %v3596_v17 = vpop.f32.mrf.mxu0  ;;  %v6812_v20 = vpop.f32.mrf.mxu1 }
 0xe3b   :  { %v3876_v23 = vcombine.low %v3780_v4, %v3787_v24  ;;  %v6405_v59 = vcombine.high %v3780_v4, %v3787_v24  ;;  %v3892_v7 = vcombine.low %v3796_v37, %v3803_v28  ;;  %v6406_v25 = vcombine.high %v3796_v37, %v3803_v28 }
 0xe3c   :  { %v6806_v29 = vpop.f32.mrf.mxu0  ;;  %v3645_v60 = vpop.f32.mrf.mxu1 }
 0xe3d   :  { %v3883_v41 = vrot.slane %v3876_v23, %v7379_v34  ;;  %v3891_v55 = vrot.slane %v6405_v59, %v7379_v34  ;;  %v3899_v39 = vrot.slane %v3892_v7, %v7379_v34  ;;  %v3907_v31 = vrot.slane %v6406_v25, %v7379_v34 }
 0xe3e   :  { %v3599_v32 = vpop.f32.mrf.mxu0  ;;  %v6813_v33 = vpop.f32.mrf.mxu1 }
 0xe3f   :  { %v3908_v46 = vcombine.low %v3883_v41, %v3891_v55  ;;  %v3924_v44 = vcombine.low %v3899_v39, %v3907_v31  ;;  %v3909_v16 = vcombine.high %v3883_v41, %v3891_v55 }
 0xe40   :  { %v6807_v35 = vpop.f32.mrf.mxu0  ;;  %v3734_v26 = vpop.f32.mrf.mxu1 }
 0xe41   :  { %v3824_v27 = vcombine.low %v3642_v19, %v3734_v26  ;;  %v3825_v38 = vcombine.high %v3642_v19, %v3734_v26  ;;  %v8054_v45 = vrot.slane %v3908_v46, %v7382_v52  ;;  %v3932_v47 = vrot.slane %v3924_v44, %v7382_v52 }
 0xe42   :  { %v3688_v40 = vpop.f32.mrf.mxu0  ;;  %v6824_v43 = vpop.f32.mrf.mxu1  ;;  %v3925_v19 = vcombine.high %v3899_v39, %v3907_v31  ;;  %v3923_v7 = vrot.slane %v3909_v16, %v7382_v52 }
 0xe43   :  { %v3808_v48 = vcombine.low %v3596_v17, %v3688_v40  ;;  %v3809_v49 = vcombine.high %v3596_v17, %v3688_v40  ;;  %v3940_v54 = vcombine.low %v8054_v45, %v3932_v47  ;;  %v3832_v56 = vrot.slane %v3824_v27, %v7379_v34 }
 0xe44   :  { %v6818_v13 = vpop.f32.mrf.mxu0  ;;  %v3737_v50 = vpop.f32.mrf.mxu1  ;;  %v3839_v58 = vrot.slane %v3825_v38, %v7379_v34  ;;  %v3939_v25 = vrot.slane %v3925_v19, %v7382_v52  ;;  %v3941_v35 = vcombine.high %v8054_v45, %v3932_v47 }
 0xe45   :  { %v3816_v62 = vrot.slane %v3808_v48, %v7379_v34  ;;  %v3823_v63 = vrot.slane %v3809_v49, %v7379_v34 }
 0xe46   :  { %v3691_v1 = vpop.f32.mrf.mxu0  ;;  %v6825_v3 = vpop.f32.mrf.mxu1  ;;  %v3942_v46 = vcombine.low %v3923_v7, %v3939_v25  ;;  %v3943_v48 = vcombine.high %v3923_v7, %v3939_v25 }
 0xe47   :  { %v3840_v30 = vcombine.low %v3816_v62, %v3832_v56  ;;  %v3841_v53 = vcombine.high %v3816_v62, %v3832_v56  ;;  %v3856_v5 = vcombine.low %v3823_v63, %v3839_v58  ;;  %v3857_v6 = vcombine.high %v3823_v63, %v3839_v58 }
 0xe48   :  { %v6819_v10 = vpop.f32.mrf.mxu0 }
 0xe49   :  { %v3848_v14 = vrot.slane %v3840_v30, %v7382_v52  ;;  %v3855_v12 = vrot.slane %v3841_v53, %v7382_v52  ;;  %v3864_v57 = vrot.slane %v3856_v5, %v7382_v52  ;;  %v3871_v51 = vrot.slane %v3857_v6, %v7382_v52 }
 0xe4b   :  { %v3944_v4 = vcombine.low %v3848_v14, %v3855_v12  ;;  %v6407_v24 = vcombine.high %v3848_v14, %v3855_v12  ;;  %v3960_v37 = vcombine.low %v3864_v57, %v3871_v51  ;;  %v6408_v28 = vcombine.high %v3864_v57, %v3871_v51  ;;  %v7198_v12 = vld [vmem:[%s8520_s4 + $0x10] sm:$0xff]   ;;  %v7199_v57 = vld [vmem:[%s8520_s4 + $0x8] sm:$0xff]   ;;  %v7200_v51 = vld [vmem:[%s8520_s4] sm:$0xff]  }
 0xe4d   :  { %v3951_v17 = vrot.slane %v3944_v4, %v7379_v34  ;;  %v3959_v20 = vrot.slane %v6407_v24, %v7379_v34  ;;  %v3967_v23 = vrot.slane %v3960_v37, %v7379_v34  ;;  %v3975_v59 = vrot.slane %v6408_v28, %v7379_v34 }
 0xe4f   :  { %v3977_v29 = vcombine.high %v3951_v17, %v3959_v20  ;;  %v3993_v60 = vcombine.high %v3967_v23, %v3975_v59  ;;  %v3976_v41 = vcombine.low %v3951_v17, %v3959_v20  ;;  %v3992_v55 = vcombine.low %v3967_v23, %v3975_v59 }
 0xe51   :  { %v3991_v39 = vrot.slane %v3977_v29, %v7382_v52  ;;  %v4007_v31 = vrot.slane %v3993_v60, %v7382_v52  ;;  %v3984_v32 = vrot.slane %v3976_v41, %v7382_v52  ;;  %v4000_v33 = vrot.slane %v3992_v55, %v7382_v52 }
 0xe53   :  { %v4010_v44 = vcombine.low %v3991_v39, %v4007_v31  ;;  %v4009_v26 = vcombine.high %v3984_v32, %v4000_v33  ;;  %v4008_v27 = vcombine.low %v3984_v32, %v4000_v33  ;;  %v4011_v43 = vcombine.high %v3991_v39, %v4007_v31 }
 0xe55   :  { %v7029_v38 = vpack.i.bf16 %v4010_v44, %v3942_v46  ;;  %v7024_v40 = vpack.i.bf16 %v4009_v26, %v3941_v35  ;;  %v7034_v49 = vpack.i.bf16 %v4011_v43, %v3943_v48 }
 0xe57   :  { %7030 = vrot.lane.b32.xlu1 %v7029_v38, %s7277_s3  ;;  %7025 = vrot.lane.b32.xlu0 %v7024_v40, %s7278_s14 }
 0xe5b   :  { %7035 = vrot.lane.b32.xlu1 %v7034_v49, %s7279_s15 }
 0xec9   :  { %v7031_v13 = vpop.permute.xlu1 %7030  ;;  %v7026_v50 = vpop.permute.xlu0 %7025 }
 0xeca   :  { %v7028_v56 = vunpack.i.h.bf16 %v7026_v50  ;;  %v7027_v58 = vunpack.i.l.bf16 %v7026_v50  ;;  %v7033_v62 = vunpack.i.h.bf16 %v7031_v13  ;;  %v7032_v63 = vunpack.i.l.bf16 %v7031_v13 }
 0xecc   :  { %v4036_v45 = vsel %vm826_vm2, %v3940_v54, %v7027_v58  ;;  %v4037_v47 = vsel %vm826_vm2, %v4008_v27, %v7028_v56  ;;  %v7197_v54 = vld [vmem:[%s8520_s4 + $0x18] sm:$0xff]   ;;  %v7201_v58 = vld [vmem:[%s8517_s1 + $0x8] sm:$0xff]  }
 0xecd   :  { %v7036_v1 = vpop.permute.xlu1 %7035  ;;  %v4038_v53 = vsel %vm1958_vm4, %v4036_v45, %v7032_v63  ;;  %v4039_v5 = vsel %vm1958_vm4, %v4037_v47, %v7033_v62  ;;  %v7202_v62 = vld [vmem:[%s8517_s1] sm:$0xff]  }
 0xece   :  { %v7038_v3 = vunpack.i.h.bf16 %v7036_v1  ;;  %v7037_v30 = vunpack.i.l.bf16 %v7036_v1  ;;  %v7203_v47 = vld [vmem:[%s8522_s6] ss:$0 sm:$0xff] }
 0xed0   :  { %v4040_v6 = vsel %vm1961_vm5, %v4038_v53, %v7037_v30  ;;  %v4041_v10 = vsel %vm1961_vm5, %v4039_v5, %v7038_v3 }
 0xed1   :  { %v4042_v14 = vpack.c.bf16 %v4041_v10, %v4040_v6 }
 0xed3   :  { %6831 = vmatmul.mubr.msk.bf16.vlgmr.msra.gmra.mxu0 %vm127_vm1, %v4042_v14 }
 0xed4   :  { %6843 = vmatpush3.bf16.msra.mxu0 %v7197_v54  ;;  %6850 = vmatprep.mubr.msk.bf16.mxu0 %vm7263_vm0, %v7262_v0 }
 0xed5   :  { %6844 = vmatprep.subr.bf16.mxu0 %v7262_v0 }
 0xed8   :  { %6845 = vmatpush3.bf16.msra.mxu0 %v7198_v12 }
 0xed9   :  { %6846 = vmatprep.subr.bf16.mxu0 %v7262_v0 }
 0xedc   :  { %6847 = vmatpush3.bf16.msra.mxu0 %v7199_v57 }
 0xedd   :  { %6848 = vmatprep.subr.bf16.mxu0 %v7262_v0 }
 0xee0   :  { %6849 = vmatpush3.bf16.msra.mxu0 %v7200_v51 }
 0xee1   :  { %6868 = vmatprep.subr.bf16.mxu0 %v7262_v0 }
 0xf93   :  { %v4080_v16 = vpop.f32.mrf.mxu0 }
 0xf94   :  { %v4081_v19 = vadd.f32 %v4080_v16, %v7690_v22 }
 0xf95   :  { %v6832_v4 = vpop.f32.mrf.mxu0 }
 0xf96   :  { %v4087_v24 = vadd.f32 %v4081_v19, %v7772_v18 }
 0xf97   :  { %v4083_v37 = vpop.f32.mrf.mxu0 }
 0xf98   :  { %v4084_v28 = vadd.f32 %v4083_v37, %v7690_v22  ;;  %v4089_v17 = vsel %vm127_vm1, %v4087_v24, 0.0 }
 0xf99   :  { %4090 = vadd.xlane.f32.xlu0 %v4089_v17  ;;  %v6833_v20 = vpop.f32.mrf.mxu0 }
 0xf9a   :  { %v4088_v23 = vadd.f32 %v4084_v28, %v7775_v61 }
 0xf9c   :  { %v4092_v59 = vsel %vm127_vm1, %v4088_v23, 0.0 }
 0xf9d   :  { %4093 = vadd.xlane.f32.xlu1 %v4092_v59 }
0x1022   :  { %v4091_v7 = vpop.xlane.xlu0 %4090 }
0x1023   :  { %v4095_v25 = vmul.f32 0.03125, %v4091_v7 }
0x1025   :  { %v4097_v29 = vsub.f32 %v4087_v24, %v4095_v25 }
0x1026   :  { %v4094_v60 = vpop.xlane.xlu1 %4093 }
0x1027   :  { %v4096_v41 = vmul.f32 0.03125, %v4094_v60  ;;  %v4099_v55 = vmul.f32 %v4097_v29, %v4097_v29 }
0x1029   :  { %v4098_v39 = vsub.f32 %v4088_v23, %v4096_v41  ;;  %v4101_v18 = vsel %vm127_vm1, %v4099_v55, 0.0 }
0x102a   :  { %4102 = vadd.xlane.f32.xlu0 %v4101_v18 }
0x102b   :  { %v4100_v31 = vmul.f32 %v4098_v39, %v4098_v39 }
0x102d   :  { %v4104_v32 = vsel %vm127_vm1, %v4100_v31, 0.0 }
0x102e   :  { %4105 = vadd.xlane.f32.xlu0 %v4104_v32 }
0x10b3   :  { %v4103_v33 = vpop.xlane.xlu0 %4102 }
0x10b4   :  { %v4107_v46 = vmul.f32 0.03125, %v4103_v33 }
0x10b6   :  { %v4109_v61 = vadd.f32 1e-05, %v4107_v46 }
0x10b7   :  { %v4106_v44 = vpop.xlane.xlu0 %4105 }
0x10b8   :  { %7136 = vrsqrt.f32 %v4109_v61  ;;  %v4108_v35 = vmul.f32 0.03125, %v4106_v44 }
0x10ba   :  { %v4110_v26 = vadd.f32 1e-05, %v4108_v35 }
0x10bc   :  { %7138 = vrsqrt.f32 %v4110_v26 }
0x10c5   :  { %v7137_v27 = vpop.eup %7136 }
0x10c6   :  { %v4113_v38 = vmul.f32 %v7137_v27, %v4097_v29 }
0x10c8   :  { %v4115_v48 = vmul.f32 %v4113_v38, %v7712_v8 }
0x10c9   :  { %v7139_v40 = vpop.eup %7138 }
0x10ca   :  { %v4114_v43 = vmul.f32 %v7139_v40, %v4098_v39  ;;  %v4117_v13 = vadd.f32 %v4115_v48, %v7716_v15 }
0x10cc   :  { %v4116_v49 = vmul.f32 %v4114_v43, %v7712_v8 }
0x10ce   :  { %v4118_v50 = vadd.f32 %v4116_v49, %v7716_v15 }
0x10d0   :  { %v4119_v56 = vpack.c.bf16 %v4118_v50, %v4117_v13 }
0x10d2   :  { %6839 = vmatmul.mubr.msk.bf16.vlgmr.msra.gmra.mxu1 %vm127_vm1, %v4119_v56 }
0x10d3   :  { %6855 = vmatpush3.bf16.msra.mxu1 %v7201_v58  ;;  %6858 = vmatprep.mubr.msk.bf16.mxu1 %vm7263_vm0, %v7262_v0 }
0x10d4   :  { %6856 = vmatprep.subr.bf16.mxu1 %v7262_v0 }
0x10d7   :  { %6857 = vmatpush3.bf16.msra.mxu1 %v7202_v62 }
0x10d8   :  { %6862 = vmatprep.subr.bf16.mxu1 %v7262_v0 }
0x1192   :  { %v4157_v63 = vpop.f32.mrf.mxu1 }
0x1193   :  { %v4158_v1 = vadd.f32 %v7203_v47, %v4157_v63 }
0x1194   :  { %v6840_v45 = vpop.f32.mrf.mxu1 }
0x1195   :  { %v4164_v5 = vmax.f32 %v4158_v1, 0.0 }
0x1196   :  { %v4160_v3 = vpop.f32.mrf.mxu1 }
0x1197   :  { %v4161_v30 = vadd.f32 %v7203_v47, %v4160_v3 }
0x1198   :  { %v6841_v53 = vpop.f32.mrf.mxu1 }
0x1199   :  { %v4165_v6 = vmax.f32 %v4161_v30, 0.0 }
0x119b   :  { %v4166_v10 = vpack.c.bf16 %v4165_v6, %v4164_v5 }
0x119d   :  { %6851 = vmatmul.mubr.msk.bf16.vlgmr.msra.gmra.mxu0 %vm2138_vm6, %v4166_v10 }
0x119e   :  { %6870 = vmatprep.mubr.msk.bf16.mxu0 %vm7263_vm0, %v7262_v0 }
0x125d   :  { %v4204_v14 = vpop.f32.mrf.mxu0 }
0x125e   :  { %v4205_v54 = vadd.f32 %v4204_v14, %v7753_v36 }
0x125f   :  { %v6852_v12 = vpop.f32.mrf.mxu0 }
0x1260   :  { %v4211_v57 = vadd.f32 %v4205_v54, %v4117_v13 }
0x1261   :  { %v4207_v51 = vpop.f32.mrf.mxu0 }
0x1262   :  { %v4208_v16 = vadd.f32 %v4207_v51, %v7753_v36  ;;  %v4213_v19 = vsel %vm127_vm1, %v4211_v57, 0.0 }
0x1263   :  { %4214 = vadd.xlane.f32.xlu1 %v4213_v19  ;;  %v6853_v4 = vpop.f32.mrf.mxu0 }
0x1264   :  { %v4212_v24 = vadd.f32 %v4208_v16, %v4118_v50  ;;  %v7204_v50 = vld [vmem:[%s8521_s5] ss:$0 sm:$0xff] }
0x1266   :  { %v4216_v37 = vsel %vm127_vm1, %v4212_v24, 0.0 }
0x1267   :  { %4217 = vadd.xlane.f32.xlu0 %v4216_v37 }
0x12ec   :  { %v4215_v28 = vpop.xlane.xlu1 %4214 }
0x12ed   :  { %v4219_v17 = vmul.f32 0.03125, %v4215_v28 }
0x12ef   :  { %v4221_v20 = vsub.f32 %v4211_v57, %v4219_v17 }
0x12f0   :  { %v4218_v23 = vpop.xlane.xlu0 %4217 }
0x12f1   :  { %v4220_v59 = vmul.f32 0.03125, %v4218_v23  ;;  %v4223_v7 = vmul.f32 %v4221_v20, %v4221_v20 }
0x12f3   :  { %v4222_v25 = vsub.f32 %v4212_v24, %v4220_v59  ;;  %v4225_v29 = vsel %vm127_vm1, %v4223_v7, 0.0 }
0x12f4   :  { %4226 = vadd.xlane.f32.xlu1 %v4225_v29 }
0x12f5   :  { %v4224_v60 = vmul.f32 %v4222_v25, %v4222_v25 }
0x12f7   :  { %v4228_v41 = vsel %vm127_vm1, %v4224_v60, 0.0 }
0x12f8   :  { %4229 = vadd.xlane.f32.xlu0 %v4228_v41 }
0x137d   :  { %v4227_v55 = vpop.xlane.xlu1 %4226 }
0x137e   :  { %v4231_v39 = vmul.f32 0.03125, %v4227_v55 }
0x1380   :  { %v4233_v18 = vadd.f32 1e-05, %v4231_v39 }
0x1381   :  { %v4230_v31 = vpop.xlane.xlu0 %4229 }
0x1382   :  { %7140 = vrsqrt.f32 %v4233_v18  ;;  %v4232_v32 = vmul.f32 0.03125, %v4230_v31 }
0x1384   :  { %v4234_v33 = vadd.f32 1e-05, %v4232_v32 }
0x1386   :  { %7142 = vrsqrt.f32 %v4234_v33 }
0x138f   :  { %v7141_v46 = vpop.eup %7140 }
0x1390   :  { %v4237_v61 = vmul.f32 %v7141_v46, %v4221_v20 }
0x1392   :  { %v4239_v26 = vmul.f32 %v4237_v61, %v7763_v9 }
0x1393   :  { %v7143_v44 = vpop.eup %7142 }
0x1394   :  { %v4238_v35 = vmul.f32 %v7143_v44, %v4222_v25  ;;  %v8143_v38 = vadd.f32 %v4239_v26, %v7767_v11 }
0x1396   :  { %v4240_v27 = vmul.f32 %v4238_v35, %v7763_v9 }
0x1398   :  { %v8146_v40 = vadd.f32 %v4240_v27, %v7767_v11 }
0x139a   :  { %v4243_v43 = vpack.c.bf16 %v8146_v40, %v8143_v38 }
0x139c   :  { %6859 = vmatmul.mubr.msk.bf16.vlgmr.msra.gmra.mxu1 %vm127_vm1, %v4243_v43 }
0x139d   :  { %6864 = vmatprep.mubr.msk.bf16.mxu1 %vm7263_vm0, %v7262_v0 }
0x145c   :  { %v4281_v48 = vpop.f32.mrf.mxu1 }
0x145d   :  { %v4282_v56 = vadd.f32 %v7204_v50, %v4281_v48 }
0x145e   :  { %v6860_v49 = vpop.f32.mrf.mxu1 }
0x1460   :  { %v4284_v13 = vpop.f32.mrf.mxu1 }
0x1461   :  { %v4285_v58 = vadd.f32 %v7204_v50, %v4284_v13 }
0x1462   :  { %v6861_v62 = vpop.f32.mrf.mxu1 }
0x1463   :  { %v8156_v63 = vpack.c.bf16 %v4285_v58, %v4282_v56 }
0x1465   :  { %4292 = vrot.lane.b32.xlu0 %v8156_v63, %s7267_s24  ;;  %4290 = vrot.lane.b32.xlu1 %v8156_v63, %s7265_s22  ;;  %v4316_v16 = vshrl.u32 %v8156_v63, 16 }
0x1469   :  { %4298 = vrot.lane.b32.xlu0 %v8156_v63, %s7269_s26  ;;  %4294 = vrot.lane.b32.xlu1 %v8156_v63, %s7264_s21 }
0x146d   :  { %4302 = vrot.lane.b32.xlu0 %v8156_v63, %s7270_s27  ;;  %4296 = vrot.lane.b32.xlu1 %v8156_v63, %s7266_s23 }
0x1471   :  { %4300 = vrot.lane.b32.xlu1 %v8156_v63, %s7268_s25 }
0x14d7   :  { %v4293_v45 = vpop.permute.xlu0 %4292  ;;  %v4291_v47 = vpop.permute.xlu1 %4290 }
0x14d8   :  { %v4317_v6 = vshrl.u32 %v4291_v47, 16  ;;  %v4314_v54 = vpack.i.b16 %v4291_v47, %v8156_v63  ;;  %v4324_v51 = vshrl.u32 %v4293_v45, 16 }
0x14da   :  { %v4318_v20 = vpack.i.b16 %v4317_v6, %v4316_v16 }
0x14db   :  { %v4295_v1 = vpop.permute.xlu1 %4294  ;;  %v4299_v3 = vpop.permute.xlu0 %4298 }
0x14dc   :  { %v4333_v10 = vshrl.u32 %v4299_v3, 16  ;;  %v4325_v12 = vshrl.u32 %v4295_v1, 16  ;;  %v4322_v19 = vpack.i.b16 %v4295_v1, %v4293_v45 }
0x14de   :  { %v4326_v23 = vpack.i.b16 %v4325_v12, %v4324_v51 }
0x14df   :  { %v4297_v30 = vpop.permute.xlu1 %4296  ;;  %v4303_v14 = vpop.permute.xlu0 %4302 }
0x14e0   :  { %v4332_v53 = vshrl.u32 %v4297_v30, 16  ;;  %v4330_v5 = vpack.i.b16 %v4299_v3, %v4297_v30  ;;  %v4341_v24 = vshrl.u32 %v4303_v14, 16 }
0x14e2   :  { %v4334_v4 = vpack.i.b16 %v4333_v10, %v4332_v53  ;;  %v4360_v37 = vcombine.low %v4314_v54, %v4330_v5  ;;  %v4361_v29 = vcombine.high %v4314_v54, %v4330_v5 }
0x14e3   :  { %v4301_v57 = vpop.permute.xlu1 %4300 }
0x14e4   :  { %v4338_v28 = vpack.i.b16 %v4303_v14, %v4301_v57  ;;  %v4340_v17 = vshrl.u32 %v4301_v57, 16  ;;  %v4494_v60 = vcombine.low %v4318_v20, %v4334_v4  ;;  %v4495_v41 = vcombine.high %v4318_v20, %v4334_v4 }
0x14e5   :  { %v4368_v55 = vrot.slane %v4360_v37, %v7379_v34  ;;  %v4375_v27 = vrot.slane %v4361_v29, %v7379_v34 }
0x14e6   :  { %v4342_v59 = vpack.i.b16 %v4341_v24, %v4340_v17  ;;  %v4376_v7 = vcombine.low %v4322_v19, %v4338_v28  ;;  %v4377_v25 = vcombine.high %v4322_v19, %v4338_v28  ;;  %v4502_v61 = vrot.slane %v4494_v60, %v7379_v34 }
0x14e7   :  { %v4509_v44 = vrot.slane %v4495_v41, %v7379_v34 }
0x14e8   :  { %v4384_v39 = vrot.slane %v4376_v7, %v7379_v34  ;;  %v4510_v18 = vcombine.low %v4326_v23, %v4342_v59  ;;  %v4511_v31 = vcombine.high %v4326_v23, %v4342_v59  ;;  %v4391_v32 = vrot.slane %v4377_v25, %v7379_v34 }
0x14ea   :  { %v4422_v33 = vcombine.low %v4368_v55, %v4384_v39  ;;  %v4423_v46 = vcombine.high %v4368_v55, %v4384_v39  ;;  %v4518_v35 = vrot.slane %v4510_v18, %v7379_v34  ;;  %v4525_v26 = vrot.slane %v4511_v31, %v7379_v34 }
0x14eb   :  { %v4438_v58 = vcombine.low %v4375_v27, %v4391_v32  ;;  %v4439_v62 = vcombine.high %v4375_v27, %v4391_v32 }
0x14ec   :  { %v4430_v43 = vrot.slane %v4422_v33, %v7382_v52  ;;  %v4437_v48 = vrot.slane %v4423_v46, %v7382_v52  ;;  %v4556_v49 = vcombine.low %v4502_v61, %v4518_v35  ;;  %v4557_v13 = vcombine.high %v4502_v61, %v4518_v35 }
0x14ed   :  { %v4572_v50 = vcombine.low %v4509_v44, %v4525_v26  ;;  %v4573_v56 = vcombine.high %v4509_v44, %v4525_v26  ;;  %v4446_v54 = vrot.slane %v4438_v58, %v7382_v52  ;;  %v4453_v12 = vrot.slane %v4439_v62, %v7382_v52 }
0x14ee   :  { %v6413_v45 = vcombine.low %v4430_v43, %v4437_v48  ;;  %v6415_v47 = vcombine.high %v4430_v43, %v4437_v48  ;;  %v4564_v1 = vrot.slane %v4556_v49, %v7382_v52  ;;  %v4571_v3 = vrot.slane %v4557_v13, %v7382_v52 }
0x14ef   :  { %v4580_v30 = vrot.slane %v4572_v50, %v7382_v52  ;;  %v4587_v53 = vrot.slane %v4573_v56, %v7382_v52  ;;  %v6421_v28 = vcombine.low %v4446_v54, %v4453_v12  ;;  %v6423_v17 = vcombine.high %v4446_v54, %v4453_v12 }
0x14f0   :  { %v4636_v5 = vrot.slane %v6413_v45, %v7379_v34  ;;  %v4652_v6 = vrot.slane %v6415_v47, %v7379_v34  ;;  %v6417_v10 = vcombine.low %v4564_v1, %v4571_v3  ;;  %v6419_v14 = vcombine.high %v4564_v1, %v4571_v3 }
0x14f1   :  { %v6425_v19 = vcombine.low %v4580_v30, %v4587_v53  ;;  %v6427_v4 = vcombine.high %v4580_v30, %v4587_v53  ;;  %v4754_v39 = vrot.slane %v6421_v28, %v7379_v34  ;;  %v4770_v18 = vrot.slane %v6423_v17, %v7379_v34 }
0x14f2   :  { %v4661_v57 = vcombine.high %v4636_v5, %v4652_v6  ;;  %v4695_v51 = vrot.slane %v6417_v10, %v7379_v34  ;;  %v4711_v16 = vrot.slane %v6419_v14, %v7379_v34  ;;  %v4660_v59 = vcombine.low %v4636_v5, %v4652_v6 }
0x14f3   :  { %v4813_v7 = vrot.slane %v6425_v19, %v7379_v34  ;;  %v4829_v25 = vrot.slane %v6427_v4, %v7379_v34  ;;  %v4779_v49 = vcombine.high %v4754_v39, %v4770_v18  ;;  %v4778_v54 = vcombine.low %v4754_v39, %v4770_v18 }
0x14f4   :  { %v4675_v24 = vrot.slane %v4661_v57, %v7382_v52  ;;  %v4720_v37 = vcombine.high %v4695_v51, %v4711_v16  ;;  %v4719_v20 = vcombine.low %v4695_v51, %v4711_v16  ;;  %v4668_v44 = vrot.slane %v4660_v59, %v7382_v52 }
0x14f5   :  { %v4838_v26 = vcombine.high %v4813_v7, %v4829_v25  ;;  %v4793_v1 = vrot.slane %v4779_v49, %v7382_v52  ;;  %v4837_v5 = vcombine.low %v4813_v7, %v4829_v25  ;;  %v4786_v17 = vrot.slane %v4778_v54, %v7382_v52 }
0x14f6   :  { %v4734_v23 = vrot.slane %v4720_v37, %v7382_v52  ;;  %v4879_v60 = vshrl.u32 %v4675_v24, 16  ;;  %v4727_v33 = vrot.slane %v4719_v20, %v7382_v52  ;;  %v4685_v46 = vcombine.high %v4675_v24, %v7273_v42 }
0x14f7   :  { %v4867_v50 = vshrl.u32 %v4668_v44, 16  ;;  %v4852_v58 = vrot.slane %v4838_v26, %v7382_v52  ;;  %v4684_v30 = vcombine.high %v4668_v44, %v7273_v42  ;;  %v4915_v14 = vshrl.u32 %v4793_v1, 16 }
0x14f8   :  { %v4878_v29 = vpack.i.b16 %v4734_v23, %v4675_v24  ;;  %v4880_v41 = vshrl.u32 %v4734_v23, 16  ;;  %v4744_v55 = vcombine.high %v4734_v23, %v7273_v42  ;;  %v4868_v43 = vshrl.u32 %v4727_v33, 16 }
0x14f9   :  { %v4885_v48 = vshrl.u32 %v4685_v46, 16  ;;  %v4866_v13 = vpack.i.b16 %v4727_v33, %v4668_v44  ;;  %v4743_v47 = vcombine.high %v4727_v33, %v7273_v42  ;;  %v4916_v53 = vshrl.u32 %v4852_v58, 16 }
0x14fa   :  { %v4940_v31 = vsel %vm826_vm2, %v4878_v29, 0  ;;  %v4881_v32 = vpack.i.b16 %v4880_v41, %v4879_v60  ;;  %v4886_v35 = vshrl.u32 %v4744_v55, 16  ;;  %v4884_v27 = vpack.i.b16 %v4744_v55, %v4685_v46 }
0x14fb   :  { %6863 = vmatpush3.bf16.xpose.msra.mxu1 %v4940_v31  ;;  %v4869_v45 = vpack.i.b16 %v4868_v43, %v4867_v50  ;;  %v4914_v6 = vpack.i.b16 %v4852_v58, %v4793_v1  ;;  %v4874_v10 = vshrl.u32 %v4743_v47, 16  ;;  %v4872_v12 = vpack.i.b16 %v4743_v47, %v4684_v30 }
0x14fc   :  { %v4986_v61 = vsel %vm826_vm2, %v4881_v32, 0  ;;  %6874 = vmatprep.subr.bf16.mxu1 %v7262_v0  ;;  %v4887_v56 = vpack.i.b16 %v4886_v35, %v4885_v48  ;;  %v5032_v62 = vsel %vm826_vm2, %v4884_v27, 0  ;;  %v4873_v57 = vshrl.u32 %v4684_v30, 16 }
0x14fd   :  { %6869 = vmatpush3.bf16.xpose.msra.mxu0 %v4986_v61  ;;  %v4917_v51 = vpack.i.b16 %v4916_v53, %v4915_v14  ;;  %v4862_v16 = vcombine.high %v4852_v58, %v7273_v42  ;;  %v5124_v19 = vsel %vm826_vm2, %v4914_v6, 0  ;;  %v4845_v24 = vrot.slane %v4837_v5, %v7382_v52 }
0x14fe   :  { %6880 = vmatprep.subr.bf16.mxu0 %v7262_v0  ;;  %v5078_v3 = vsel %vm826_vm2, %v4887_v56, 0  ;;  %v4875_v4 = vpack.i.b16 %v4874_v10, %v4873_v57  ;;  %v4803_v37 = vcombine.high %v4793_v1, %v7273_v42  ;;  %v4903_v29 = vshrl.u32 %v4786_v17, 16 }
0x14ff   :  { %v5170_v28 = vsel %vm826_vm2, %v4917_v51, 0  ;;  %v4922_v20 = vshrl.u32 %v4862_v16, 16  ;;  %v4904_v59 = vshrl.u32 %v4845_v24, 16  ;;  %v4902_v25 = vpack.i.b16 %v4845_v24, %v4786_v17 }
0x1500   :  { %v4920_v23 = vpack.i.b16 %v4862_v16, %v4803_v37  ;;  %v4921_v7 = vshrl.u32 %v4803_v37, 16  ;;  %v4861_v39 = vcombine.high %v4845_v24, %v7273_v42  ;;  %v4802_v31 = vcombine.high %v4786_v17, %v7273_v42 }
0x1501   :  { %v4905_v55 = vpack.i.b16 %v4904_v59, %v4903_v29 }
0x1502   :  { %6865 = vmatmul.mubr.msk.bf16.vlgmr.msra.gmra.mxu1 %vm826_vm2, %v4866_v13  ;;  %v4923_v60 = vpack.i.b16 %v4922_v20, %v4921_v7  ;;  %v5216_v41 = vsel %vm826_vm2, %v4920_v23, 0  ;;  %v4910_v32 = vshrl.u32 %v4861_v39, 16  ;;  %v4908_v33 = vpack.i.b16 %v4861_v39, %v4802_v31 }
0x1503   :  { %6875 = vmatpush3.bf16.xpose.msra.mxu1 %v5032_v62  ;;  %6876 = vmatprep.mubr.msk.bf16.mxu1 %vm7263_vm0, %v7262_v0  ;;  %v4909_v46 = vshrl.u32 %v4802_v31, 16 }
0x1504   :  { %6871 = vmatmul.mubr.msk.bf16.vlgmr.msra.gmra.mxu0 %vm826_vm2, %v4869_v45  ;;  %6886 = vmatprep.subr.bf16.mxu1 %v7262_v0  ;;  %v5262_v18 = vsel %vm826_vm2, %v4923_v60, 0 }
0x1505   :  { %6881 = vmatpush3.bf16.xpose.msra.mxu0 %v5078_v3  ;;  %6882 = vmatprep.mubr.msk.bf16.mxu0 %vm7263_vm0, %v7262_v0  ;;  %v4911_v61 = vpack.i.b16 %v4910_v32, %v4909_v46 }
0x1506   :  { %6892 = vmatprep.subr.bf16.mxu0 %v7262_v0 }
0x150a   :  { %6877 = vmatmul.mubr.msk.bf16.vlgmr.msra.gmra.mxu1 %vm826_vm2, %v4872_v12 }
0x150b   :  { %6887 = vmatpush3.bf16.xpose.msra.mxu1 %v5124_v19  ;;  %6888 = vmatprep.mubr.msk.bf16.mxu1 %vm7263_vm0, %v7262_v0 }
0x150c   :  { %6883 = vmatmul.mubr.msk.bf16.vlgmr.msra.gmra.mxu0 %vm826_vm2, %v4875_v4  ;;  %6898 = vmatprep.subr.bf16.mxu1 %v7262_v0 }
0x150d   :  { %6893 = vmatpush3.bf16.xpose.msra.mxu0 %v5170_v28  ;;  %6894 = vmatprep.mubr.msk.bf16.mxu0 %vm7263_vm0, %v7262_v0 }
0x150e   :  { %6904 = vmatprep.subr.bf16.mxu0 %v7262_v0 }
0x1512   :  { %6889 = vmatmul.mubr.msk.bf16.vlgmr.msra.gmra.mxu1 %vm826_vm2, %v4902_v25 }
0x1513   :  { %6899 = vmatpush3.bf16.xpose.msra.mxu1 %v5216_v41  ;;  %6900 = vmatprep.mubr.msk.bf16.mxu1 %vm7263_vm0, %v7262_v0 }
0x1514   :  { %6895 = vmatmul.mubr.msk.bf16.vlgmr.msra.gmra.mxu0 %vm826_vm2, %v4905_v55  ;;  %6910 = vmatprep.subr.bf16.mxu1 %v7262_v0 }
0x1515   :  { %6905 = vmatpush3.bf16.xpose.msra.mxu0 %v5262_v18  ;;  %6906 = vmatprep.mubr.msk.bf16.mxu0 %vm7263_vm0, %v7262_v0 }
0x1516   :  { %6916 = vmatprep.subr.bf16.mxu0 %v7262_v0 }
0x151a   :  { %6901 = vmatmul.mubr.msk.bf16.vlgmr.msra.gmra.mxu1 %vm826_vm2, %v4908_v33 }
0x151b   :  { %6912 = vmatprep.mubr.msk.bf16.mxu1 %vm7263_vm0, %v7262_v0 }
0x151c   :  { %6907 = vmatmul.mubr.msk.bf16.vlgmr.msra.gmra.mxu0 %vm826_vm2, %v4911_v61 }
0x151d   :  { %6918 = vmatprep.mubr.msk.bf16.mxu0 %vm7263_vm0, %v7262_v0 }
0x15c2   :  { %v4976_v44 = vpop.f32.mrf.mxu1 }
0x15c3   :  { %v5304_v35 = vsel %vm826_vm2, %v4976_v44, -inf }
0x15c4   :  { %5305 = vmax.xlane.f32.xlu1 %v5304_v35  ;;  %v6866_v26 = vpop.f32.mrf.mxu1  ;;  %v5022_v27 = vpop.f32.mrf.mxu0 }
0x15c5   :  { %v5307_v43 = vsel %vm826_vm2, %v5022_v27, -inf }
0x15c6   :  { %v4979_v48 = vpop.f32.mrf.mxu1  ;;  %5308 = vmax.xlane.f32.xlu0 %v5307_v43  ;;  %v6872_v49 = vpop.f32.mrf.mxu0 }
0x15c8   :  { %v6867_v13 = vpop.f32.mrf.mxu1  ;;  %v5025_v50 = vpop.f32.mrf.mxu0 }
0x15ca   :  { %v6873_v56 = vpop.f32.mrf.mxu0  ;;  %v8256_v58 = vpop.f32.mrf.mxu1 }
0x15cb   :  { %v5310_v62 = vsel %vm826_vm2, %v8256_v58, -inf }
0x15cc   :  { %v6878_v45 = vpop.f32.mrf.mxu1  ;;  %5311 = vmax.xlane.f32.xlu0 %v5310_v62  ;;  %v5114_v47 = vpop.f32.mrf.mxu0 }
0x15cd   :  { %v5313_v1 = vsel %vm826_vm2, %v5114_v47, -inf }
0x15ce   :  { %v5071_v3 = vpop.f32.mrf.mxu1  ;;  %5314 = vmax.xlane.f32.xlu1 %v5313_v1  ;;  %v6884_v30 = vpop.f32.mrf.mxu0 }
0x15d0   :  { %v6879_v53 = vpop.f32.mrf.mxu1  ;;  %v5117_v5 = vpop.f32.mrf.mxu0 }
0x15d2   :  { %v6885_v6 = vpop.f32.mrf.mxu0  ;;  %v5160_v10 = vpop.f32.mrf.mxu1 }
0x15d3   :  { %v5316_v14 = vsel %vm826_vm2, %v5160_v10, -inf }
0x15d4   :  { %v6890_v54 = vpop.f32.mrf.mxu1  ;;  %5317 = vmax.xlane.f32.xlu0 %v5316_v14  ;;  %v5206_v12 = vpop.f32.mrf.mxu0 }
0x15d5   :  { %v5319_v57 = vsel %vm826_vm2, %v5206_v12, -inf }
0x15d6   :  { %v5163_v51 = vpop.f32.mrf.mxu1  ;;  %5320 = vmax.xlane.f32.xlu1 %v5319_v57  ;;  %v6896_v16 = vpop.f32.mrf.mxu0 }
0x15d8   :  { %v6891_v19 = vpop.f32.mrf.mxu1  ;;  %v5209_v4 = vpop.f32.mrf.mxu0 }
0x15da   :  { %v6897_v24 = vpop.f32.mrf.mxu0  ;;  %v5252_v37 = vpop.f32.mrf.mxu1 }
0x15db   :  { %v5322_v28 = vsel %vm826_vm2, %v5252_v37, -inf }
0x15dc   :  { %v6902_v17 = vpop.f32.mrf.mxu1  ;;  %5323 = vmax.xlane.f32.xlu0 %v5322_v28  ;;  %v5298_v20 = vpop.f32.mrf.mxu0 }
0x15dd   :  { %v5325_v23 = vsel %vm826_vm2, %v5298_v20, -inf }
0x15de   :  { %v5255_v59 = vpop.f32.mrf.mxu1  ;;  %5326 = vmax.xlane.f32.xlu1 %v5325_v23  ;;  %v6908_v7 = vpop.f32.mrf.mxu0 }
0x15e0   :  { %v6903_v25 = vpop.f32.mrf.mxu1  ;;  %v5301_v29 = vpop.f32.mrf.mxu0 }
0x15e2   :  { %v6909_v60 = vpop.f32.mrf.mxu0 }
0x15ef   :  { %4306 = vrot.lane.b32.xlu1 %v8156_v63, %s7274_s28 }
0x15f2   :  { %4304 = vrot.lane.b32.xlu0 %v8156_v63, %s7260_s30 }
0x164d   :  { %v5306_v41 = vpop.xlane.xlu1 %5305 }
0x164e   :  { %v5328_v55 = vsub.f32 %v4976_v44, %v5306_v41 }
0x164f   :  { %v5309_v39 = vpop.xlane.xlu0 %5308 }
0x1650   :  { %v5336_v18 = vmul.f32 1.442695, %v5328_v55  ;;  %v5329_v31 = vsub.f32 %v5022_v27, %v5309_v39 }
0x1652   :  { %7144 = vpow2.f32 %v5336_v18  ;;  %v5338_v32 = vmul.f32 1.442695, %v5329_v31 }
0x1654   :  { %7146 = vpow2.f32 %v5338_v32 }
0x1655   :  { %v5312_v44 = vpop.xlane.xlu0 %5311 }
0x1656   :  { %v5330_v48 = vsub.f32 %v8256_v58, %v5312_v44 }
0x1657   :  { %v5315_v26 = vpop.xlane.xlu1 %5314 }
0x1658   :  { %v5331_v27 = vsub.f32 %v5114_v47, %v5315_v26  ;;  %v5340_v62 = vmul.f32 1.442695, %v5330_v48 }
0x165a   :  { %v5342_v13 = vmul.f32 1.442695, %v5331_v27 }
0x165c   :  { %7148 = vpow2.f32 %v5342_v13 }
0x165d   :  { %v5318_v43 = vpop.xlane.xlu0 %5317  ;;  %7150 = vpow2.f32 %v5340_v62 }
0x165e   :  { %v5332_v50 = vsub.f32 %v5160_v10, %v5318_v43 }
0x165f   :  { %v8269_v33 = vpop.eup %7144  ;;  %v5321_v49 = vpop.xlane.xlu1 %5320 }
0x1660   :  { %v5352_v46 = vsel %vm826_vm2, %v8269_v33, 0.0  ;;  %v5333_v45 = vsub.f32 %v5206_v12, %v5321_v49  ;;  %v5344_v3 = vmul.f32 1.442695, %v5332_v50 }
0x1661   :  { %v8273_v61 = vpop.eup %7146  ;;  %5353 = vadd.xlane.f32.xlu0 %v5352_v46 }
0x1662   :  { %v5355_v35 = vsel %vm826_vm2, %v8273_v61, 0.0  ;;  %v5346_v53 = vmul.f32 1.442695, %v5333_v45  ;;  %7152 = vpow2.f32 %v5344_v3 }
0x1663   :  { %5356 = vadd.xlane.f32.xlu1 %v5355_v35 }
0x1664   :  { %7154 = vpow2.f32 %v5346_v53 }
0x1665   :  { %v5324_v56 = vpop.xlane.xlu0 %5323 }
0x1666   :  { %v5334_v30 = vsub.f32 %v5252_v37, %v5324_v56 }
0x1667   :  { %v5327_v1 = vpop.xlane.xlu1 %5326 }
0x1668   :  { %v5335_v5 = vsub.f32 %v5298_v20, %v5327_v1 }
0x1669   :  { %v8282_v58 = vpop.eup %7148  ;;  %v4305_v37 = vpop.permute.xlu0 %4304 }
0x166a   :  { %v5350_v47 = vmul.f32 1.442695, %v5335_v5  ;;  %v8284_v6 = vpop.eup %7150  ;;  %v5361_v10 = vsel %vm826_vm2, %v8282_v58, 0.0  ;;  %v4348_v25 = vshrl.u32 %v4305_v37, 16 }
0x166b   :  { %v5358_v54 = vsel %vm826_vm2, %v8284_v6, 0.0  ;;  %v4307_v28 = vpop.permute.xlu1 %4306 }
0x166c   :  { %v4349_v23 = vshrl.u32 %v4307_v28, 16  ;;  %v8306_v7 = vpack.i.b16 %v4307_v28, %v4305_v37 }
0x166e   :  { %v8310_v39 = vpack.i.b16 %v4349_v23, %v4348_v25  ;;  %v4399_v18 = vrot.slane %v8306_v7, %v7379_v34 }
0x166f   :  { %v8288_v14 = vpop.eup %7152 }
0x1670   :  { %v5364_v57 = vsel %vm826_vm2, %v8288_v14, 0.0  ;;  %v4533_v44 = vrot.slane %v8310_v39, %v7379_v34 }
0x1671   :  { %v8292_v12 = vpop.eup %7154 }
0x1672   :  { %v5367_v16 = vsel %vm826_vm2, %v8292_v12, 0.0 }
0x1674   :  { %4308 = vrot.lane.b32.xlu1 %v8156_v63, %s7275_s29 }
0x1677   :  { %4310 = vrot.lane.b32.xlu0 %v8156_v63, %s7276_s9  ;;  %v5348_v63 = vmul.f32 1.442695, %v5334_v30 }
0x1679   :  { %7156 = vpow2.f32 %v5348_v63 }
0x167a   :  { %7158 = vpow2.f32 %v5350_v47 }
0x1686   :  { %v8296_v51 = vpop.eup %7156 }
0x1687   :  { %v8300_v19 = vpop.eup %7158  ;;  %v5370_v4 = vsel %vm826_vm2, %v8296_v51, 0.0 }
0x1688   :  { %v5373_v24 = vsel %vm826_vm2, %v8300_v19, 0.0 }
0x1696   :  { %5362 = vadd.xlane.f32.xlu0 %v5361_v10 }
0x1698   :  { %5359 = vadd.xlane.f32.xlu1 %v5358_v54 }
0x169a   :  { %5365 = vadd.xlane.f32.xlu0 %v5364_v57 }
0x169c   :  { %5368 = vadd.xlane.f32.xlu1 %v5367_v16 }
0x169e   :  { %5371 = vadd.xlane.f32.xlu0 %v5370_v4 }
0x16a0   :  { %5374 = vadd.xlane.f32.xlu1 %v5373_v24 }
0x16ea   :  { %v5354_v17 = vpop.xlane.xlu0 %5353 }
0x16eb   :  { %7160 = vrcp.f32 %v5354_v17 }
0x16ec   :  { %v5357_v20 = vpop.xlane.xlu1 %5356 }
0x16ed   :  { %7162 = vrcp.f32 %v5357_v20 }
0x16ee   :  { %v4311_v59 = vpop.permute.xlu0 %4310 }
0x16ef   :  { %v4357_v60 = vshrl.u32 %v4311_v59, 16 }
0x16f0   :  { %v4309_v29 = vpop.permute.xlu1 %4308 }
0x16f1   :  { %v8308_v41 = vpack.i.b16 %v4311_v59, %v4309_v29  ;;  %v4356_v55 = vshrl.u32 %v4309_v29, 16 }
0x16f3   :  { %v4358_v31 = vpack.i.b16 %v4357_v60, %v4356_v55  ;;  %v4414_v32 = vrot.slane %v8308_v41, %v7379_v34 }
0x16f5   :  { %v4454_v46 = vcombine.low %v4399_v18, %v4414_v32  ;;  %v4455_v35 = vcombine.high %v4399_v18, %v4414_v32  ;;  %v4548_v26 = vrot.slane %v4358_v31, %v7379_v34 }
0x16f7   :  { %v4462_v27 = vrot.slane %v4454_v46, %v7382_v52  ;;  %v4469_v43 = vrot.slane %v4455_v35, %v7382_v52  ;;  %v4588_v48 = vcombine.low %v4533_v44, %v4548_v26  ;;  %v4589_v49 = vcombine.high %v4533_v44, %v4548_v26 }
0x16f8   :  { %v7161_v10 = vpop.eup %7160  ;;  %v4541_v46 = vcombine.high %v4358_v31, %v7549_v2  ;;  %v4526_v44 = vcombine.high %v8310_v39, %v7549_v2  ;;  %v4407_v26 = vcombine.high %v8308_v41, %v7549_v2 }
0x16f9   :  { %v6414_v13 = vcombine.low %v4462_v27, %v4469_v43  ;;  %v6416_v50 = vcombine.high %v4462_v27, %v4469_v43  ;;  %v4596_v56 = vrot.slane %v4588_v48, %v7382_v52  ;;  %v4603_v62 = vrot.slane %v4589_v49, %v7382_v52 }
0x16fa   :  { %v7163_v16 = vpop.eup %7162  ;;  %v5384_v24 = vmul.f32 %v7161_v10, %v8269_v33  ;;  %v4392_v27 = vcombine.high %v8306_v7, %v7549_v2  ;;  %v4555_v43 = vrot.slane %v4541_v46, %v7379_v34  ;;  %v4540_v39 = vrot.slane %v4526_v44, %v7379_v34 }
0x16fb   :  { %v4643_v45 = vrot.slane %v6414_v13, %v7379_v34  ;;  %v4659_v1 = vrot.slane %v6416_v50, %v7379_v34  ;;  %v6418_v3 = vcombine.low %v4596_v56, %v4603_v62  ;;  %v6420_v30 = vcombine.high %v4596_v56, %v4603_v62 }
0x16fc   :  { %v5385_v23 = vmul.f32 %v7163_v16, %v8273_v61  ;;  %v5392_v32 = vpack.c.bf16 %v5384_v24, %v5384_v24  ;;  %v4421_v41 = vrot.slane %v4407_v26, %v7379_v34  ;;  %v4406_v48 = vrot.slane %v4392_v27, %v7379_v34 }
0x16fd   :  { %v4676_v53 = vcombine.low %v4643_v45, %v4659_v1  ;;  %v4702_v5 = vrot.slane %v6418_v3, %v7379_v34  ;;  %v4718_v63 = vrot.slane %v6420_v30, %v7379_v34  ;;  %v4604_v49 = vcombine.low %v4540_v39, %v4555_v43 }
0x16fe   :  { %v5393_v35 = vpack.c.bf16 %v5385_v23, %v5385_v23  ;;  %v4605_v13 = vcombine.high %v4540_v39, %v4555_v43  ;;  %v4470_v50 = vcombine.low %v4406_v48, %v4421_v41  ;;  %v4471_v56 = vcombine.high %v4406_v48, %v4421_v41 }
0x16ff   :  { %v4683_v47 = vrot.slane %v4676_v53, %v7382_v52  ;;  %v4735_v54 = vcombine.low %v4702_v5, %v4718_v63  ;;  %v4612_v62 = vrot.slane %v4604_v49, %v7382_v52 }
0x1700   :  { %v4619_v45 = vrot.slane %v4605_v13, %v7382_v52  ;;  %v4478_v2 = vrot.slane %v4470_v50, %v7382_v52  ;;  %v4485_v7 = vrot.slane %v4471_v56, %v7382_v52 }
0x1701   :  { %v4686_v57 = vcombine.high %v4683_v47, %v7273_v42  ;;  %v4742_v4 = vrot.slane %v4735_v54, %v7382_v52  ;;  %v4891_v28 = vshrl.u32 %v4683_v47, 16 }
0x1702   :  { %v6426_v1 = vcombine.low %v4612_v62, %v4619_v45  ;;  %v6428_v3 = vcombine.high %v4612_v62, %v4619_v45  ;;  %v6422_v30 = vcombine.low %v4478_v2, %v4485_v7  ;;  %v6424_v53 = vcombine.high %v4478_v2, %v4485_v7 }
0x1703   :  { %v4890_v37 = vpack.i.b16 %v4742_v4, %v4683_v47  ;;  %v4892_v17 = vshrl.u32 %v4742_v4, 16  ;;  %v4745_v20 = vcombine.high %v4742_v4, %v7273_v42  ;;  %v4897_v59 = vshrl.u32 %v4686_v57, 16 }
0x1704   :  { %v4820_v5 = vrot.slane %v6426_v1, %v7379_v34  ;;  %v4836_v63 = vrot.slane %v6428_v3, %v7379_v34  ;;  %v4761_v10 = vrot.slane %v6422_v30, %v7379_v34  ;;  %v4777_v54 = vrot.slane %v6424_v53, %v7379_v34  ;;  %v7205_v1 = vld [vmem:[#allocation2 + $0x8] sm:$0xff]   ;;  %v7208_v3 = vld [vmem:[%s8518_s2] sm:$0xff]  }
0x1705   :  { %v5404_v25 = vsel %vm1294_vm3, %v4890_v37, 0  ;;  %v4893_v29 = vpack.i.b16 %v4892_v17, %v4891_v28  ;;  %v4896_v60 = vpack.i.b16 %v4745_v20, %v4686_v57  ;;  %v4898_v55 = vshrl.u32 %v4745_v20, 16 }
0x1706   :  { %6911 = vmatpush3.bf16.msra.mxu1 %v5404_v25  ;;  %v4853_v16 = vcombine.low %v4820_v5, %v4836_v63  ;;  %v4794_v24 = vcombine.low %v4761_v10, %v4777_v54 }
0x1707   :  { %v5450_v18 = vsel %vm1294_vm3, %v4893_v29, 0  ;;  %6922 = vmatprep.subr.bf16.mxu1 %v7262_v0  ;;  %v4899_v33 = vpack.i.b16 %v4898_v55, %v4897_v59  ;;  %v5496_v61 = vsel %vm1294_vm3, %v4896_v60, 0 }
0x1708   :  { %6917 = vmatpush3.bf16.msra.mxu0 %v5450_v18  ;;  %v4860_v28 = vrot.slane %v4853_v16, %v7382_v52  ;;  %v4801_v17 = vrot.slane %v4794_v24, %v7382_v52 }
0x1709   :  { %6913 = vmatmul.mubr.msk.bf16.vlgmr.msra.gmra.mxu1 %vm826_vm2, %v5392_v32  ;;  %6928 = vmatprep.subr.bf16.mxu0 %v7262_v0  ;;  %v5542_v31 = vsel %vm1294_vm3, %v4899_v33, 0 }
0x170a   :  { %6923 = vmatpush3.bf16.msra.mxu1 %v5496_v61  ;;  %6924 = vmatprep.mubr.msk.bf16.mxu1 %vm7263_vm0, %v7262_v0  ;;  %v4928_v23 = vshrl.u32 %v4860_v28, 16  ;;  %v4927_v25 = vshrl.u32 %v4801_v17, 16  ;;  %v4863_v18 = vcombine.high %v4860_v28, %v7273_v42  ;;  %v4926_v61 = vpack.i.b16 %v4860_v28, %v4801_v17 }
0x170b   :  { %6919 = vmatmul.mubr.msk.bf16.vlgmr.msra.gmra.mxu0 %vm826_vm2, %v5393_v35  ;;  %6934 = vmatprep.subr.bf16.mxu1 %v7262_v0  ;;  %v4804_v35 = vcombine.high %v4801_v17, %v7273_v42 }
0x170c   :  { %6929 = vmatpush3.bf16.msra.mxu0 %v5542_v31  ;;  %6930 = vmatprep.mubr.msk.bf16.mxu0 %vm7263_vm0, %v7262_v0  ;;  %v4929_v55 = vpack.i.b16 %v4928_v23, %v4927_v25  ;;  %v4934_v27 = vshrl.u32 %v4863_v18, 16 }
0x170d   :  { %6940 = vmatprep.subr.bf16.mxu0 %v7262_v0  ;;  %v4932_v49 = vpack.i.b16 %v4863_v18, %v4804_v35 }
0x170e   :  { %v5634_v26 = vsel %vm1294_vm3, %v4929_v55, 0 }
0x170f   :  { %v5680_v45 = vsel %vm1294_vm3, %v4932_v49, 0 }
0x171f   :  { %v5363_v47 = vpop.xlane.xlu0 %5362 }
0x1720   :  { %7164 = vrcp.f32 %v5363_v47 }
0x1721   :  { %v5360_v57 = vpop.xlane.xlu1 %5359 }
0x1722   :  { %7166 = vrcp.f32 %v5360_v57 }
0x1723   :  { %v5366_v4 = vpop.xlane.xlu0 %5365 }
0x1724   :  { %7168 = vrcp.f32 %v5366_v4 }
0x1725   :  { %v5369_v37 = vpop.xlane.xlu1 %5368 }
0x1726   :  { %7170 = vrcp.f32 %v5369_v37 }
0x1727   :  { %v5372_v59 = vpop.xlane.xlu0 %5371 }
0x1729   :  { %v5375_v20 = vpop.xlane.xlu1 %5374 }
0x172a   :  { %7172 = vrcp.f32 %v5375_v20 }
0x172b   :  { %7174 = vrcp.f32 %v5372_v59 }
0x172d   :  { %v7165_v29 = vpop.eup %7164 }
0x172e   :  { %v5387_v60 = vmul.f32 %v7165_v29, %v8282_v58  ;;  %v5588_v58 = vsel %vm1294_vm3, %v4926_v61, 0 }
0x172f   :  { %v7167_v32 = vpop.eup %7166 }
0x1730   :  { %v5395_v33 = vpack.c.bf16 %v5387_v60, %v5387_v60  ;;  %v5386_v46 = vmul.f32 %v7167_v32, %v8284_v6  ;;  %v4933_v6 = vshrl.u32 %v4804_v35, 16 }
0x1731   :  { %v7169_v44 = vpop.eup %7168 }
0x1732   :  { %6931 = vmatmul.mubr.msk.bf16.vlgmr.msra.gmra.mxu0 %vm826_vm2, %v5395_v33  ;;  %v5394_v31 = vpack.c.bf16 %v5386_v46, %v5386_v46  ;;  %v4935_v39 = vpack.i.b16 %v4934_v27, %v4933_v6  ;;  %v5388_v41 = vmul.f32 %v7169_v44, %v8288_v14 }
0x1733   :  { %v7171_v43 = vpop.eup %7170  ;;  %6941 = vmatpush3.bf16.msra.mxu0 %v5634_v26  ;;  %6942 = vmatprep.mubr.msk.bf16.mxu0 %vm7263_vm0, %v7262_v0 }
0x1734   :  { %6925 = vmatmul.mubr.msk.bf16.vlgmr.msra.gmra.mxu1 %vm826_vm2, %v5394_v31  ;;  %6952 = vmatprep.subr.bf16.mxu0 %v7262_v0  ;;  %v5389_v42 = vmul.f32 %v7171_v43, %v8292_v12  ;;  %v5726_v50 = vsel %vm1294_vm3, %v4935_v39, 0  ;;  %v5396_v56 = vpack.c.bf16 %v5388_v41, %v5388_v41 }
0x1735   :  { %6935 = vmatpush3.bf16.msra.mxu1 %v5588_v58  ;;  %6936 = vmatprep.mubr.msk.bf16.mxu1 %vm7263_vm0, %v7262_v0 }
0x1736   :  { %6946 = vmatprep.subr.bf16.mxu1 %v7262_v0  ;;  %v5397_v48 = vpack.c.bf16 %v5389_v42, %v5389_v42 }
0x1737   :  { %v7173_v13 = vpop.eup %7172 }
0x1738   :  { %v7175_v62 = vpop.eup %7174  ;;  %v5391_v12 = vmul.f32 %v7173_v13, %v8300_v19  ;;  %v7206_v19 = vld [vmem:[%s8518_s2 + $0x8] sm:$0xff]  }
0x1739   :  { %v5390_v14 = vmul.f32 %v7175_v62, %v8296_v51  ;;  %v7207_v51 = vld [vmem:[#allocation2] sm:$0xff]  }
0x173a   :  { %6943 = vmatmul.mubr.msk.bf16.vlgmr.msra.gmra.mxu0 %vm826_vm2, %v5397_v48  ;;  %v5399_v2 = vpack.c.bf16 %v5391_v12, %v5391_v12 }
0x173b   :  { %6953 = vmatpush3.bf16.msra.mxu0 %v5726_v50  ;;  %6954 = vmatprep.mubr.msk.bf16.mxu0 %vm7263_vm0, %v7262_v0  ;;  %v5398_v7 = vpack.c.bf16 %v5390_v14, %v5390_v14 }
0x173c   :  { %6937 = vmatmul.mubr.msk.bf16.vlgmr.msra.gmra.mxu1 %vm826_vm2, %v5396_v56  ;;  %6966 = vmatprep.subr.bf16.mxu0 %v7262_v0 }
0x173d   :  { %6947 = vmatpush3.bf16.msra.mxu1 %v5680_v45  ;;  %6948 = vmatprep.mubr.msk.bf16.mxu1 %vm7263_vm0, %v7262_v0 }
0x173e   :  { %6958 = vmatprep.subr.bf16.mxu1 %v7262_v0 }
0x1742   :  { %6955 = vmatmul.mubr.msk.bf16.vlgmr.msra.gmra.mxu0 %vm826_vm2, %v5399_v2 }
0x1743   :  { %6967 = vmatpush3.bf16.msra.mxu0 %v7205_v1  ;;  %6970 = vmatprep.mubr.msk.bf16.mxu0 %vm7263_vm0, %v7262_v0 }
0x1744   :  { %6949 = vmatmul.mubr.msk.bf16.vlgmr.msra.gmra.mxu1 %vm826_vm2, %v5398_v7  ;;  %6968 = vmatprep.subr.bf16.mxu0 %v7262_v0 }
0x1745   :  { %6959 = vmatpush3.bf16.msra.mxu1 %v7206_v19  ;;  %6962 = vmatprep.mubr.msk.bf16.mxu1 %vm7263_vm0, %v7262_v0 }
0x1746   :  { %6960 = vmatprep.subr.bf16.mxu1 %v7262_v0 }
0x1747   :  { %6969 = vmatpush3.bf16.msra.mxu0 %v7207_v51 }
0x1749   :  { %6961 = vmatpush3.bf16.msra.mxu1 %v7208_v3 }
0x174a   :  { %6974 = vmatprep.subr.bf16.mxu1 %v7262_v0 }
0x17c9   :  { %v5440_v30 = vpop.f32.mrf.mxu1 }
0x17cb   :  { %v6914_v53 = vpop.f32.mrf.mxu1  ;;  %v5486_v5 = vpop.f32.mrf.mxu0 }
0x17cd   :  { %v5443_v63 = vpop.f32.mrf.mxu1  ;;  %v6920_v47 = vpop.f32.mrf.mxu0 }
0x17cf   :  { %v6915_v10 = vpop.f32.mrf.mxu1  ;;  %v5489_v54 = vpop.f32.mrf.mxu0 }
0x17d1   :  { %v6921_v57 = vpop.f32.mrf.mxu0 }
0x17f2   :  { %v5578_v16 = vpop.f32.mrf.mxu0 }
0x17f3   :  { %v5784_v4 = vcombine.low %v5486_v5, %v5578_v16  ;;  %v5785_v24 = vcombine.high %v5486_v5, %v5578_v16 }
0x17f4   :  { %v5532_v37 = vpop.f32.mrf.mxu1  ;;  %v6932_v28 = vpop.f32.mrf.mxu0 }
0x17f5   :  { %v5768_v17 = vcombine.low %v5440_v30, %v5532_v37  ;;  %v5769_v20 = vcombine.high %v5440_v30, %v5532_v37  ;;  %v5792_v25 = vrot.slane %v5784_v4, %v7379_v34  ;;  %v5799_v29 = vrot.slane %v5785_v24, %v7379_v34 }
0x17f6   :  { %v6926_v23 = vpop.f32.mrf.mxu1  ;;  %v5581_v59 = vpop.f32.mrf.mxu0 }
0x17f7   :  { %v5776_v60 = vrot.slane %v5768_v17, %v7379_v34  ;;  %v5783_v55 = vrot.slane %v5769_v20, %v7379_v34 }
0x17f8   :  { %v5535_v18 = vpop.f32.mrf.mxu1  ;;  %v6933_v32 = vpop.f32.mrf.mxu0 }
0x17f9   :  { %v5800_v33 = vcombine.low %v5776_v60, %v5792_v25  ;;  %v5801_v46 = vcombine.high %v5776_v60, %v5792_v25  ;;  %v5816_v61 = vcombine.low %v5783_v55, %v5799_v29  ;;  %v5817_v35 = vcombine.high %v5783_v55, %v5799_v29 }
0x17fa   :  { %v6927_v44 = vpop.f32.mrf.mxu1  ;;  %v5670_v26 = vpop.f32.mrf.mxu0 }
0x17fb   :  { %v5808_v31 = vrot.slane %v5800_v33, %v7382_v52  ;;  %v5815_v27 = vrot.slane %v5801_v46, %v7382_v52  ;;  %v5824_v43 = vrot.slane %v5816_v61, %v7382_v52  ;;  %v5831_v58 = vrot.slane %v5817_v35, %v7382_v52 }
0x17fc   :  { %v5624_v42 = vpop.f32.mrf.mxu1  ;;  %v6944_v6 = vpop.f32.mrf.mxu0 }
0x17fd   :  { %v5904_v39 = vcombine.low %v5808_v31, %v5815_v27  ;;  %v6445_v41 = vcombine.high %v5808_v31, %v5815_v27  ;;  %v5920_v48 = vcombine.low %v5824_v43, %v5831_v58  ;;  %v6446_v49 = vcombine.high %v5824_v43, %v5831_v58 }
0x17fe   :  { %v6938_v13 = vpop.f32.mrf.mxu1  ;;  %v5673_v50 = vpop.f32.mrf.mxu0 }
0x17ff   :  { %v5911_v56 = vrot.slane %v5904_v39, %v7379_v34  ;;  %v5919_v62 = vrot.slane %v6445_v41, %v7379_v34  ;;  %v5927_v12 = vrot.slane %v5920_v48, %v7379_v34  ;;  %v5935_v45 = vrot.slane %v6446_v49, %v7379_v34 }
0x1800   :  { %v5627_v14 = vpop.f32.mrf.mxu1  ;;  %v6945_v2 = vpop.f32.mrf.mxu0 }
0x1801   :  { %v5936_v7 = vcombine.low %v5911_v56, %v5919_v62  ;;  %v5952_v1 = vcombine.low %v5927_v12, %v5935_v45  ;;  %v5937_v61 = vcombine.high %v5911_v56, %v5919_v62  ;;  %v5953_v35 = vcombine.high %v5927_v12, %v5935_v45 }
0x1802   :  { %v6939_v19 = vpop.f32.mrf.mxu1  ;;  %v5762_v51 = vpop.f32.mrf.mxu0 }
0x1803   :  { %v5852_v3 = vcombine.low %v5670_v26, %v5762_v51  ;;  %v5853_v30 = vcombine.high %v5670_v26, %v5762_v51  ;;  %v8424_v63 = vrot.slane %v5936_v7, %v7382_v52  ;;  %v5960_v47 = vrot.slane %v5952_v1, %v7382_v52 }
0x1804   :  { %v5716_v53 = vpop.f32.mrf.mxu1  ;;  %v6956_v5 = vpop.f32.mrf.mxu0  ;;  %v5951_v39 = vrot.slane %v5937_v61, %v7382_v52  ;;  %v5967_v41 = vrot.slane %v5953_v35, %v7382_v52 }
0x1805   :  { %v5836_v10 = vcombine.low %v5624_v42, %v5716_v53  ;;  %v5837_v54 = vcombine.high %v5624_v42, %v5716_v53  ;;  %v5968_v4 = vcombine.low %v8424_v63, %v5960_v47  ;;  %v5860_v24 = vrot.slane %v5852_v3, %v7379_v34 }
0x1806   :  { %v6950_v57 = vpop.f32.mrf.mxu1  ;;  %v5765_v16 = vpop.f32.mrf.mxu0  ;;  %v5867_v37 = vrot.slane %v5853_v30, %v7379_v34  ;;  %v5970_v14 = vcombine.low %v5951_v39, %v5967_v41  ;;  %v5971_v30 = vcombine.high %v5951_v39, %v5967_v41 }
0x1807   :  { %v5844_v28 = vrot.slane %v5836_v10, %v7379_v34  ;;  %v5851_v17 = vrot.slane %v5837_v54, %v7379_v34 }
0x1808   :  { %v5719_v20 = vpop.f32.mrf.mxu1  ;;  %v6957_v23 = vpop.f32.mrf.mxu0 }
0x1809   :  { %v5868_v59 = vcombine.low %v5844_v28, %v5860_v24  ;;  %v5869_v25 = vcombine.high %v5844_v28, %v5860_v24  ;;  %v5884_v29 = vcombine.low %v5851_v17, %v5867_v37  ;;  %v5885_v60 = vcombine.high %v5851_v17, %v5867_v37 }
0x180a   :  { %v6951_v55 = vpop.f32.mrf.mxu1 }
0x180b   :  { %v5876_v18 = vrot.slane %v5868_v59, %v7382_v52  ;;  %v5883_v32 = vrot.slane %v5869_v25, %v7382_v52  ;;  %v5892_v33 = vrot.slane %v5884_v29, %v7382_v52  ;;  %v5899_v46 = vrot.slane %v5885_v60, %v7382_v52  ;;  %v7210_v29 = vld [vmem:[%s8520_s4 + $0x10] sm:$0xff]   ;;  %v7211_v60 = vld [vmem:[%s8520_s4 + $0x8] sm:$0xff]   ;;  %v7212_v55 = vld [vmem:[%s8520_s4] sm:$0xff]  }
0x180d   :  { %v5972_v44 = vcombine.low %v5876_v18, %v5883_v32  ;;  %v6447_v26 = vcombine.high %v5876_v18, %v5883_v32  ;;  %v5988_v31 = vcombine.low %v5892_v33, %v5899_v46  ;;  %v6448_v27 = vcombine.high %v5892_v33, %v5899_v46 }
0x180f   :  { %v5979_v43 = vrot.slane %v5972_v44, %v7379_v34  ;;  %v5987_v58 = vrot.slane %v6447_v26, %v7379_v34  ;;  %v5995_v42 = vrot.slane %v5988_v31, %v7379_v34  ;;  %v6003_v6 = vrot.slane %v6448_v27, %v7379_v34 }
0x1810   :  { %v5969_v34 = vcombine.high %v8424_v63, %v5960_v47 }
0x1811   :  { %v6005_v48 = vcombine.high %v5979_v43, %v5987_v58  ;;  %v6021_v49 = vcombine.high %v5995_v42, %v6003_v6  ;;  %v6004_v13 = vcombine.low %v5979_v43, %v5987_v58  ;;  %v6020_v50 = vcombine.low %v5995_v42, %v6003_v6 }
0x1813   :  { %v6019_v56 = vrot.slane %v6005_v48, %v7382_v52  ;;  %v6035_v62 = vrot.slane %v6021_v49, %v7382_v52  ;;  %v6012_v12 = vrot.slane %v6004_v13, %v7382_v52  ;;  %v6028_v45 = vrot.slane %v6020_v50, %v7382_v52 }
0x1815   :  { %v6038_v2 = vcombine.low %v6019_v56, %v6035_v62  ;;  %v6037_v7 = vcombine.high %v6012_v12, %v6028_v45  ;;  %v6036_v1 = vcombine.low %v6012_v12, %v6028_v45  ;;  %v6039_v3 = vcombine.high %v6019_v56, %v6035_v62 }
0x1817   :  { %v7044_v19 = vpack.i.bf16 %v6038_v2, %v5970_v14  ;;  %v7039_v51 = vpack.i.bf16 %v6037_v7, %v5969_v34  ;;  %v7049_v53 = vpack.i.bf16 %v6039_v3, %v5971_v30 }
0x1819   :  { %7045 = vrot.lane.b32.xlu1 %v7044_v19, %s7277_s3  ;;  %7040 = vrot.lane.b32.xlu0 %v7039_v51, %s7278_s14 }
0x181d   :  { %7050 = vrot.lane.b32.xlu1 %v7049_v53, %s7279_s15  ;;  %v7213_v53 = vld [vmem:[%s8522_s6] ss:$0 sm:$0xff]  ;;  %s7280_s15 = smov [#allocation5]  }
0x181e   :  { %s6308_s17 = sshll.u32 %s7280_s15, 4  ;;  %s6309_s17 = int_to_ptr.vmem [resolvable:$true] %s6308_s17 }
0x181f   :  { %s7235_s18 = scalar_lea.vmem %s6309_s17, 256  ;;  %p7240_p6 = scmp.lt.s32.totalorder %s6309_s17, %s6309_s17 }
0x1820   :  { %p7236_p5 = scmp.ne.s32.totalorder %s6309_s17, %s7235_s18  ;;  %p7241_p7 = scmp.lt.s32.totalorder %s7235_s18, %s7235_s18 }
0x1822   :  { %p7242_p8 = por %p7241_p7, %p7240_p6 }
0x1824   :  { %p7243_p9 = pnand %p7242_p8, %p7236_p5 }
0x188b   :  { %v7046_v5 = vpop.permute.xlu1 %7045  ;;  %v7041_v10 = vpop.permute.xlu0 %7040 }
0x188c   :  { %v7043_v52 = vunpack.i.h.bf16 %v7041_v10  ;;  %v7042_v54 = vunpack.i.l.bf16 %v7041_v10  ;;  %v7048_v57 = vunpack.i.h.bf16 %v7046_v5  ;;  %v7047_v16 = vunpack.i.l.bf16 %v7046_v5 }
0x188e   :  { %v6064_v63 = vsel %vm826_vm2, %v5968_v4, %v7042_v54  ;;  %v6065_v47 = vsel %vm826_vm2, %v6036_v1, %v7043_v52  ;;  %v7209_v4 = vld [vmem:[%s8520_s4 + $0x18] sm:$0xff]  }
0x188f   :  { %v7051_v24 = vpop.permute.xlu1 %7050  ;;  %v6066_v17 = vsel %vm1958_vm4, %v6064_v63, %v7047_v16  ;;  %v6067_v20 = vsel %vm1958_vm4, %v6065_v47, %v7048_v57 }
0x1890   :  { %v7053_v37 = vunpack.i.h.bf16 %v7051_v24  ;;  %v7052_v28 = vunpack.i.l.bf16 %v7051_v24 }
0x1892   :  { %v6068_v23 = vsel %vm1961_vm5, %v6066_v17, %v7052_v28  ;;  %v6069_v59 = vsel %vm1961_vm5, %v6067_v20, %v7053_v37 }
0x1893   :  { %v6070_v25 = vpack.c.bf16 %v6069_v59, %v6068_v23 }
0x1895   :  { %6963 = vmatmul.mubr.msk.bf16.vlgmr.msra.gmra.mxu1 %vm127_vm1, %v6070_v25 }
0x1896   :  { %6975 = vmatpush3.bf16.msra.mxu1 %v7209_v4  ;;  %6982 = vmatprep.mubr.msk.bf16.mxu1 %vm7263_vm0, %v7262_v0 }
0x1897   :  { %6976 = vmatprep.subr.bf16.mxu1 %v7262_v0 }
0x189a   :  { %6977 = vmatpush3.bf16.msra.mxu1 %v7210_v29 }
0x189b   :  { %6978 = vmatprep.subr.bf16.mxu1 %v7262_v0 }
0x189e   :  { %6979 = vmatpush3.bf16.msra.mxu1 %v7211_v60 }
0x189f   :  { %6980 = vmatprep.subr.bf16.mxu1 %v7262_v0 }
0x18a2   :  { %6981 = vmatpush3.bf16.msra.mxu1 %v7212_v55 }
0x1955   :  { %v6108_v18 = vpop.f32.mrf.mxu1 }
0x1956   :  { %v6109_v32 = vadd.f32 %v6108_v18, %v7690_v22 }
0x1957   :  { %v6964_v33 = vpop.f32.mrf.mxu1 }
0x1958   :  { %v6115_v46 = vadd.f32 %v6109_v32, %v8143_v38 }
0x1959   :  { %v6111_v61 = vpop.f32.mrf.mxu1 }
0x195a   :  { %v6112_v35 = vadd.f32 %v6111_v61, %v7690_v22  ;;  %v6117_v44 = vsel %vm127_vm1, %v6115_v46, 0.0 }
0x195b   :  { %6118 = vadd.xlane.f32.xlu0 %v6117_v44  ;;  %v6965_v26 = vpop.f32.mrf.mxu1 }
0x195c   :  { %v6116_v0 = vadd.f32 %v6112_v35, %v8146_v40 }
0x195e   :  { %v6120_v31 = vsel %vm127_vm1, %v6116_v0, 0.0 }
0x195f   :  { %6121 = vadd.xlane.f32.xlu1 %v6120_v31 }
0x19e4   :  { %v6119_v27 = vpop.xlane.xlu0 %6118 }
0x19e5   :  { %v6123_v43 = vmul.f32 0.03125, %v6119_v27 }
0x19e7   :  { %v6125_v58 = vsub.f32 %v6115_v46, %v6123_v43 }
0x19e8   :  { %v6122_v42 = vpop.xlane.xlu1 %6121 }
0x19e9   :  { %v6124_v6 = vmul.f32 0.03125, %v6122_v42  ;;  %v6127_v39 = vmul.f32 %v6125_v58, %v6125_v58 }
0x19eb   :  { %v6126_v41 = vsub.f32 %v6116_v0, %v6124_v6  ;;  %v6129_v38 = vsel %vm127_vm1, %v6127_v39, 0.0 }
0x19ec   :  { %6130 = vadd.xlane.f32.xlu0 %v6129_v38 }
0x19ed   :  { %v6128_v22 = vmul.f32 %v6126_v41, %v6126_v41 }
0x19ef   :  { %v6132_v48 = vsel %vm127_vm1, %v6128_v22, 0.0 }
0x19f0   :  { %6133 = vadd.xlane.f32.xlu0 %v6132_v48 }
0x1a75   :  { %v6131_v49 = vpop.xlane.xlu0 %6130 }
0x1a76   :  { %v6135_v13 = vmul.f32 0.03125, %v6131_v49 }
0x1a78   :  { %v6137_v40 = vadd.f32 1e-05, %v6135_v13 }
0x1a79   :  { %v6134_v50 = vpop.xlane.xlu0 %6133 }
0x1a7a   :  { %7176 = vrsqrt.f32 %v6137_v40  ;;  %v6136_v56 = vmul.f32 0.03125, %v6134_v50 }
0x1a7c   :  { %v6138_v62 = vadd.f32 1e-05, %v6136_v56 }
0x1a7e   :  { %7178 = vrsqrt.f32 %v6138_v62 }
0x1a87   :  { %v7177_v12 = vpop.eup %7176 }
0x1a88   :  { %v6141_v45 = vmul.f32 %v7177_v12, %v6125_v58 }
0x1a8a   :  { %v6143_v2 = vmul.f32 %v6141_v45, %v7712_v8 }
0x1a8b   :  { %v7179_v14 = vpop.eup %7178 }
0x1a8c   :  { %v6142_v34 = vmul.f32 %v7179_v14, %v6126_v41  ;;  %v6145_v1 = vadd.f32 %v6143_v2, %v7716_v15 }
0x1a8e   :  { %v6144_v7 = vmul.f32 %v6142_v34, %v7712_v8 }
0x1a90   :  { %v6146_v19 = vadd.f32 %v6144_v7, %v7716_v15 }
0x1a92   :  { %v6147_v51 = vpack.c.bf16 %v6146_v19, %v6145_v1 }
0x1a94   :  { %6971 = vmatmul.mubr.msk.bf16.vlgmr.msra.gmra.mxu0 %vm127_vm1, %v6147_v51  ;;  %v108_v51 = vsub.s32 6, %v7374_v21 }
0x1b54   :  { %v6185_v3 = vpop.f32.mrf.mxu0 }
0x1b55   :  { %v6186_v5 = vadd.f32 %v7213_v53, %v6185_v3  ;;  %v112_v3 = vsub.s32 7, %v7374_v21 }
0x1b56   :  { %v6972_v30 = vpop.f32.mrf.mxu0 }
0x1b57   :  { %v6192_v57 = vmax.f32 %v6186_v5, 0.0  ;;  %v7214_v30 = vld [vmem:[%s8523_s7] sm:$0xff] }
0x1b58   :  { %v6188_v10 = vpop.f32.mrf.mxu0 }
0x1b59   :  { %v6189_v52 = vadd.f32 %v7213_v53, %v6188_v10  ;;  %v109_v53 = vrot.slane %v7214_v30, %v108_v51 }
0x1b5a   :  { %v6973_v54 = vpop.f32.mrf.mxu0 }
0x1b5b   :  { %v6193_v16 = vmax.f32 %v6189_v52, 0.0  ;;  %v113_v52 = vrot.slane %v7214_v30, %v112_v3 }
0x1b5d   :  { %v6194_v8 = vpack.c.bf16 %v6193_v16, %v6192_v57 }
0x1b5f   :  { %6983 = vmatmul.mubr.msk.bf16.vlgmr.msra.gmra.mxu1 %vm2138_vm6, %v6194_v8 }
0x1c1f   :  { %v6232_v63 = vpop.f32.mrf.mxu1 }
0x1c20   :  { %v6233_v15 = vadd.f32 %v6232_v63, %v7753_v36 }
0x1c21   :  { %v6984_v47 = vpop.f32.mrf.mxu1 }
0x1c22   :  { %v6239_v24 = vadd.f32 %v6233_v15, %v6145_v1 }
0x1c23   :  { %v6235_v37 = vpop.f32.mrf.mxu1 }
0x1c24   :  { %v6236_v28 = vadd.f32 %v6235_v37, %v7753_v36  ;;  %v6241_v17 = vsel %vm127_vm1, %v6239_v24, 0.0 }
0x1c25   :  { %6242 = vadd.xlane.f32.xlu1 %v6241_v17  ;;  %v6985_v20 = vpop.f32.mrf.mxu1 }
0x1c26   :  { %v6240_v23 = vadd.f32 %v6236_v28, %v6146_v19 }
0x1c28   :  { %v6244_v59 = vsel %vm127_vm1, %v6240_v23, 0.0 }
0x1c29   :  { %6245 = vadd.xlane.f32.xlu0 %v6244_v59 }
0x1cae   :  { %v6243_v25 = vpop.xlane.xlu1 %6242 }
0x1caf   :  { %v6247_v4 = vmul.f32 0.03125, %v6243_v25 }
0x1cb1   :  { %v6249_v29 = vsub.f32 %v6239_v24, %v6247_v4 }
0x1cb2   :  { %v6246_v60 = vpop.xlane.xlu0 %6245 }
0x1cb3   :  { %v6248_v55 = vmul.f32 0.03125, %v6246_v60  ;;  %v6251_v18 = vmul.f32 %v6249_v29, %v6249_v29 }
0x1cb5   :  { %v6250_v32 = vsub.f32 %v6240_v23, %v6248_v55  ;;  %v6253_v33 = vsel %vm127_vm1, %v6251_v18, 0.0 }
0x1cb6   :  { %6254 = vadd.xlane.f32.xlu1 %v6253_v33 }
0x1cb7   :  { %v6252_v46 = vmul.f32 %v6250_v32, %v6250_v32 }
0x1cb9   :  { %v6256_v36 = vsel %vm127_vm1, %v6252_v46, 0.0 }
0x1cba   :  { %6257 = vadd.xlane.f32.xlu0 %v6256_v36 }
0x1d3f   :  { %v6255_v61 = vpop.xlane.xlu1 %6254 }
0x1d40   :  { %v6259_v35 = vmul.f32 0.03125, %v6255_v61 }
0x1d42   :  { %v6261_v44 = vadd.f32 1e-05, %v6259_v35 }
0x1d43   :  { %v6258_v26 = vpop.xlane.xlu0 %6257 }
0x1d44   :  { %7180 = vrsqrt.f32 %v6261_v44  ;;  %v6260_v0 = vmul.f32 0.03125, %v6258_v26 }
0x1d46   :  { %v6262_v31 = vadd.f32 1e-05, %v6260_v0 }
0x1d48   :  { %7182 = vrsqrt.f32 %v6262_v31 }
0x1d51   :  { %v7181_v27 = vpop.eup %7180 }
0x1d52   :  { %v6265_v43 = vmul.f32 %v7181_v27, %v6249_v29 }
0x1d54   :  { %v6267_v58 = vmul.f32 %v6265_v43, %v7763_v9 }
0x1d55   :  { %v7183_v42 = vpop.eup %7182 }
0x1d56   :  { %v6269_v6 = vadd.f32 %v6267_v58, %v7767_v11  ;;  %v6266_v39 = vmul.f32 %v7183_v42, %v6250_v32 }
0x1d58   :  { %v6271_v41 = vsel %vm127_vm1, %v6269_v6, 0.0  ;;  %v6268_v38 = vmul.f32 %v6266_v39, %v7763_v9 }
0x1d59   :  { %6272 = vadd.xlane.f32.xlu1 %v6271_v41 }
0x1d5a   :  { %v6270_v22 = vadd.f32 %v6268_v38, %v7767_v11 }
0x1d5c   :  { %v6274_v48 = vsel %vm127_vm1, %v6270_v22, 0.0 }
0x1d5d   :  { %6275 = vadd.xlane.f32.xlu0 %v6274_v48 }
0x1de2   :  { %v6273_v49 = vpop.xlane.xlu1 %6272 }
0x1de3   :  { %v6277_v13 = vmul.f32 0.03125, %v6273_v49 }
0x1de5   :  { %v6279_v40 = vsub.f32 %v6269_v6, %v6277_v13 }
0x1de6   :  { %v6276_v50 = vpop.xlane.xlu0 %6275 }
0x1de7   :  { %v6278_v56 = vmul.f32 0.03125, %v6276_v50  ;;  %v6281_v62 = vmul.f32 %v6279_v40, %v6279_v40 }
0x1de9   :  { %v6280_v12 = vsub.f32 %v6270_v22, %v6278_v56  ;;  %v6283_v45 = vsel %vm127_vm1, %v6281_v62, 0.0 }
0x1dea   :  { %6284 = vadd.xlane.f32.xlu1 %v6283_v45 }
0x1deb   :  { %v6282_v14 = vmul.f32 %v6280_v12, %v6280_v12 }
0x1ded   :  { %v6286_v2 = vsel %vm127_vm1, %v6282_v14, 0.0 }
0x1dee   :  { %6287 = vadd.xlane.f32.xlu0 %v6286_v2 }
0x1e73   :  { %v6285_v9 = vpop.xlane.xlu1 %6284 }
0x1e74   :  { %v6289_v34 = vmul.f32 0.03125, %v6285_v9 }
0x1e76   :  { %v6291_v11 = vadd.f32 1e-05, %v6289_v34 }
0x1e77   :  { %v6288_v7 = vpop.xlane.xlu0 %6287 }
0x1e78   :  { %7184 = vrsqrt.f32 %v6291_v11  ;;  %v6290_v1 = vmul.f32 0.03125, %v6288_v7 }
0x1e7a   :  { %v6292_v19 = vadd.f32 1e-05, %v6290_v1 }
0x1e7c   :  { %7186 = vrsqrt.f32 %v6292_v19 }
0x1e85   :  { %v7185_v5 = vpop.eup %7184 }
0x1e86   :  { %v6295_v10 = vmul.f32 %v7185_v5, %v6279_v40 }
0x1e88   :  { %v6297_v54 = vmul.f32 %v6295_v10, %v109_v53 }
0x1e89   :  { %v7187_v57 = vpop.eup %7186 }
0x1e8a   :  { %v6296_v16 = vmul.f32 %v7187_v57, %v6280_v12  ;;  %v6299_v8 = vadd.f32 %v6297_v54, %v113_v52 }
0x1e8c   :  { %v6298_v63 = vmul.f32 %v6296_v16, %v109_v53  ;;  %6301 = vst.msk [vmem:[#allocation5] sm:$0xff] %vm127_vm1, %v6299_v8 }
0x1e8e   :  { %v6300_v15 = vadd.f32 %v6298_v63, %v113_v52 }
0x1e90   :  { %6302 = vst.msk [vmem:[#allocation5 + $0x8] sm:$0xff] %vm127_vm1, %v6300_v15 }
0x1e91   :  { %7246 = shalt.err (!%p7243_p9)
}
0x1e92   :  { %s7281_s7 = smov 128  }
0x1e93   :  { %6314 = dma.vmem_to_hbm [thread:$0]  %s6309_s17, 256, %s8524_s8, [#allocation4], %s7281_s7, %s7281_s7, %s7278_s14  }
0x1e94   :  { %7257 = dma.done.wait [#allocation4], 256  }
0x1e95   :  { %7258 = vsyncadd [#allocation4], 4294967040 }
0x1e96   :  { %6318 = vsyncpa [#allocation3], 1 }
0x1e97   :  { %6319 = vsyncpa [#allocation4], 1 }

</bundles_post_ra>
